<compile_context>
chip_gen: v7x
topology: tpu7x:2x2x1
jax: 0.10.0
libtpu: 0.0.40
codegen_flags: <defaults>
</compile_context>

<pallas_src>
import jax
import jax.numpy as jnp
from jax import lax
from jax.experimental import pallas as pl
from jax.experimental.pallas import tpu as pltpu
import numpy as np


def _upconv_concat_kernel(x1u_ref, x2_ref, w_ref, out_ref):
    # x1u_ref: (1, Cin, H, W)      nearest-upsampled x1 (NCHW), one batch elem
    # x2_ref : (1, C2,  H, W)
    # w_ref  : (Cout*Cin*3*3,)     conv weight, flattened row-major, in SMEM
    # out_ref: (1, Cout+C2, H, W)
    _, Cin, H, W = x1u_ref.shape
    C2 = x2_ref.shape[1]
    Cout = out_ref.shape[1] - C2

    # Border-validity masks for the 8 off-center taps: this realizes the
    # 3x3 / pad=1 zero padding in-kernel (no wrapper jnp.pad).
    ry = lax.broadcasted_iota(jnp.int32, (H, W), 0)
    cx = lax.broadcasted_iota(jnp.int32, (H, W), 1)
    valid = {}
    for oy in (-1, 0, 1):
        for ox in (-1, 0, 1):
            m = None
            if oy == -1:
                m = ry >= 1
            elif oy == 1:
                m = ry < H - 1
            if ox == -1:
                mc = cx >= 1
                m = mc if m is None else m & mc
            elif ox == 1:
                mc = cx < W - 1
                m = mc if m is None else m & mc
            valid[(oy, ox)] = m  # None for the center tap

    def shifted_tap(x2d, oy, ox):
        # result[y, x] = x2d[y+oy, x+ox], 0 outside the image.
        v = x2d
        if ox != 0:
            v = pltpu.roll(v, (-ox) % W, 1)   # lane-axis rotate (XLU slot)
        if oy != 0:
            v = pltpu.roll(v, (-oy) % H, 0)   # sublane-axis rotate (XLU slot)
        m = valid[(oy, ox)]
        if m is not None:
            v = jnp.where(m, v, 0.0)
        return v

    # 3x3 conv accumulated in f32 on the VPU with scalar weights from SMEM.
    # Each shifted tap is computed once and reused across all Cout outputs.
    accs = [jnp.zeros((H, W), jnp.float32) for _ in range(Cout)]
    for ci in range(Cin):
        x_ci = x1u_ref[0, ci, :, :].astype(jnp.float32)            # (H, W)
        for ky in range(3):
            for kx in range(3):
                tap = shifted_tap(x_ci, ky - 1, kx - 1)
                for co in range(Cout):
                    wv = w_ref[((co * Cin + ci) * 3 + ky) * 3 + kx]
                    accs[co] = accs[co] + wv * tap

    # Disjoint channel-slice stores (channel axis is leading/untiled -> no
    # concat intermediate, no lane-masked partial stores).
    for co in range(Cout):
        out_ref[0, co, :, :] = accs[co].astype(out_ref.dtype)
    out_ref[0, Cout:Cout + C2, :, :] = x2_ref[0, :, :, :]


def _nearest_upsample_nchw(x1, H2, W2):
    """PyTorch F.interpolate(mode='nearest') to (H2, W2), NCHW, no HBM gather
    for integer scale factors."""
    N, C, H1, W1 = x1.shape
    if H2 % H1 == 0 and W2 % W1 == 0:
        sh, sw = H2 // H1, W2 // W1
        return jnp.broadcast_to(
            x1[:, :, :, None, :, None], (N, C, H1, sh, W1, sw)
        ).reshape(N, C, H2, W2)
    # General case: src = floor(dst * in/out), clamped to in-1 (static indices).
    hi = np.minimum(np.floor(np.arange(H2) * (H1 / H2)), H1 - 1).astype(np.int32)
    wi = np.minimum(np.floor(np.arange(W2) * (W1 / W2)), W1 - 1).astype(np.int32)
    return jnp.take(jnp.take(x1, jnp.asarray(hi), axis=2), jnp.asarray(wi), axis=3)


def upsample_and_concat(x1, x2, weight):
    """Forward pass of the PyTorch module.

    x1:     (N, Cin, H1, W1)
    x2:     (N, C2,  H2, W2)
    weight: (Cout, Cin, 3, 3)   (nn.Conv2d weight, bias=False)
    returns (N, Cout + C2, H2, W2)   in NCHW, same dtype as x1/x2.
    """
    N, Cin, H1, W1 = x1.shape
    N2, C2, H2, W2 = x2.shape
    assert N == N2
    assert x1.dtype == x2.dtype, "x1 and x2 must share a dtype"
    Cout = weight.shape[0]
    assert weight.shape == (Cout, Cin, 3, 3)

    x1_up = _nearest_upsample_nchw(x1, H2, W2)           # (N, Cin, H2, W2)
    w_flat = weight.astype(jnp.float32).reshape(-1)      # scalars -> SMEM

    return pl.pallas_call(
        _upconv_concat_kernel,
        out_shape=jax.ShapeDtypeStruct((N, Cout + C2, H2, W2), x1.dtype),
        grid_spec=pltpu.PrefetchScalarGridSpec(
            num_scalar_prefetch=0,
            grid=(N,),
            in_specs=[
                pl.BlockSpec((1, Cin, H2, W2), lambda n: (n, 0, 0, 0)),
                pl.BlockSpec((1, C2, H2, W2), lambda n: (n, 0, 0, 0)),
                pl.BlockSpec(memory_space=pltpu.MemorySpace.SMEM),
            ],
            out_specs=pl.BlockSpec(
                (1, Cout + C2, H2, W2), lambda n: (n, 0, 0, 0)
            ),
        ),
        compiler_params=pltpu.CompilerParams(
            dimension_semantics=("parallel",),
            vmem_limit_bytes=64 * 1024 * 1024,
        ),
    )(x1_up, x2, w_flat)


def _reference(x1, x2, weight):
    """Pure-JAX reference (lax conv) mirroring the PyTorch forward."""
    _, _, H2, W2 = x2.shape
    x1_up = _nearest_upsample_nchw(x1, H2, W2)
    conv = lax.conv_general_dilated(
        x1_up, weight, window_strides=(1, 1), padding=((1, 1), (1, 1)),
        dimension_numbers=("NCHW", "OIHW", "NCHW"),
    )
    return jnp.concatenate([conv, x2], axis=1)


if __name__ == "__main__":
    key = jax.random.PRNGKey(0)
    k1, k2, k3 = jax.random.split(key, 3)

    # in_nc = 4 (channels of x1), out_nc = 4, x2 has 6 channels.
    N, Cin, H1, W1 = 2, 4, 8, 8
    C2, H2, W2 = 6, 16, 16
    Cout = 4

    x1 = jax.random.normal(k1, (N, Cin, H1, W1), dtype=jnp.float32)
    x2 = jax.random.normal(k2, (N, C2, H2, W2), dtype=jnp.float32)
    fan_in = Cin * 3 * 3
    weight = jax.random.normal(k3, (Cout, Cin, 3, 3), dtype=jnp.float32)
    weight = weight * (2.0 / fan_in) ** 0.5

    fn = jax.jit(upsample_and_concat)
    out = jax.block_until_ready(fn(x1, x2, weight))

    ref = _reference(x1, x2, weight)
    assert out.shape == (N, Cout + C2, H2, W2)
    np.testing.assert_allclose(np.asarray(out), np.asarray(ref),
                               rtol=1e-5, atol=1e-5)

    print("KERNEL_OK")
</pallas_src>

<mosaic_0001>
module attributes {stable_mosaic.version = 11 : i64} {
  func.func @_upconv_concat_kernel(%arg0: i32, %arg1: memref<1x4x16x16xf32, #tpu.memory_space<vmem>>, %arg2: memref<1x6x16x16xf32, #tpu.memory_space<vmem>>, %arg3: memref<144xf32, #tpu.memory_space<smem>>, %arg4: memref<1x10x16x16xf32, #tpu.memory_space<vmem>>) attributes {dimension_semantics = [#tpu.dimension_semantics<parallel>], iteration_bounds = array<i64: 2>, scalar_prefetch = 0 : i64, scratch_operands = 0 : i64, tpu.core_type = #tpu.core_type<tc>, window_params = [{transform_indices = @transform_0, window_bounds = array<i64: 1, 4, 16, 16>}, {transform_indices = @transform_1, window_bounds = array<i64: 1, 6, 16, 16>}, {transform_indices = @transform_2, window_bounds = array<i64: 144>}, {transform_indices = @transform_3, window_bounds = array<i64: 1, 10, 16, 16>}]} {
    %0 = tpu.iota {dimensions = array<i32: 0>} : vector<16x16xi32>
    %1 = tpu.iota {dimensions = array<i32: 1>} : vector<16x16xi32>
    %c1_i32 = arith.constant 1 : i32
    %2 = vector.broadcast %c1_i32 : i32 to vector<16x16xi32>
    %3 = arith.cmpi sge, %0, %2 : vector<16x16xi32>
    %c1_i32_0 = arith.constant 1 : i32
    %4 = vector.broadcast %c1_i32_0 : i32 to vector<16x16xi32>
    %5 = arith.cmpi sge, %1, %4 : vector<16x16xi32>
    %6 = arith.andi %3, %5 : vector<16x16xi1>
    %c1_i32_1 = arith.constant 1 : i32
    %7 = vector.broadcast %c1_i32_1 : i32 to vector<16x16xi32>
    %8 = arith.cmpi sge, %0, %7 : vector<16x16xi32>
    %c1_i32_2 = arith.constant 1 : i32
    %9 = vector.broadcast %c1_i32_2 : i32 to vector<16x16xi32>
    %10 = arith.cmpi sge, %0, %9 : vector<16x16xi32>
    %c15_i32 = arith.constant 15 : i32
    %11 = vector.broadcast %c15_i32 : i32 to vector<16x16xi32>
    %12 = arith.cmpi slt, %1, %11 : vector<16x16xi32>
    %13 = arith.andi %10, %12 : vector<16x16xi1>
    %c1_i32_3 = arith.constant 1 : i32
    %14 = vector.broadcast %c1_i32_3 : i32 to vector<16x16xi32>
    %15 = arith.cmpi sge, %1, %14 : vector<16x16xi32>
    %c15_i32_4 = arith.constant 15 : i32
    %16 = vector.broadcast %c15_i32_4 : i32 to vector<16x16xi32>
    %17 = arith.cmpi slt, %1, %16 : vector<16x16xi32>
    %c15_i32_5 = arith.constant 15 : i32
    %18 = vector.broadcast %c15_i32_5 : i32 to vector<16x16xi32>
    %19 = arith.cmpi slt, %0, %18 : vector<16x16xi32>
    %c1_i32_6 = arith.constant 1 : i32
    %20 = vector.broadcast %c1_i32_6 : i32 to vector<16x16xi32>
    %21 = arith.cmpi sge, %1, %20 : vector<16x16xi32>
    %22 = arith.andi %19, %21 : vector<16x16xi1>
    %c15_i32_7 = arith.constant 15 : i32
    %23 = vector.broadcast %c15_i32_7 : i32 to vector<16x16xi32>
    %24 = arith.cmpi slt, %0, %23 : vector<16x16xi32>
    %c15_i32_8 = arith.constant 15 : i32
    %25 = vector.broadcast %c15_i32_8 : i32 to vector<16x16xi32>
    %26 = arith.cmpi slt, %0, %25 : vector<16x16xi32>
    %c15_i32_9 = arith.constant 15 : i32
    %27 = vector.broadcast %c15_i32_9 : i32 to vector<16x16xi32>
    %28 = arith.cmpi slt, %1, %27 : vector<16x16xi32>
    %29 = arith.andi %26, %28 : vector<16x16xi1>
    %cst = arith.constant 0.000000e+00 : f32
    %30 = vector.broadcast %cst : f32 to vector<16x16xf32>
    %cst_10 = arith.constant 0.000000e+00 : f32
    %31 = vector.broadcast %cst_10 : f32 to vector<16x16xf32>
    %cst_11 = arith.constant 0.000000e+00 : f32
    %32 = vector.broadcast %cst_11 : f32 to vector<16x16xf32>
    %cst_12 = arith.constant 0.000000e+00 : f32
    %33 = vector.broadcast %cst_12 : f32 to vector<16x16xf32>
    %c0 = arith.constant 0 : index
    %c0_13 = arith.constant 0 : index
    %c0_14 = arith.constant 0 : index
    %c0_15 = arith.constant 0 : index
    %34 = vector.load %arg1[%c0, %c0_13, %c0_14, %c0_15] : memref<1x4x16x16xf32, #tpu.memory_space<vmem>>, vector<1x1x16x16xf32>
    %35 = vector.shape_cast %34 : vector<1x1x16x16xf32> to vector<16x16xf32>
    %c1_i32_16 = arith.constant 1 : i32
    %36 = tpu.dynamic_rotate %35 by %c1_i32_16 dim 1 : vector<16x16xf32>, i32 -> vector<16x16xf32>
    %c1_i32_17 = arith.constant 1 : i32
    %37 = tpu.dynamic_rotate %36 by %c1_i32_17 dim 0 : vector<16x16xf32>, i32 -> vector<16x16xf32>
    %cst_18 = arith.constant 0.000000e+00 : f32
    %38 = vector.broadcast %cst_18 : f32 to vector<16x16xf32>
    %39 = arith.select %6, %37, %38 : vector<16x16xi1>, vector<16x16xf32>
    %c0_19 = arith.constant 0 : index
    %40 = memref.load %arg3[%c0_19] : memref<144xf32, #tpu.memory_space<smem>>
    %41 = vector.broadcast %40 : f32 to vector<16x16xf32>
    %42 = arith.mulf %41, %39 : vector<16x16xf32>
    %43 = arith.addf %30, %42 : vector<16x16xf32>
    %c36 = arith.constant 36 : index
    %44 = memref.load %arg3[%c36] : memref<144xf32, #tpu.memory_space<smem>>
    %45 = vector.broadcast %44 : f32 to vector<16x16xf32>
    %46 = arith.mulf %45, %39 : vector<16x16xf32>
    %47 = arith.addf %31, %46 : vector<16x16xf32>
    %c72 = arith.constant 72 : index
    %48 = memref.load %arg3[%c72] : memref<144xf32, #tpu.memory_space<smem>>
    %49 = vector.broadcast %48 : f32 to vector<16x16xf32>
    %50 = arith.mulf %49, %39 : vector<16x16xf32>
    %51 = arith.addf %32, %50 : vector<16x16xf32>
    %c108 = arith.constant 108 : index
    %52 = memref.load %arg3[%c108] : memref<144xf32, #tpu.memory_space<smem>>
    %53 = vector.broadcast %52 : f32 to vector<16x16xf32>
    %54 = arith.mulf %53, %39 : vector<16x16xf32>
    %55 = arith.addf %33, %54 : vector<16x16xf32>
    %c1_i32_20 = arith.constant 1 : i32
    %56 = tpu.dynamic_rotate %35 by %c1_i32_20 dim 0 : vector<16x16xf32>, i32 -> vector<16x16xf32>
    %cst_21 = arith.constant 0.000000e+00 : f32
    %57 = vector.broadcast %cst_21 : f32 to vector<16x16xf32>
    %58 = arith.select %8, %56, %57 : vector<16x16xi1>, vector<16x16xf32>
    %c1 = arith.constant 1 : index
    %59 = memref.load %arg3[%c1] : memref<144xf32, #tpu.memory_space<smem>>
    %60 = vector.broadcast %59 : f32 to vector<16x16xf32>
    %61 = arith.mulf %60, %58 : vector<16x16xf32>
    %62 = arith.addf %43, %61 : vector<16x16xf32>
    %c37 = arith.constant 37 : index
    %63 = memref.load %arg3[%c37] : memref<144xf32, #tpu.memory_space<smem>>
    %64 = vector.broadcast %63 : f32 to vector<16x16xf32>
    %65 = arith.mulf %64, %58 : vector<16x16xf32>
    %66 = arith.addf %47, %65 : vector<16x16xf32>
    %c73 = arith.constant 73 : index
    %67 = memref.load %arg3[%c73] : memref<144xf32, #tpu.memory_space<smem>>
    %68 = vector.broadcast %67 : f32 to vector<16x16xf32>
    %69 = arith.mulf %68, %58 : vector<16x16xf32>
    %70 = arith.addf %51, %69 : vector<16x16xf32>
    %c109 = arith.constant 109 : index
    %71 = memref.load %arg3[%c109] : memref<144xf32, #tpu.memory_space<smem>>
    %72 = vector.broadcast %71 : f32 to vector<16x16xf32>
    %73 = arith.mulf %72, %58 : vector<16x16xf32>
    %74 = arith.addf %55, %73 : vector<16x16xf32>
    %c15_i32_22 = arith.constant 15 : i32
    %75 = tpu.dynamic_rotate %35 by %c15_i32_22 dim 1 : vector<16x16xf32>, i32 -> vector<16x16xf32>
    %c1_i32_23 = arith.constant 1 : i32
    %76 = tpu.dynamic_rotate %75 by %c1_i32_23 dim 0 : vector<16x16xf32>, i32 -> vector<16x16xf32>
    %cst_24 = arith.constant 0.000000e+00 : f32
    %77 = vector.broadcast %cst_24 : f32 to vector<16x16xf32>
    %78 = arith.select %13, %76, %77 : vector<16x16xi1>, vector<16x16xf32>
    %c2 = arith.constant 2 : index
    %79 = memref.load %arg3[%c2] : memref<144xf32, #tpu.memory_space<smem>>
    %80 = vector.broadcast %79 : f32 to vector<16x16xf32>
    %81 = arith.mulf %80, %78 : vector<16x16xf32>
    %82 = arith.addf %62, %81 : vector<16x16xf32>
    %c38 = arith.constant 38 : index
    %83 = memref.load %arg3[%c38] : memref<144xf32, #tpu.memory_space<smem>>
    %84 = vector.broadcast %83 : f32 to vector<16x16xf32>
    %85 = arith.mulf %84, %78 : vector<16x16xf32>
    %86 = arith.addf %66, %85 : vector<16x16xf32>
    %c74 = arith.constant 74 : index
    %87 = memref.load %arg3[%c74] : memref<144xf32, #tpu.memory_space<smem>>
    %88 = vector.broadcast %87 : f32 to vector<16x16xf32>
    %89 = arith.mulf %88, %78 : vector<16x16xf32>
    %90 = arith.addf %70, %89 : vector<16x16xf32>
    %c110 = arith.constant 110 : index
    %91 = memref.load %arg3[%c110] : memref<144xf32, #tpu.memory_space<smem>>
    %92 = vector.broadcast %91 : f32 to vector<16x16xf32>
    %93 = arith.mulf %92, %78 : vector<16x16xf32>
    %94 = arith.addf %74, %93 : vector<16x16xf32>
    %c1_i32_25 = arith.constant 1 : i32
    %95 = tpu.dynamic_rotate %35 by %c1_i32_25 dim 1 : vector<16x16xf32>, i32 -> vector<16x16xf32>
    %cst_26 = arith.constant 0.000000e+00 : f32
    %96 = vector.broadcast %cst_26 : f32 to vector<16x16xf32>
    %97 = arith.select %15, %95, %96 : vector<16x16xi1>, vector<16x16xf32>
    %c3 = arith.constant 3 : index
    %98 = memref.load %arg3[%c3] : memref<144xf32, #tpu.memory_space<smem>>
    %99 = vector.broadcast %98 : f32 to vector<16x16xf32>
    %100 = arith.mulf %99, %97 : vector<16x16xf32>
    %101 = arith.addf %82, %100 : vector<16x16xf32>
    %c39 = arith.constant 39 : index
    %102 = memref.load %arg3[%c39] : memref<144xf32, #tpu.memory_space<smem>>
    %103 = vector.broadcast %102 : f32 to vector<16x16xf32>
    %104 = arith.mulf %103, %97 : vector<16x16xf32>
    %105 = arith.addf %86, %104 : vector<16x16xf32>
    %c75 = arith.constant 75 : index
    %106 = memref.load %arg3[%c75] : memref<144xf32, #tpu.memory_space<smem>>
    %107 = vector.broadcast %106 : f32 to vector<16x16xf32>
    %108 = arith.mulf %107, %97 : vector<16x16xf32>
    %109 = arith.addf %90, %108 : vector<16x16xf32>
    %c111 = arith.constant 111 : index
    %110 = memref.load %arg3[%c111] : memref<144xf32, #tpu.memory_space<smem>>
    %111 = vector.broadcast %110 : f32 to vector<16x16xf32>
    %112 = arith.mulf %111, %97 : vector<16x16xf32>
    %113 = arith.addf %94, %112 : vector<16x16xf32>
    %c4 = arith.constant 4 : index
    %114 = memref.load %arg3[%c4] : memref<144xf32, #tpu.memory_space<smem>>
    %115 = vector.broadcast %114 : f32 to vector<16x16xf32>
    %116 = arith.mulf %115, %35 : vector<16x16xf32>
    %117 = arith.addf %101, %116 : vector<16x16xf32>
    %c40 = arith.constant 40 : index
    %118 = memref.load %arg3[%c40] : memref<144xf32, #tpu.memory_space<smem>>
    %119 = vector.broadcast %118 : f32 to vector<16x16xf32>
    %120 = arith.mulf %119, %35 : vector<16x16xf32>
    %121 = arith.addf %105, %120 : vector<16x16xf32>
    %c76 = arith.constant 76 : index
    %122 = memref.load %arg3[%c76] : memref<144xf32, #tpu.memory_space<smem>>
    %123 = vector.broadcast %122 : f32 to vector<16x16xf32>
    %124 = arith.mulf %123, %35 : vector<16x16xf32>
    %125 = arith.addf %109, %124 : vector<16x16xf32>
    %c112 = arith.constant 112 : index
    %126 = memref.load %arg3[%c112] : memref<144xf32, #tpu.memory_space<smem>>
    %127 = vector.broadcast %126 : f32 to vector<16x16xf32>
    %128 = arith.mulf %127, %35 : vector<16x16xf32>
    %129 = arith.addf %113, %128 : vector<16x16xf32>
    %c15_i32_27 = arith.constant 15 : i32
    %130 = tpu.dynamic_rotate %35 by %c15_i32_27 dim 1 : vector<16x16xf32>, i32 -> vector<16x16xf32>
    %cst_28 = arith.constant 0.000000e+00 : f32
    %131 = vector.broadcast %cst_28 : f32 to vector<16x16xf32>
    %132 = arith.select %17, %130, %131 : vector<16x16xi1>, vector<16x16xf32>
    %c5 = arith.constant 5 : index
    %133 = memref.load %arg3[%c5] : memref<144xf32, #tpu.memory_space<smem>>
    %134 = vector.broadcast %133 : f32 to vector<16x16xf32>
    %135 = arith.mulf %134, %132 : vector<16x16xf32>
    %136 = arith.addf %117, %135 : vector<16x16xf32>
    %c41 = arith.constant 41 : index
    %137 = memref.load %arg3[%c41] : memref<144xf32, #tpu.memory_space<smem>>
    %138 = vector.broadcast %137 : f32 to vector<16x16xf32>
    %139 = arith.mulf %138, %132 : vector<16x16xf32>
    %140 = arith.addf %121, %139 : vector<16x16xf32>
    %c77 = arith.constant 77 : index
    %141 = memref.load %arg3[%c77] : memref<144xf32, #tpu.memory_space<smem>>
    %142 = vector.broadcast %141 : f32 to vector<16x16xf32>
    %143 = arith.mulf %142, %132 : vector<16x16xf32>
    %144 = arith.addf %125, %143 : vector<16x16xf32>
    %c113 = arith.constant 113 : index
    %145 = memref.load %arg3[%c113] : memref<144xf32, #tpu.memory_space<smem>>
    %146 = vector.broadcast %145 : f32 to vector<16x16xf32>
    %147 = arith.mulf %146, %132 : vector<16x16xf32>
    %148 = arith.addf %129, %147 : vector<16x16xf32>
    %c1_i32_29 = arith.constant 1 : i32
    %149 = tpu.dynamic_rotate %35 by %c1_i32_29 dim 1 : vector<16x16xf32>, i32 -> vector<16x16xf32>
    %c15_i32_30 = arith.constant 15 : i32
    %150 = tpu.dynamic_rotate %149 by %c15_i32_30 dim 0 : vector<16x16xf32>, i32 -> vector<16x16xf32>
    %cst_31 = arith.constant 0.000000e+00 : f32
    %151 = vector.broadcast %cst_31 : f32 to vector<16x16xf32>
    %152 = arith.select %22, %150, %151 : vector<16x16xi1>, vector<16x16xf32>
    %c6 = arith.constant 6 : index
    %153 = memref.load %arg3[%c6] : memref<144xf32, #tpu.memory_space<smem>>
    %154 = vector.broadcast %153 : f32 to vector<16x16xf32>
    %155 = arith.mulf %154, %152 : vector<16x16xf32>
    %156 = arith.addf %136, %155 : vector<16x16xf32>
    %c42 = arith.constant 42 : index
    %157 = memref.load %arg3[%c42] : memref<144xf32, #tpu.memory_space<smem>>
    %158 = vector.broadcast %157 : f32 to vector<16x16xf32>
    %159 = arith.mulf %158, %152 : vector<16x16xf32>
    %160 = arith.addf %140, %159 : vector<16x16xf32>
    %c78 = arith.constant 78 : index
    %161 = memref.load %arg3[%c78] : memref<144xf32, #tpu.memory_space<smem>>
    %162 = vector.broadcast %161 : f32 to vector<16x16xf32>
    %163 = arith.mulf %162, %152 : vector<16x16xf32>
    %164 = arith.addf %144, %163 : vector<16x16xf32>
    %c114 = arith.constant 114 : index
    %165 = memref.load %arg3[%c114] : memref<144xf32, #tpu.memory_space<smem>>
    %166 = vector.broadcast %165 : f32 to vector<16x16xf32>
    %167 = arith.mulf %166, %152 : vector<16x16xf32>
    %168 = arith.addf %148, %167 : vector<16x16xf32>
    %c15_i32_32 = arith.constant 15 : i32
    %169 = tpu.dynamic_rotate %35 by %c15_i32_32 dim 0 : vector<16x16xf32>, i32 -> vector<16x16xf32>
    %cst_33 = arith.constant 0.000000e+00 : f32
    %170 = vector.broadcast %cst_33 : f32 to vector<16x16xf32>
    %171 = arith.select %24, %169, %170 : vector<16x16xi1>, vector<16x16xf32>
    %c7 = arith.constant 7 : index
    %172 = memref.load %arg3[%c7] : memref<144xf32, #tpu.memory_space<smem>>
    %173 = vector.broadcast %172 : f32 to vector<16x16xf32>
    %174 = arith.mulf %173, %171 : vector<16x16xf32>
    %175 = arith.addf %156, %174 : vector<16x16xf32>
    %c43 = arith.constant 43 : index
    %176 = memref.load %arg3[%c43] : memref<144xf32, #tpu.memory_space<smem>>
    %177 = vector.broadcast %176 : f32 to vector<16x16xf32>
    %178 = arith.mulf %177, %171 : vector<16x16xf32>
    %179 = arith.addf %160, %178 : vector<16x16xf32>
    %c79 = arith.constant 79 : index
    %180 = memref.load %arg3[%c79] : memref<144xf32, #tpu.memory_space<smem>>
    %181 = vector.broadcast %180 : f32 to vector<16x16xf32>
    %182 = arith.mulf %181, %171 : vector<16x16xf32>
    %183 = arith.addf %164, %182 : vector<16x16xf32>
    %c115 = arith.constant 115 : index
    %184 = memref.load %arg3[%c115] : memref<144xf32, #tpu.memory_space<smem>>
    %185 = vector.broadcast %184 : f32 to vector<16x16xf32>
    %186 = arith.mulf %185, %171 : vector<16x16xf32>
    %187 = arith.addf %168, %186 : vector<16x16xf32>
    %c15_i32_34 = arith.constant 15 : i32
    %188 = tpu.dynamic_rotate %35 by %c15_i32_34 dim 1 : vector<16x16xf32>, i32 -> vector<16x16xf32>
    %c15_i32_35 = arith.constant 15 : i32
    %189 = tpu.dynamic_rotate %188 by %c15_i32_35 dim 0 : vector<16x16xf32>, i32 -> vector<16x16xf32>
    %cst_36 = arith.constant 0.000000e+00 : f32
    %190 = vector.broadcast %cst_36 : f32 to vector<16x16xf32>
    %191 = arith.select %29, %189, %190 : vector<16x16xi1>, vector<16x16xf32>
    %c8 = arith.constant 8 : index
    %192 = memref.load %arg3[%c8] : memref<144xf32, #tpu.memory_space<smem>>
    %193 = vector.broadcast %192 : f32 to vector<16x16xf32>
    %194 = arith.mulf %193, %191 : vector<16x16xf32>
    %195 = arith.addf %175, %194 : vector<16x16xf32>
    %c44 = arith.constant 44 : index
    %196 = memref.load %arg3[%c44] : memref<144xf32, #tpu.memory_space<smem>>
    %197 = vector.broadcast %196 : f32 to vector<16x16xf32>
    %198 = arith.mulf %197, %191 : vector<16x16xf32>
    %199 = arith.addf %179, %198 : vector<16x16xf32>
    %c80 = arith.constant 80 : index
    %200 = memref.load %arg3[%c80] : memref<144xf32, #tpu.memory_space<smem>>
    %201 = vector.broadcast %200 : f32 to vector<16x16xf32>
    %202 = arith.mulf %201, %191 : vector<16x16xf32>
    %203 = arith.addf %183, %202 : vector<16x16xf32>
    %c116 = arith.constant 116 : index
    %204 = memref.load %arg3[%c116] : memref<144xf32, #tpu.memory_space<smem>>
    %205 = vector.broadcast %204 : f32 to vector<16x16xf32>
    %206 = arith.mulf %205, %191 : vector<16x16xf32>
    %207 = arith.addf %187, %206 : vector<16x16xf32>
    %c0_37 = arith.constant 0 : index
    %c1_38 = arith.constant 1 : index
    %c0_39 = arith.constant 0 : index
    %c0_40 = arith.constant 0 : index
    %208 = vector.load %arg1[%c0_37, %c1_38, %c0_39, %c0_40] : memref<1x4x16x16xf32, #tpu.memory_space<vmem>>, vector<1x1x16x16xf32>
    %209 = vector.shape_cast %208 : vector<1x1x16x16xf32> to vector<16x16xf32>
    %c1_i32_41 = arith.constant 1 : i32
    %210 = tpu.dynamic_rotate %209 by %c1_i32_41 dim 1 : vector<16x16xf32>, i32 -> vector<16x16xf32>
    %c1_i32_42 = arith.constant 1 : i32
    %211 = tpu.dynamic_rotate %210 by %c1_i32_42 dim 0 : vector<16x16xf32>, i32 -> vector<16x16xf32>
    %cst_43 = arith.constant 0.000000e+00 : f32
    %212 = vector.broadcast %cst_43 : f32 to vector<16x16xf32>
    %213 = arith.select %6, %211, %212 : vector<16x16xi1>, vector<16x16xf32>
    %c9 = arith.constant 9 : index
    %214 = memref.load %arg3[%c9] : memref<144xf32, #tpu.memory_space<smem>>
    %215 = vector.broadcast %214 : f32 to vector<16x16xf32>
    %216 = arith.mulf %215, %213 : vector<16x16xf32>
    %217 = arith.addf %195, %216 : vector<16x16xf32>
    %c45 = arith.constant 45 : index
    %218 = memref.load %arg3[%c45] : memref<144xf32, #tpu.memory_space<smem>>
    %219 = vector.broadcast %218 : f32 to vector<16x16xf32>
    %220 = arith.mulf %219, %213 : vector<16x16xf32>
    %221 = arith.addf %199, %220 : vector<16x16xf32>
    %c81 = arith.constant 81 : index
    %222 = memref.load %arg3[%c81] : memref<144xf32, #tpu.memory_space<smem>>
    %223 = vector.broadcast %222 : f32 to vector<16x16xf32>
    %224 = arith.mulf %223, %213 : vector<16x16xf32>
    %225 = arith.addf %203, %224 : vector<16x16xf32>
    %c117 = arith.constant 117 : index
    %226 = memref.load %arg3[%c117] : memref<144xf32, #tpu.memory_space<smem>>
    %227 = vector.broadcast %226 : f32 to vector<16x16xf32>
    %228 = arith.mulf %227, %213 : vector<16x16xf32>
    %229 = arith.addf %207, %228 : vector<16x16xf32>
    %c1_i32_44 = arith.constant 1 : i32
    %230 = tpu.dynamic_rotate %209 by %c1_i32_44 dim 0 : vector<16x16xf32>, i32 -> vector<16x16xf32>
    %cst_45 = arith.constant 0.000000e+00 : f32
    %231 = vector.broadcast %cst_45 : f32 to vector<16x16xf32>
    %232 = arith.select %8, %230, %231 : vector<16x16xi1>, vector<16x16xf32>
    %c10 = arith.constant 10 : index
    %233 = memref.load %arg3[%c10] : memref<144xf32, #tpu.memory_space<smem>>
    %234 = vector.broadcast %233 : f32 to vector<16x16xf32>
    %235 = arith.mulf %234, %232 : vector<16x16xf32>
    %236 = arith.addf %217, %235 : vector<16x16xf32>
    %c46 = arith.constant 46 : index
    %237 = memref.load %arg3[%c46] : memref<144xf32, #tpu.memory_space<smem>>
    %238 = vector.broadcast %237 : f32 to vector<16x16xf32>
    %239 = arith.mulf %238, %232 : vector<16x16xf32>
    %240 = arith.addf %221, %239 : vector<16x16xf32>
    %c82 = arith.constant 82 : index
    %241 = memref.load %arg3[%c82] : memref<144xf32, #tpu.memory_space<smem>>
    %242 = vector.broadcast %241 : f32 to vector<16x16xf32>
    %243 = arith.mulf %242, %232 : vector<16x16xf32>
    %244 = arith.addf %225, %243 : vector<16x16xf32>
    %c118 = arith.constant 118 : index
    %245 = memref.load %arg3[%c118] : memref<144xf32, #tpu.memory_space<smem>>
    %246 = vector.broadcast %245 : f32 to vector<16x16xf32>
    %247 = arith.mulf %246, %232 : vector<16x16xf32>
    %248 = arith.addf %229, %247 : vector<16x16xf32>
    %c15_i32_46 = arith.constant 15 : i32
    %249 = tpu.dynamic_rotate %209 by %c15_i32_46 dim 1 : vector<16x16xf32>, i32 -> vector<16x16xf32>
    %c1_i32_47 = arith.constant 1 : i32
    %250 = tpu.dynamic_rotate %249 by %c1_i32_47 dim 0 : vector<16x16xf32>, i32 -> vector<16x16xf32>
    %cst_48 = arith.constant 0.000000e+00 : f32
    %251 = vector.broadcast %cst_48 : f32 to vector<16x16xf32>
    %252 = arith.select %13, %250, %251 : vector<16x16xi1>, vector<16x16xf32>
    %c11 = arith.constant 11 : index
    %253 = memref.load %arg3[%c11] : memref<144xf32, #tpu.memory_space<smem>>
    %254 = vector.broadcast %253 : f32 to vector<16x16xf32>
    %255 = arith.mulf %254, %252 : vector<16x16xf32>
    %256 = arith.addf %236, %255 : vector<16x16xf32>
    %c47 = arith.constant 47 : index
    %257 = memref.load %arg3[%c47] : memref<144xf32, #tpu.memory_space<smem>>
    %258 = vector.broadcast %257 : f32 to vector<16x16xf32>
    %259 = arith.mulf %258, %252 : vector<16x16xf32>
    %260 = arith.addf %240, %259 : vector<16x16xf32>
    %c83 = arith.constant 83 : index
    %261 = memref.load %arg3[%c83] : memref<144xf32, #tpu.memory_space<smem>>
    %262 = vector.broadcast %261 : f32 to vector<16x16xf32>
    %263 = arith.mulf %262, %252 : vector<16x16xf32>
    %264 = arith.addf %244, %263 : vector<16x16xf32>
    %c119 = arith.constant 119 : index
    %265 = memref.load %arg3[%c119] : memref<144xf32, #tpu.memory_space<smem>>
    %266 = vector.broadcast %265 : f32 to vector<16x16xf32>
    %267 = arith.mulf %266, %252 : vector<16x16xf32>
    %268 = arith.addf %248, %267 : vector<16x16xf32>
    %c1_i32_49 = arith.constant 1 : i32
    %269 = tpu.dynamic_rotate %209 by %c1_i32_49 dim 1 : vector<16x16xf32>, i32 -> vector<16x16xf32>
    %cst_50 = arith.constant 0.000000e+00 : f32
    %270 = vector.broadcast %cst_50 : f32 to vector<16x16xf32>
    %271 = arith.select %15, %269, %270 : vector<16x16xi1>, vector<16x16xf32>
    %c12 = arith.constant 12 : index
    %272 = memref.load %arg3[%c12] : memref<144xf32, #tpu.memory_space<smem>>
    %273 = vector.broadcast %272 : f32 to vector<16x16xf32>
    %274 = arith.mulf %273, %271 : vector<16x16xf32>
    %275 = arith.addf %256, %274 : vector<16x16xf32>
    %c48 = arith.constant 48 : index
    %276 = memref.load %arg3[%c48] : memref<144xf32, #tpu.memory_space<smem>>
    %277 = vector.broadcast %276 : f32 to vector<16x16xf32>
    %278 = arith.mulf %277, %271 : vector<16x16xf32>
    %279 = arith.addf %260, %278 : vector<16x16xf32>
    %c84 = arith.constant 84 : index
    %280 = memref.load %arg3[%c84] : memref<144xf32, #tpu.memory_space<smem>>
    %281 = vector.broadcast %280 : f32 to vector<16x16xf32>
    %282 = arith.mulf %281, %271 : vector<16x16xf32>
    %283 = arith.addf %264, %282 : vector<16x16xf32>
    %c120 = arith.constant 120 : index
    %284 = memref.load %arg3[%c120] : memref<144xf32, #tpu.memory_space<smem>>
    %285 = vector.broadcast %284 : f32 to vector<16x16xf32>
    %286 = arith.mulf %285, %271 : vector<16x16xf32>
    %287 = arith.addf %268, %286 : vector<16x16xf32>
    %c13 = arith.constant 13 : index
    %288 = memref.load %arg3[%c13] : memref<144xf32, #tpu.memory_space<smem>>
    %289 = vector.broadcast %288 : f32 to vector<16x16xf32>
    %290 = arith.mulf %289, %209 : vector<16x16xf32>
    %291 = arith.addf %275, %290 : vector<16x16xf32>
    %c49 = arith.constant 49 : index
    %292 = memref.load %arg3[%c49] : memref<144xf32, #tpu.memory_space<smem>>
    %293 = vector.broadcast %292 : f32 to vector<16x16xf32>
    %294 = arith.mulf %293, %209 : vector<16x16xf32>
    %295 = arith.addf %279, %294 : vector<16x16xf32>
    %c85 = arith.constant 85 : index
    %296 = memref.load %arg3[%c85] : memref<144xf32, #tpu.memory_space<smem>>
    %297 = vector.broadcast %296 : f32 to vector<16x16xf32>
    %298 = arith.mulf %297, %209 : vector<16x16xf32>
    %299 = arith.addf %283, %298 : vector<16x16xf32>
    %c121 = arith.constant 121 : index
    %300 = memref.load %arg3[%c121] : memref<144xf32, #tpu.memory_space<smem>>
    %301 = vector.broadcast %300 : f32 to vector<16x16xf32>
    %302 = arith.mulf %301, %209 : vector<16x16xf32>
    %303 = arith.addf %287, %302 : vector<16x16xf32>
    %c15_i32_51 = arith.constant 15 : i32
    %304 = tpu.dynamic_rotate %209 by %c15_i32_51 dim 1 : vector<16x16xf32>, i32 -> vector<16x16xf32>
    %cst_52 = arith.constant 0.000000e+00 : f32
    %305 = vector.broadcast %cst_52 : f32 to vector<16x16xf32>
    %306 = arith.select %17, %304, %305 : vector<16x16xi1>, vector<16x16xf32>
    %c14 = arith.constant 14 : index
    %307 = memref.load %arg3[%c14] : memref<144xf32, #tpu.memory_space<smem>>
    %308 = vector.broadcast %307 : f32 to vector<16x16xf32>
    %309 = arith.mulf %308, %306 : vector<16x16xf32>
    %310 = arith.addf %291, %309 : vector<16x16xf32>
    %c50 = arith.constant 50 : index
    %311 = memref.load %arg3[%c50] : memref<144xf32, #tpu.memory_space<smem>>
    %312 = vector.broadcast %311 : f32 to vector<16x16xf32>
    %313 = arith.mulf %312, %306 : vector<16x16xf32>
    %314 = arith.addf %295, %313 : vector<16x16xf32>
    %c86 = arith.constant 86 : index
    %315 = memref.load %arg3[%c86] : memref<144xf32, #tpu.memory_space<smem>>
    %316 = vector.broadcast %315 : f32 to vector<16x16xf32>
    %317 = arith.mulf %316, %306 : vector<16x16xf32>
    %318 = arith.addf %299, %317 : vector<16x16xf32>
    %c122 = arith.constant 122 : index
    %319 = memref.load %arg3[%c122] : memref<144xf32, #tpu.memory_space<smem>>
    %320 = vector.broadcast %319 : f32 to vector<16x16xf32>
    %321 = arith.mulf %320, %306 : vector<16x16xf32>
    %322 = arith.addf %303, %321 : vector<16x16xf32>
    %c1_i32_53 = arith.constant 1 : i32
    %323 = tpu.dynamic_rotate %209 by %c1_i32_53 dim 1 : vector<16x16xf32>, i32 -> vector<16x16xf32>
    %c15_i32_54 = arith.constant 15 : i32
    %324 = tpu.dynamic_rotate %323 by %c15_i32_54 dim 0 : vector<16x16xf32>, i32 -> vector<16x16xf32>
    %cst_55 = arith.constant 0.000000e+00 : f32
    %325 = vector.broadcast %cst_55 : f32 to vector<16x16xf32>
    %326 = arith.select %22, %324, %325 : vector<16x16xi1>, vector<16x16xf32>
    %c15 = arith.constant 15 : index
    %327 = memref.load %arg3[%c15] : memref<144xf32, #tpu.memory_space<smem>>
    %328 = vector.broadcast %327 : f32 to vector<16x16xf32>
    %329 = arith.mulf %328, %326 : vector<16x16xf32>
    %330 = arith.addf %310, %329 : vector<16x16xf32>
    %c51 = arith.constant 51 : index
    %331 = memref.load %arg3[%c51] : memref<144xf32, #tpu.memory_space<smem>>
    %332 = vector.broadcast %331 : f32 to vector<16x16xf32>
    %333 = arith.mulf %332, %326 : vector<16x16xf32>
    %334 = arith.addf %314, %333 : vector<16x16xf32>
    %c87 = arith.constant 87 : index
    %335 = memref.load %arg3[%c87] : memref<144xf32, #tpu.memory_space<smem>>
    %336 = vector.broadcast %335 : f32 to vector<16x16xf32>
    %337 = arith.mulf %336, %326 : vector<16x16xf32>
    %338 = arith.addf %318, %337 : vector<16x16xf32>
    %c123 = arith.constant 123 : index
    %339 = memref.load %arg3[%c123] : memref<144xf32, #tpu.memory_space<smem>>
    %340 = vector.broadcast %339 : f32 to vector<16x16xf32>
    %341 = arith.mulf %340, %326 : vector<16x16xf32>
    %342 = arith.addf %322, %341 : vector<16x16xf32>
    %c15_i32_56 = arith.constant 15 : i32
    %343 = tpu.dynamic_rotate %209 by %c15_i32_56 dim 0 : vector<16x16xf32>, i32 -> vector<16x16xf32>
    %cst_57 = arith.constant 0.000000e+00 : f32
    %344 = vector.broadcast %cst_57 : f32 to vector<16x16xf32>
    %345 = arith.select %24, %343, %344 : vector<16x16xi1>, vector<16x16xf32>
    %c16 = arith.constant 16 : index
    %346 = memref.load %arg3[%c16] : memref<144xf32, #tpu.memory_space<smem>>
    %347 = vector.broadcast %346 : f32 to vector<16x16xf32>
    %348 = arith.mulf %347, %345 : vector<16x16xf32>
    %349 = arith.addf %330, %348 : vector<16x16xf32>
    %c52 = arith.constant 52 : index
    %350 = memref.load %arg3[%c52] : memref<144xf32, #tpu.memory_space<smem>>
    %351 = vector.broadcast %350 : f32 to vector<16x16xf32>
    %352 = arith.mulf %351, %345 : vector<16x16xf32>
    %353 = arith.addf %334, %352 : vector<16x16xf32>
    %c88 = arith.constant 88 : index
    %354 = memref.load %arg3[%c88] : memref<144xf32, #tpu.memory_space<smem>>
    %355 = vector.broadcast %354 : f32 to vector<16x16xf32>
    %356 = arith.mulf %355, %345 : vector<16x16xf32>
    %357 = arith.addf %338, %356 : vector<16x16xf32>
    %c124 = arith.constant 124 : index
    %358 = memref.load %arg3[%c124] : memref<144xf32, #tpu.memory_space<smem>>
    %359 = vector.broadcast %358 : f32 to vector<16x16xf32>
    %360 = arith.mulf %359, %345 : vector<16x16xf32>
    %361 = arith.addf %342, %360 : vector<16x16xf32>
    %c15_i32_58 = arith.constant 15 : i32
    %362 = tpu.dynamic_rotate %209 by %c15_i32_58 dim 1 : vector<16x16xf32>, i32 -> vector<16x16xf32>
    %c15_i32_59 = arith.constant 15 : i32
    %363 = tpu.dynamic_rotate %362 by %c15_i32_59 dim 0 : vector<16x16xf32>, i32 -> vector<16x16xf32>
    %cst_60 = arith.constant 0.000000e+00 : f32
    %364 = vector.broadcast %cst_60 : f32 to vector<16x16xf32>
    %365 = arith.select %29, %363, %364 : vector<16x16xi1>, vector<16x16xf32>
    %c17 = arith.constant 17 : index
    %366 = memref.load %arg3[%c17] : memref<144xf32, #tpu.memory_space<smem>>
    %367 = vector.broadcast %366 : f32 to vector<16x16xf32>
    %368 = arith.mulf %367, %365 : vector<16x16xf32>
    %369 = arith.addf %349, %368 : vector<16x16xf32>
    %c53 = arith.constant 53 : index
    %370 = memref.load %arg3[%c53] : memref<144xf32, #tpu.memory_space<smem>>
    %371 = vector.broadcast %370 : f32 to vector<16x16xf32>
    %372 = arith.mulf %371, %365 : vector<16x16xf32>
    %373 = arith.addf %353, %372 : vector<16x16xf32>
    %c89 = arith.constant 89 : index
    %374 = memref.load %arg3[%c89] : memref<144xf32, #tpu.memory_space<smem>>
    %375 = vector.broadcast %374 : f32 to vector<16x16xf32>
    %376 = arith.mulf %375, %365 : vector<16x16xf32>
    %377 = arith.addf %357, %376 : vector<16x16xf32>
    %c125 = arith.constant 125 : index
    %378 = memref.load %arg3[%c125] : memref<144xf32, #tpu.memory_space<smem>>
    %379 = vector.broadcast %378 : f32 to vector<16x16xf32>
    %380 = arith.mulf %379, %365 : vector<16x16xf32>
    %381 = arith.addf %361, %380 : vector<16x16xf32>
    %c0_61 = arith.constant 0 : index
    %c2_62 = arith.constant 2 : index
    %c0_63 = arith.constant 0 : index
    %c0_64 = arith.constant 0 : index
    %382 = vector.load %arg1[%c0_61, %c2_62, %c0_63, %c0_64] : memref<1x4x16x16xf32, #tpu.memory_space<vmem>>, vector<1x1x16x16xf32>
    %383 = vector.shape_cast %382 : vector<1x1x16x16xf32> to vector<16x16xf32>
    %c1_i32_65 = arith.constant 1 : i32
    %384 = tpu.dynamic_rotate %383 by %c1_i32_65 dim 1 : vector<16x16xf32>, i32 -> vector<16x16xf32>
    %c1_i32_66 = arith.constant 1 : i32
    %385 = tpu.dynamic_rotate %384 by %c1_i32_66 dim 0 : vector<16x16xf32>, i32 -> vector<16x16xf32>
    %cst_67 = arith.constant 0.000000e+00 : f32
    %386 = vector.broadcast %cst_67 : f32 to vector<16x16xf32>
    %387 = arith.select %6, %385, %386 : vector<16x16xi1>, vector<16x16xf32>
    %c18 = arith.constant 18 : index
    %388 = memref.load %arg3[%c18] : memref<144xf32, #tpu.memory_space<smem>>
    %389 = vector.broadcast %388 : f32 to vector<16x16xf32>
    %390 = arith.mulf %389, %387 : vector<16x16xf32>
    %391 = arith.addf %369, %390 : vector<16x16xf32>
    %c54 = arith.constant 54 : index
    %392 = memref.load %arg3[%c54] : memref<144xf32, #tpu.memory_space<smem>>
    %393 = vector.broadcast %392 : f32 to vector<16x16xf32>
    %394 = arith.mulf %393, %387 : vector<16x16xf32>
    %395 = arith.addf %373, %394 : vector<16x16xf32>
    %c90 = arith.constant 90 : index
    %396 = memref.load %arg3[%c90] : memref<144xf32, #tpu.memory_space<smem>>
    %397 = vector.broadcast %396 : f32 to vector<16x16xf32>
    %398 = arith.mulf %397, %387 : vector<16x16xf32>
    %399 = arith.addf %377, %398 : vector<16x16xf32>
    %c126 = arith.constant 126 : index
    %400 = memref.load %arg3[%c126] : memref<144xf32, #tpu.memory_space<smem>>
    %401 = vector.broadcast %400 : f32 to vector<16x16xf32>
    %402 = arith.mulf %401, %387 : vector<16x16xf32>
    %403 = arith.addf %381, %402 : vector<16x16xf32>
    %c1_i32_68 = arith.constant 1 : i32
    %404 = tpu.dynamic_rotate %383 by %c1_i32_68 dim 0 : vector<16x16xf32>, i32 -> vector<16x16xf32>
    %cst_69 = arith.constant 0.000000e+00 : f32
    %405 = vector.broadcast %cst_69 : f32 to vector<16x16xf32>
    %406 = arith.select %8, %404, %405 : vector<16x16xi1>, vector<16x16xf32>
    %c19 = arith.constant 19 : index
    %407 = memref.load %arg3[%c19] : memref<144xf32, #tpu.memory_space<smem>>
    %408 = vector.broadcast %407 : f32 to vector<16x16xf32>
    %409 = arith.mulf %408, %406 : vector<16x16xf32>
    %410 = arith.addf %391, %409 : vector<16x16xf32>
    %c55 = arith.constant 55 : index
    %411 = memref.load %arg3[%c55] : memref<144xf32, #tpu.memory_space<smem>>
    %412 = vector.broadcast %411 : f32 to vector<16x16xf32>
    %413 = arith.mulf %412, %406 : vector<16x16xf32>
    %414 = arith.addf %395, %413 : vector<16x16xf32>
    %c91 = arith.constant 91 : index
    %415 = memref.load %arg3[%c91] : memref<144xf32, #tpu.memory_space<smem>>
    %416 = vector.broadcast %415 : f32 to vector<16x16xf32>
    %417 = arith.mulf %416, %406 : vector<16x16xf32>
    %418 = arith.addf %399, %417 : vector<16x16xf32>
    %c127 = arith.constant 127 : index
    %419 = memref.load %arg3[%c127] : memref<144xf32, #tpu.memory_space<smem>>
    %420 = vector.broadcast %419 : f32 to vector<16x16xf32>
    %421 = arith.mulf %420, %406 : vector<16x16xf32>
    %422 = arith.addf %403, %421 : vector<16x16xf32>
    %c15_i32_70 = arith.constant 15 : i32
    %423 = tpu.dynamic_rotate %383 by %c15_i32_70 dim 1 : vector<16x16xf32>, i32 -> vector<16x16xf32>
    %c1_i32_71 = arith.constant 1 : i32
    %424 = tpu.dynamic_rotate %423 by %c1_i32_71 dim 0 : vector<16x16xf32>, i32 -> vector<16x16xf32>
    %cst_72 = arith.constant 0.000000e+00 : f32
    %425 = vector.broadcast %cst_72 : f32 to vector<16x16xf32>
    %426 = arith.select %13, %424, %425 : vector<16x16xi1>, vector<16x16xf32>
    %c20 = arith.constant 20 : index
    %427 = memref.load %arg3[%c20] : memref<144xf32, #tpu.memory_space<smem>>
    %428 = vector.broadcast %427 : f32 to vector<16x16xf32>
    %429 = arith.mulf %428, %426 : vector<16x16xf32>
    %430 = arith.addf %410, %429 : vector<16x16xf32>
    %c56 = arith.constant 56 : index
    %431 = memref.load %arg3[%c56] : memref<144xf32, #tpu.memory_space<smem>>
    %432 = vector.broadcast %431 : f32 to vector<16x16xf32>
    %433 = arith.mulf %432, %426 : vector<16x16xf32>
    %434 = arith.addf %414, %433 : vector<16x16xf32>
    %c92 = arith.constant 92 : index
    %435 = memref.load %arg3[%c92] : memref<144xf32, #tpu.memory_space<smem>>
    %436 = vector.broadcast %435 : f32 to vector<16x16xf32>
    %437 = arith.mulf %436, %426 : vector<16x16xf32>
    %438 = arith.addf %418, %437 : vector<16x16xf32>
    %c128 = arith.constant 128 : index
    %439 = memref.load %arg3[%c128] : memref<144xf32, #tpu.memory_space<smem>>
    %440 = vector.broadcast %439 : f32 to vector<16x16xf32>
    %441 = arith.mulf %440, %426 : vector<16x16xf32>
    %442 = arith.addf %422, %441 : vector<16x16xf32>
    %c1_i32_73 = arith.constant 1 : i32
    %443 = tpu.dynamic_rotate %383 by %c1_i32_73 dim 1 : vector<16x16xf32>, i32 -> vector<16x16xf32>
    %cst_74 = arith.constant 0.000000e+00 : f32
    %444 = vector.broadcast %cst_74 : f32 to vector<16x16xf32>
    %445 = arith.select %15, %443, %444 : vector<16x16xi1>, vector<16x16xf32>
    %c21 = arith.constant 21 : index
    %446 = memref.load %arg3[%c21] : memref<144xf32, #tpu.memory_space<smem>>
    %447 = vector.broadcast %446 : f32 to vector<16x16xf32>
    %448 = arith.mulf %447, %445 : vector<16x16xf32>
    %449 = arith.addf %430, %448 : vector<16x16xf32>
    %c57 = arith.constant 57 : index
    %450 = memref.load %arg3[%c57] : memref<144xf32, #tpu.memory_space<smem>>
    %451 = vector.broadcast %450 : f32 to vector<16x16xf32>
    %452 = arith.mulf %451, %445 : vector<16x16xf32>
    %453 = arith.addf %434, %452 : vector<16x16xf32>
    %c93 = arith.constant 93 : index
    %454 = memref.load %arg3[%c93] : memref<144xf32, #tpu.memory_space<smem>>
    %455 = vector.broadcast %454 : f32 to vector<16x16xf32>
    %456 = arith.mulf %455, %445 : vector<16x16xf32>
    %457 = arith.addf %438, %456 : vector<16x16xf32>
    %c129 = arith.constant 129 : index
    %458 = memref.load %arg3[%c129] : memref<144xf32, #tpu.memory_space<smem>>
    %459 = vector.broadcast %458 : f32 to vector<16x16xf32>
    %460 = arith.mulf %459, %445 : vector<16x16xf32>
    %461 = arith.addf %442, %460 : vector<16x16xf32>
    %c22 = arith.constant 22 : index
    %462 = memref.load %arg3[%c22] : memref<144xf32, #tpu.memory_space<smem>>
    %463 = vector.broadcast %462 : f32 to vector<16x16xf32>
    %464 = arith.mulf %463, %383 : vector<16x16xf32>
    %465 = arith.addf %449, %464 : vector<16x16xf32>
    %c58 = arith.constant 58 : index
    %466 = memref.load %arg3[%c58] : memref<144xf32, #tpu.memory_space<smem>>
    %467 = vector.broadcast %466 : f32 to vector<16x16xf32>
    %468 = arith.mulf %467, %383 : vector<16x16xf32>
    %469 = arith.addf %453, %468 : vector<16x16xf32>
    %c94 = arith.constant 94 : index
    %470 = memref.load %arg3[%c94] : memref<144xf32, #tpu.memory_space<smem>>
    %471 = vector.broadcast %470 : f32 to vector<16x16xf32>
    %472 = arith.mulf %471, %383 : vector<16x16xf32>
    %473 = arith.addf %457, %472 : vector<16x16xf32>
    %c130 = arith.constant 130 : index
    %474 = memref.load %arg3[%c130] : memref<144xf32, #tpu.memory_space<smem>>
    %475 = vector.broadcast %474 : f32 to vector<16x16xf32>
    %476 = arith.mulf %475, %383 : vector<16x16xf32>
    %477 = arith.addf %461, %476 : vector<16x16xf32>
    %c15_i32_75 = arith.constant 15 : i32
    %478 = tpu.dynamic_rotate %383 by %c15_i32_75 dim 1 : vector<16x16xf32>, i32 -> vector<16x16xf32>
    %cst_76 = arith.constant 0.000000e+00 : f32
    %479 = vector.broadcast %cst_76 : f32 to vector<16x16xf32>
    %480 = arith.select %17, %478, %479 : vector<16x16xi1>, vector<16x16xf32>
    %c23 = arith.constant 23 : index
    %481 = memref.load %arg3[%c23] : memref<144xf32, #tpu.memory_space<smem>>
    %482 = vector.broadcast %481 : f32 to vector<16x16xf32>
    %483 = arith.mulf %482, %480 : vector<16x16xf32>
    %484 = arith.addf %465, %483 : vector<16x16xf32>
    %c59 = arith.constant 59 : index
    %485 = memref.load %arg3[%c59] : memref<144xf32, #tpu.memory_space<smem>>
    %486 = vector.broadcast %485 : f32 to vector<16x16xf32>
    %487 = arith.mulf %486, %480 : vector<16x16xf32>
    %488 = arith.addf %469, %487 : vector<16x16xf32>
    %c95 = arith.constant 95 : index
    %489 = memref.load %arg3[%c95] : memref<144xf32, #tpu.memory_space<smem>>
    %490 = vector.broadcast %489 : f32 to vector<16x16xf32>
    %491 = arith.mulf %490, %480 : vector<16x16xf32>
    %492 = arith.addf %473, %491 : vector<16x16xf32>
    %c131 = arith.constant 131 : index
    %493 = memref.load %arg3[%c131] : memref<144xf32, #tpu.memory_space<smem>>
    %494 = vector.broadcast %493 : f32 to vector<16x16xf32>
    %495 = arith.mulf %494, %480 : vector<16x16xf32>
    %496 = arith.addf %477, %495 : vector<16x16xf32>
    %c1_i32_77 = arith.constant 1 : i32
    %497 = tpu.dynamic_rotate %383 by %c1_i32_77 dim 1 : vector<16x16xf32>, i32 -> vector<16x16xf32>
    %c15_i32_78 = arith.constant 15 : i32
    %498 = tpu.dynamic_rotate %497 by %c15_i32_78 dim 0 : vector<16x16xf32>, i32 -> vector<16x16xf32>
    %cst_79 = arith.constant 0.000000e+00 : f32
    %499 = vector.broadcast %cst_79 : f32 to vector<16x16xf32>
    %500 = arith.select %22, %498, %499 : vector<16x16xi1>, vector<16x16xf32>
    %c24 = arith.constant 24 : index
    %501 = memref.load %arg3[%c24] : memref<144xf32, #tpu.memory_space<smem>>
    %502 = vector.broadcast %501 : f32 to vector<16x16xf32>
    %503 = arith.mulf %502, %500 : vector<16x16xf32>
    %504 = arith.addf %484, %503 : vector<16x16xf32>
    %c60 = arith.constant 60 : index
    %505 = memref.load %arg3[%c60] : memref<144xf32, #tpu.memory_space<smem>>
    %506 = vector.broadcast %505 : f32 to vector<16x16xf32>
    %507 = arith.mulf %506, %500 : vector<16x16xf32>
    %508 = arith.addf %488, %507 : vector<16x16xf32>
    %c96 = arith.constant 96 : index
    %509 = memref.load %arg3[%c96] : memref<144xf32, #tpu.memory_space<smem>>
    %510 = vector.broadcast %509 : f32 to vector<16x16xf32>
    %511 = arith.mulf %510, %500 : vector<16x16xf32>
    %512 = arith.addf %492, %511 : vector<16x16xf32>
    %c132 = arith.constant 132 : index
    %513 = memref.load %arg3[%c132] : memref<144xf32, #tpu.memory_space<smem>>
    %514 = vector.broadcast %513 : f32 to vector<16x16xf32>
    %515 = arith.mulf %514, %500 : vector<16x16xf32>
    %516 = arith.addf %496, %515 : vector<16x16xf32>
    %c15_i32_80 = arith.constant 15 : i32
    %517 = tpu.dynamic_rotate %383 by %c15_i32_80 dim 0 : vector<16x16xf32>, i32 -> vector<16x16xf32>
    %cst_81 = arith.constant 0.000000e+00 : f32
    %518 = vector.broadcast %cst_81 : f32 to vector<16x16xf32>
    %519 = arith.select %24, %517, %518 : vector<16x16xi1>, vector<16x16xf32>
    %c25 = arith.constant 25 : index
    %520 = memref.load %arg3[%c25] : memref<144xf32, #tpu.memory_space<smem>>
    %521 = vector.broadcast %520 : f32 to vector<16x16xf32>
    %522 = arith.mulf %521, %519 : vector<16x16xf32>
    %523 = arith.addf %504, %522 : vector<16x16xf32>
    %c61 = arith.constant 61 : index
    %524 = memref.load %arg3[%c61] : memref<144xf32, #tpu.memory_space<smem>>
    %525 = vector.broadcast %524 : f32 to vector<16x16xf32>
    %526 = arith.mulf %525, %519 : vector<16x16xf32>
    %527 = arith.addf %508, %526 : vector<16x16xf32>
    %c97 = arith.constant 97 : index
    %528 = memref.load %arg3[%c97] : memref<144xf32, #tpu.memory_space<smem>>
    %529 = vector.broadcast %528 : f32 to vector<16x16xf32>
    %530 = arith.mulf %529, %519 : vector<16x16xf32>
    %531 = arith.addf %512, %530 : vector<16x16xf32>
    %c133 = arith.constant 133 : index
    %532 = memref.load %arg3[%c133] : memref<144xf32, #tpu.memory_space<smem>>
    %533 = vector.broadcast %532 : f32 to vector<16x16xf32>
    %534 = arith.mulf %533, %519 : vector<16x16xf32>
    %535 = arith.addf %516, %534 : vector<16x16xf32>
    %c15_i32_82 = arith.constant 15 : i32
    %536 = tpu.dynamic_rotate %383 by %c15_i32_82 dim 1 : vector<16x16xf32>, i32 -> vector<16x16xf32>
    %c15_i32_83 = arith.constant 15 : i32
    %537 = tpu.dynamic_rotate %536 by %c15_i32_83 dim 0 : vector<16x16xf32>, i32 -> vector<16x16xf32>
    %cst_84 = arith.constant 0.000000e+00 : f32
    %538 = vector.broadcast %cst_84 : f32 to vector<16x16xf32>
    %539 = arith.select %29, %537, %538 : vector<16x16xi1>, vector<16x16xf32>
    %c26 = arith.constant 26 : index
    %540 = memref.load %arg3[%c26] : memref<144xf32, #tpu.memory_space<smem>>
    %541 = vector.broadcast %540 : f32 to vector<16x16xf32>
    %542 = arith.mulf %541, %539 : vector<16x16xf32>
    %543 = arith.addf %523, %542 : vector<16x16xf32>
    %c62 = arith.constant 62 : index
    %544 = memref.load %arg3[%c62] : memref<144xf32, #tpu.memory_space<smem>>
    %545 = vector.broadcast %544 : f32 to vector<16x16xf32>
    %546 = arith.mulf %545, %539 : vector<16x16xf32>
    %547 = arith.addf %527, %546 : vector<16x16xf32>
    %c98 = arith.constant 98 : index
    %548 = memref.load %arg3[%c98] : memref<144xf32, #tpu.memory_space<smem>>
    %549 = vector.broadcast %548 : f32 to vector<16x16xf32>
    %550 = arith.mulf %549, %539 : vector<16x16xf32>
    %551 = arith.addf %531, %550 : vector<16x16xf32>
    %c134 = arith.constant 134 : index
    %552 = memref.load %arg3[%c134] : memref<144xf32, #tpu.memory_space<smem>>
    %553 = vector.broadcast %552 : f32 to vector<16x16xf32>
    %554 = arith.mulf %553, %539 : vector<16x16xf32>
    %555 = arith.addf %535, %554 : vector<16x16xf32>
    %c0_85 = arith.constant 0 : index
    %c3_86 = arith.constant 3 : index
    %c0_87 = arith.constant 0 : index
    %c0_88 = arith.constant 0 : index
    %556 = vector.load %arg1[%c0_85, %c3_86, %c0_87, %c0_88] : memref<1x4x16x16xf32, #tpu.memory_space<vmem>>, vector<1x1x16x16xf32>
    %557 = vector.shape_cast %556 : vector<1x1x16x16xf32> to vector<16x16xf32>
    %c1_i32_89 = arith.constant 1 : i32
    %558 = tpu.dynamic_rotate %557 by %c1_i32_89 dim 1 : vector<16x16xf32>, i32 -> vector<16x16xf32>
    %c1_i32_90 = arith.constant 1 : i32
    %559 = tpu.dynamic_rotate %558 by %c1_i32_90 dim 0 : vector<16x16xf32>, i32 -> vector<16x16xf32>
    %cst_91 = arith.constant 0.000000e+00 : f32
    %560 = vector.broadcast %cst_91 : f32 to vector<16x16xf32>
    %561 = arith.select %6, %559, %560 : vector<16x16xi1>, vector<16x16xf32>
    %c27 = arith.constant 27 : index
    %562 = memref.load %arg3[%c27] : memref<144xf32, #tpu.memory_space<smem>>
    %563 = vector.broadcast %562 : f32 to vector<16x16xf32>
    %564 = arith.mulf %563, %561 : vector<16x16xf32>
    %565 = arith.addf %543, %564 : vector<16x16xf32>
    %c63 = arith.constant 63 : index
    %566 = memref.load %arg3[%c63] : memref<144xf32, #tpu.memory_space<smem>>
    %567 = vector.broadcast %566 : f32 to vector<16x16xf32>
    %568 = arith.mulf %567, %561 : vector<16x16xf32>
    %569 = arith.addf %547, %568 : vector<16x16xf32>
    %c99 = arith.constant 99 : index
    %570 = memref.load %arg3[%c99] : memref<144xf32, #tpu.memory_space<smem>>
    %571 = vector.broadcast %570 : f32 to vector<16x16xf32>
    %572 = arith.mulf %571, %561 : vector<16x16xf32>
    %573 = arith.addf %551, %572 : vector<16x16xf32>
    %c135 = arith.constant 135 : index
    %574 = memref.load %arg3[%c135] : memref<144xf32, #tpu.memory_space<smem>>
    %575 = vector.broadcast %574 : f32 to vector<16x16xf32>
    %576 = arith.mulf %575, %561 : vector<16x16xf32>
    %577 = arith.addf %555, %576 : vector<16x16xf32>
    %c1_i32_92 = arith.constant 1 : i32
    %578 = tpu.dynamic_rotate %557 by %c1_i32_92 dim 0 : vector<16x16xf32>, i32 -> vector<16x16xf32>
    %cst_93 = arith.constant 0.000000e+00 : f32
    %579 = vector.broadcast %cst_93 : f32 to vector<16x16xf32>
    %580 = arith.select %8, %578, %579 : vector<16x16xi1>, vector<16x16xf32>
    %c28 = arith.constant 28 : index
    %581 = memref.load %arg3[%c28] : memref<144xf32, #tpu.memory_space<smem>>
    %582 = vector.broadcast %581 : f32 to vector<16x16xf32>
    %583 = arith.mulf %582, %580 : vector<16x16xf32>
    %584 = arith.addf %565, %583 : vector<16x16xf32>
    %c64 = arith.constant 64 : index
    %585 = memref.load %arg3[%c64] : memref<144xf32, #tpu.memory_space<smem>>
    %586 = vector.broadcast %585 : f32 to vector<16x16xf32>
    %587 = arith.mulf %586, %580 : vector<16x16xf32>
    %588 = arith.addf %569, %587 : vector<16x16xf32>
    %c100 = arith.constant 100 : index
    %589 = memref.load %arg3[%c100] : memref<144xf32, #tpu.memory_space<smem>>
    %590 = vector.broadcast %589 : f32 to vector<16x16xf32>
    %591 = arith.mulf %590, %580 : vector<16x16xf32>
    %592 = arith.addf %573, %591 : vector<16x16xf32>
    %c136 = arith.constant 136 : index
    %593 = memref.load %arg3[%c136] : memref<144xf32, #tpu.memory_space<smem>>
    %594 = vector.broadcast %593 : f32 to vector<16x16xf32>
    %595 = arith.mulf %594, %580 : vector<16x16xf32>
    %596 = arith.addf %577, %595 : vector<16x16xf32>
    %c15_i32_94 = arith.constant 15 : i32
    %597 = tpu.dynamic_rotate %557 by %c15_i32_94 dim 1 : vector<16x16xf32>, i32 -> vector<16x16xf32>
    %c1_i32_95 = arith.constant 1 : i32
    %598 = tpu.dynamic_rotate %597 by %c1_i32_95 dim 0 : vector<16x16xf32>, i32 -> vector<16x16xf32>
    %cst_96 = arith.constant 0.000000e+00 : f32
    %599 = vector.broadcast %cst_96 : f32 to vector<16x16xf32>
    %600 = arith.select %13, %598, %599 : vector<16x16xi1>, vector<16x16xf32>
    %c29 = arith.constant 29 : index
    %601 = memref.load %arg3[%c29] : memref<144xf32, #tpu.memory_space<smem>>
    %602 = vector.broadcast %601 : f32 to vector<16x16xf32>
    %603 = arith.mulf %602, %600 : vector<16x16xf32>
    %604 = arith.addf %584, %603 : vector<16x16xf32>
    %c65 = arith.constant 65 : index
    %605 = memref.load %arg3[%c65] : memref<144xf32, #tpu.memory_space<smem>>
    %606 = vector.broadcast %605 : f32 to vector<16x16xf32>
    %607 = arith.mulf %606, %600 : vector<16x16xf32>
    %608 = arith.addf %588, %607 : vector<16x16xf32>
    %c101 = arith.constant 101 : index
    %609 = memref.load %arg3[%c101] : memref<144xf32, #tpu.memory_space<smem>>
    %610 = vector.broadcast %609 : f32 to vector<16x16xf32>
    %611 = arith.mulf %610, %600 : vector<16x16xf32>
    %612 = arith.addf %592, %611 : vector<16x16xf32>
    %c137 = arith.constant 137 : index
    %613 = memref.load %arg3[%c137] : memref<144xf32, #tpu.memory_space<smem>>
    %614 = vector.broadcast %613 : f32 to vector<16x16xf32>
    %615 = arith.mulf %614, %600 : vector<16x16xf32>
    %616 = arith.addf %596, %615 : vector<16x16xf32>
    %c1_i32_97 = arith.constant 1 : i32
    %617 = tpu.dynamic_rotate %557 by %c1_i32_97 dim 1 : vector<16x16xf32>, i32 -> vector<16x16xf32>
    %cst_98 = arith.constant 0.000000e+00 : f32
    %618 = vector.broadcast %cst_98 : f32 to vector<16x16xf32>
    %619 = arith.select %15, %617, %618 : vector<16x16xi1>, vector<16x16xf32>
    %c30 = arith.constant 30 : index
    %620 = memref.load %arg3[%c30] : memref<144xf32, #tpu.memory_space<smem>>
    %621 = vector.broadcast %620 : f32 to vector<16x16xf32>
    %622 = arith.mulf %621, %619 : vector<16x16xf32>
    %623 = arith.addf %604, %622 : vector<16x16xf32>
    %c66 = arith.constant 66 : index
    %624 = memref.load %arg3[%c66] : memref<144xf32, #tpu.memory_space<smem>>
    %625 = vector.broadcast %624 : f32 to vector<16x16xf32>
    %626 = arith.mulf %625, %619 : vector<16x16xf32>
    %627 = arith.addf %608, %626 : vector<16x16xf32>
    %c102 = arith.constant 102 : index
    %628 = memref.load %arg3[%c102] : memref<144xf32, #tpu.memory_space<smem>>
    %629 = vector.broadcast %628 : f32 to vector<16x16xf32>
    %630 = arith.mulf %629, %619 : vector<16x16xf32>
    %631 = arith.addf %612, %630 : vector<16x16xf32>
    %c138 = arith.constant 138 : index
    %632 = memref.load %arg3[%c138] : memref<144xf32, #tpu.memory_space<smem>>
    %633 = vector.broadcast %632 : f32 to vector<16x16xf32>
    %634 = arith.mulf %633, %619 : vector<16x16xf32>
    %635 = arith.addf %616, %634 : vector<16x16xf32>
    %c31 = arith.constant 31 : index
    %636 = memref.load %arg3[%c31] : memref<144xf32, #tpu.memory_space<smem>>
    %637 = vector.broadcast %636 : f32 to vector<16x16xf32>
    %638 = arith.mulf %637, %557 : vector<16x16xf32>
    %639 = arith.addf %623, %638 : vector<16x16xf32>
    %c67 = arith.constant 67 : index
    %640 = memref.load %arg3[%c67] : memref<144xf32, #tpu.memory_space<smem>>
    %641 = vector.broadcast %640 : f32 to vector<16x16xf32>
    %642 = arith.mulf %641, %557 : vector<16x16xf32>
    %643 = arith.addf %627, %642 : vector<16x16xf32>
    %c103 = arith.constant 103 : index
    %644 = memref.load %arg3[%c103] : memref<144xf32, #tpu.memory_space<smem>>
    %645 = vector.broadcast %644 : f32 to vector<16x16xf32>
    %646 = arith.mulf %645, %557 : vector<16x16xf32>
    %647 = arith.addf %631, %646 : vector<16x16xf32>
    %c139 = arith.constant 139 : index
    %648 = memref.load %arg3[%c139] : memref<144xf32, #tpu.memory_space<smem>>
    %649 = vector.broadcast %648 : f32 to vector<16x16xf32>
    %650 = arith.mulf %649, %557 : vector<16x16xf32>
    %651 = arith.addf %635, %650 : vector<16x16xf32>
    %c15_i32_99 = arith.constant 15 : i32
    %652 = tpu.dynamic_rotate %557 by %c15_i32_99 dim 1 : vector<16x16xf32>, i32 -> vector<16x16xf32>
    %cst_100 = arith.constant 0.000000e+00 : f32
    %653 = vector.broadcast %cst_100 : f32 to vector<16x16xf32>
    %654 = arith.select %17, %652, %653 : vector<16x16xi1>, vector<16x16xf32>
    %c32 = arith.constant 32 : index
    %655 = memref.load %arg3[%c32] : memref<144xf32, #tpu.memory_space<smem>>
    %656 = vector.broadcast %655 : f32 to vector<16x16xf32>
    %657 = arith.mulf %656, %654 : vector<16x16xf32>
    %658 = arith.addf %639, %657 : vector<16x16xf32>
    %c68 = arith.constant 68 : index
    %659 = memref.load %arg3[%c68] : memref<144xf32, #tpu.memory_space<smem>>
    %660 = vector.broadcast %659 : f32 to vector<16x16xf32>
    %661 = arith.mulf %660, %654 : vector<16x16xf32>
    %662 = arith.addf %643, %661 : vector<16x16xf32>
    %c104 = arith.constant 104 : index
    %663 = memref.load %arg3[%c104] : memref<144xf32, #tpu.memory_space<smem>>
    %664 = vector.broadcast %663 : f32 to vector<16x16xf32>
    %665 = arith.mulf %664, %654 : vector<16x16xf32>
    %666 = arith.addf %647, %665 : vector<16x16xf32>
    %c140 = arith.constant 140 : index
    %667 = memref.load %arg3[%c140] : memref<144xf32, #tpu.memory_space<smem>>
    %668 = vector.broadcast %667 : f32 to vector<16x16xf32>
    %669 = arith.mulf %668, %654 : vector<16x16xf32>
    %670 = arith.addf %651, %669 : vector<16x16xf32>
    %c1_i32_101 = arith.constant 1 : i32
    %671 = tpu.dynamic_rotate %557 by %c1_i32_101 dim 1 : vector<16x16xf32>, i32 -> vector<16x16xf32>
    %c15_i32_102 = arith.constant 15 : i32
    %672 = tpu.dynamic_rotate %671 by %c15_i32_102 dim 0 : vector<16x16xf32>, i32 -> vector<16x16xf32>
    %cst_103 = arith.constant 0.000000e+00 : f32
    %673 = vector.broadcast %cst_103 : f32 to vector<16x16xf32>
    %674 = arith.select %22, %672, %673 : vector<16x16xi1>, vector<16x16xf32>
    %c33 = arith.constant 33 : index
    %675 = memref.load %arg3[%c33] : memref<144xf32, #tpu.memory_space<smem>>
    %676 = vector.broadcast %675 : f32 to vector<16x16xf32>
    %677 = arith.mulf %676, %674 : vector<16x16xf32>
    %678 = arith.addf %658, %677 : vector<16x16xf32>
    %c69 = arith.constant 69 : index
    %679 = memref.load %arg3[%c69] : memref<144xf32, #tpu.memory_space<smem>>
    %680 = vector.broadcast %679 : f32 to vector<16x16xf32>
    %681 = arith.mulf %680, %674 : vector<16x16xf32>
    %682 = arith.addf %662, %681 : vector<16x16xf32>
    %c105 = arith.constant 105 : index
    %683 = memref.load %arg3[%c105] : memref<144xf32, #tpu.memory_space<smem>>
    %684 = vector.broadcast %683 : f32 to vector<16x16xf32>
    %685 = arith.mulf %684, %674 : vector<16x16xf32>
    %686 = arith.addf %666, %685 : vector<16x16xf32>
    %c141 = arith.constant 141 : index
    %687 = memref.load %arg3[%c141] : memref<144xf32, #tpu.memory_space<smem>>
    %688 = vector.broadcast %687 : f32 to vector<16x16xf32>
    %689 = arith.mulf %688, %674 : vector<16x16xf32>
    %690 = arith.addf %670, %689 : vector<16x16xf32>
    %c15_i32_104 = arith.constant 15 : i32
    %691 = tpu.dynamic_rotate %557 by %c15_i32_104 dim 0 : vector<16x16xf32>, i32 -> vector<16x16xf32>
    %cst_105 = arith.constant 0.000000e+00 : f32
    %692 = vector.broadcast %cst_105 : f32 to vector<16x16xf32>
    %693 = arith.select %24, %691, %692 : vector<16x16xi1>, vector<16x16xf32>
    %c34 = arith.constant 34 : index
    %694 = memref.load %arg3[%c34] : memref<144xf32, #tpu.memory_space<smem>>
    %695 = vector.broadcast %694 : f32 to vector<16x16xf32>
    %696 = arith.mulf %695, %693 : vector<16x16xf32>
    %697 = arith.addf %678, %696 : vector<16x16xf32>
    %c70 = arith.constant 70 : index
    %698 = memref.load %arg3[%c70] : memref<144xf32, #tpu.memory_space<smem>>
    %699 = vector.broadcast %698 : f32 to vector<16x16xf32>
    %700 = arith.mulf %699, %693 : vector<16x16xf32>
    %701 = arith.addf %682, %700 : vector<16x16xf32>
    %c106 = arith.constant 106 : index
    %702 = memref.load %arg3[%c106] : memref<144xf32, #tpu.memory_space<smem>>
    %703 = vector.broadcast %702 : f32 to vector<16x16xf32>
    %704 = arith.mulf %703, %693 : vector<16x16xf32>
    %705 = arith.addf %686, %704 : vector<16x16xf32>
    %c142 = arith.constant 142 : index
    %706 = memref.load %arg3[%c142] : memref<144xf32, #tpu.memory_space<smem>>
    %707 = vector.broadcast %706 : f32 to vector<16x16xf32>
    %708 = arith.mulf %707, %693 : vector<16x16xf32>
    %709 = arith.addf %690, %708 : vector<16x16xf32>
    %c15_i32_106 = arith.constant 15 : i32
    %710 = tpu.dynamic_rotate %557 by %c15_i32_106 dim 1 : vector<16x16xf32>, i32 -> vector<16x16xf32>
    %c15_i32_107 = arith.constant 15 : i32
    %711 = tpu.dynamic_rotate %710 by %c15_i32_107 dim 0 : vector<16x16xf32>, i32 -> vector<16x16xf32>
    %cst_108 = arith.constant 0.000000e+00 : f32
    %712 = vector.broadcast %cst_108 : f32 to vector<16x16xf32>
    %713 = arith.select %29, %711, %712 : vector<16x16xi1>, vector<16x16xf32>
    %c35 = arith.constant 35 : index
    %714 = memref.load %arg3[%c35] : memref<144xf32, #tpu.memory_space<smem>>
    %715 = vector.broadcast %714 : f32 to vector<16x16xf32>
    %716 = arith.mulf %715, %713 : vector<16x16xf32>
    %717 = arith.addf %697, %716 : vector<16x16xf32>
    %c71 = arith.constant 71 : index
    %718 = memref.load %arg3[%c71] : memref<144xf32, #tpu.memory_space<smem>>
    %719 = vector.broadcast %718 : f32 to vector<16x16xf32>
    %720 = arith.mulf %719, %713 : vector<16x16xf32>
    %721 = arith.addf %701, %720 : vector<16x16xf32>
    %c107 = arith.constant 107 : index
    %722 = memref.load %arg3[%c107] : memref<144xf32, #tpu.memory_space<smem>>
    %723 = vector.broadcast %722 : f32 to vector<16x16xf32>
    %724 = arith.mulf %723, %713 : vector<16x16xf32>
    %725 = arith.addf %705, %724 : vector<16x16xf32>
    %c143 = arith.constant 143 : index
    %726 = memref.load %arg3[%c143] : memref<144xf32, #tpu.memory_space<smem>>
    %727 = vector.broadcast %726 : f32 to vector<16x16xf32>
    %728 = arith.mulf %727, %713 : vector<16x16xf32>
    %729 = arith.addf %709, %728 : vector<16x16xf32>
    %c0_109 = arith.constant 0 : index
    %c0_110 = arith.constant 0 : index
    %c0_111 = arith.constant 0 : index
    %c0_112 = arith.constant 0 : index
    %730 = vector.load %arg4[%c0_109, %c0_110, %c0_111, %c0_112] : memref<1x10x16x16xf32, #tpu.memory_space<vmem>>, vector<1x1x16x16xf32>
    %731 = vector.shape_cast %730 : vector<1x1x16x16xf32> to vector<16x16xf32>
    %732 = vector.shape_cast %717 : vector<16x16xf32> to vector<1x1x16x16xf32>
    tpu.vector_store %arg4[%c0_109, %c0_110, %c0_111, %c0_112], %732 {strides = array<i32>} : memref<1x10x16x16xf32, #tpu.memory_space<vmem>>, vector<1x1x16x16xf32>,
    %c0_113 = arith.constant 0 : index
    %c1_114 = arith.constant 1 : index
    %c0_115 = arith.constant 0 : index
    %c0_116 = arith.constant 0 : index
    %733 = vector.load %arg4[%c0_113, %c1_114, %c0_115, %c0_116] : memref<1x10x16x16xf32, #tpu.memory_space<vmem>>, vector<1x1x16x16xf32>
    %734 = vector.shape_cast %733 : vector<1x1x16x16xf32> to vector<16x16xf32>
    %735 = vector.shape_cast %721 : vector<16x16xf32> to vector<1x1x16x16xf32>
    tpu.vector_store %arg4[%c0_113, %c1_114, %c0_115, %c0_116], %735 {strides = array<i32>} : memref<1x10x16x16xf32, #tpu.memory_space<vmem>>, vector<1x1x16x16xf32>,
    %c0_117 = arith.constant 0 : index
    %c2_118 = arith.constant 2 : index
    %c0_119 = arith.constant 0 : index
    %c0_120 = arith.constant 0 : index
    %736 = vector.load %arg4[%c0_117, %c2_118, %c0_119, %c0_120] : memref<1x10x16x16xf32, #tpu.memory_space<vmem>>, vector<1x1x16x16xf32>
    %737 = vector.shape_cast %736 : vector<1x1x16x16xf32> to vector<16x16xf32>
    %738 = vector.shape_cast %725 : vector<16x16xf32> to vector<1x1x16x16xf32>
    tpu.vector_store %arg4[%c0_117, %c2_118, %c0_119, %c0_120], %738 {strides = array<i32>} : memref<1x10x16x16xf32, #tpu.memory_space<vmem>>, vector<1x1x16x16xf32>,
    %c0_121 = arith.constant 0 : index
    %c3_122 = arith.constant 3 : index
    %c0_123 = arith.constant 0 : index
    %c0_124 = arith.constant 0 : index
    %739 = vector.load %arg4[%c0_121, %c3_122, %c0_123, %c0_124] : memref<1x10x16x16xf32, #tpu.memory_space<vmem>>, vector<1x1x16x16xf32>
    %740 = vector.shape_cast %739 : vector<1x1x16x16xf32> to vector<16x16xf32>
    %741 = vector.shape_cast %729 : vector<16x16xf32> to vector<1x1x16x16xf32>
    tpu.vector_store %arg4[%c0_121, %c3_122, %c0_123, %c0_124], %741 {strides = array<i32>} : memref<1x10x16x16xf32, #tpu.memory_space<vmem>>, vector<1x1x16x16xf32>,
    %c0_125 = arith.constant 0 : index
    %c0_126 = arith.constant 0 : index
    %c0_127 = arith.constant 0 : index
    %c0_128 = arith.constant 0 : index
    %742 = vector.load %arg2[%c0_125, %c0_126, %c0_127, %c0_128] : memref<1x6x16x16xf32, #tpu.memory_space<vmem>>, vector<1x6x16x16xf32>
    %743 = vector.shape_cast %742 : vector<1x6x16x16xf32> to vector<6x16x16xf32>
    %c0_129 = arith.constant 0 : index
    %c4_130 = arith.constant 4 : index
    %c0_131 = arith.constant 0 : index
    %c0_132 = arith.constant 0 : index
    %744 = vector.load %arg4[%c0_129, %c4_130, %c0_131, %c0_132] : memref<1x10x16x16xf32, #tpu.memory_space<vmem>>, vector<1x6x16x16xf32>
    %745 = vector.shape_cast %744 : vector<1x6x16x16xf32> to vector<6x16x16xf32>
    %746 = vector.shape_cast %743 : vector<6x16x16xf32> to vector<1x6x16x16xf32>
    tpu.vector_store %arg4[%c0_129, %c4_130, %c0_131, %c0_132], %746 {strides = array<i32>} : memref<1x10x16x16xf32, #tpu.memory_space<vmem>>, vector<1x6x16x16xf32>,
    return
  }
  func.func @transform_0(%arg0: i32) -> (i32, i32, i32, i32) {
    %c0_i32 = arith.constant 0 : i32
    %c0_i32_0 = arith.constant 0 : i32
    %c0_i32_1 = arith.constant 0 : i32
    %c0_i32_2 = arith.constant 0 : i32
    return %arg0, %c0_i32, %c0_i32_0, %c0_i32_1 : i32, i32, i32, i32
  }
  func.func @transform_1(%arg0: i32) -> (i32, i32, i32, i32) {
    %c0_i32 = arith.constant 0 : i32
    %c0_i32_0 = arith.constant 0 : i32
    %c0_i32_1 = arith.constant 0 : i32
    %c0_i32_2 = arith.constant 0 : i32
    return %arg0, %c0_i32, %c0_i32_0, %c0_i32_1 : i32, i32, i32, i32
  }
  func.func @transform_2(%arg0: i32) -> i32 {
    %c0_i32 = arith.constant 0 : i32
    %c0_i32_0 = arith.constant 0 : i32
    return %c0_i32 : i32
  }
  func.func @transform_3(%arg0: i32) -> (i32, i32, i32, i32) {
    %c0_i32 = arith.constant 0 : i32
    %c0_i32_0 = arith.constant 0 : i32
    %c0_i32_1 = arith.constant 0 : i32
    %c0_i32_2 = arith.constant 0 : i32
    return %arg0, %c0_i32, %c0_i32_0, %c0_i32_1 : i32, i32, i32, i32
  }
}

</mosaic_0001>

<bundles_post_ra>
// kernel: upsample_and_concat.1
= control target key start
LH: loop header
LB: loop body
LE: loop exit
PB: predicated region body
PF: predicated region fallthrough
CT: control target
= control target key end

     0   :  { %s4042_s0 = inlined_call_operand.hbm [shape: f32[2,4,16,16], index: 0, kind: input, shape index: {}]   ;;  %s4043_s1 = inlined_call_operand.hbm [shape: f32[2,6,16,16], index: 1, kind: input, shape index: {}]   ;;  %s4044_s2 = inlined_call_operand.hbm [shape: f32[144], index: 2, kind: input, shape index: {}]   ;;  %s4045_s3 = inlined_call_operand.hbm [shape: f32[2,10,16,16], index: 3, kind: output, shape index: {}]  }
   0x1   :  { %4229 = sst [smem:[#allocation162_spill]] %s4042_s0 }
   0x2   :  { %4230 = sst [smem:[#allocation163_spill]] %s4043_s1 }
   0x3   :  { %4231 = sst [smem:[#allocation164_spill]] %s4044_s2 }
   0x4   :  { %4232 = sst [smem:[#allocation165_spill]] %s4045_s3 }
   0x5   :  { %8 = vsyncpa [#allocation3], 0 }
   0x6   :  { %10 = vsyncpa [#allocation3 + $0x1], 0 }
   0x7   :  { %11 = vsyncpa [#allocation7], 0 }
   0x8   :  { %13 = vsyncpa [#allocation7 + $0x1], 0 }
   0x9   :  { %14 = vsyncpa [#allocation5], 0 }
   0xa   :  { %15 = vsyncpa [#allocation4], 0 }
   0xb   :  { %17 = vsyncpa [#allocation4 + $0x1], 0  ;;  %s1999_s12 = smov 0   ;;  %s2001_s13 = smov 0  }
   0xc   :  { %s2003_s14 = smov 0   ;;  %s2005_s15 = smov 0  }
   0xd LB: > { %4233 = sst [smem:[#allocation14_spill]] %s1954_s12  ;;  %s2020_s16 = sadd.s32 4294967295, %s1966_s15   ;;  %s1966_s15 = sphi %s2005_s15, %s4773_s15   ;;  %s1962_s14 = sphi %s2003_s14, %s4776_s14   ;;  %s1958_s13 = sphi %s2001_s13, %s4775_s13   ;;  %s1954_s12 = sphi %s1999_s12, %s4774_s12  }
   0xe   : > { %4234 = sst [smem:[#allocation15_spill]] %s1958_s13  ;;  %s1561_s17 = sadd.s32 4294967294, %s1966_s15  }
   0xf   : > { %4235 = sst [smem:[#allocation16_spill]] %s1962_s14  ;;  %s2024_s18 = sadd.s32 1, %s1966_s15  }
  0x10   : > { %4236 = sst [smem:[#allocation17_spill]] %s1966_s15  ;;  %s30_s19 = sadd.s32 1, %s1962_s14 }
  0x11   : > { %4237 = sst [smem:[#allocation18_spill]] %s2020_s16  ;;  %s27_s20 = ssub.s32 %s1966_s15, %s2024_s18 }
  0x12   : > { %4238 = sst [smem:[#allocation19_spill]] %s2024_s18  ;;  %p37_p0 = scmp.ne.s32.totalorder %s1962_s14, %s1958_s13 }
  0x13   : > { %p28_p1 = scmp.eq.s32.totalorder %s27_s20, 0  ;;  %p38_p2 = scmp.eq.s32.totalorder %s1966_s15, 0 }
  0x14   : > { %p43_p3 = scmp.ne.s32.totalorder %s1958_s13, %s1954_s12  ;;  %p4046_p4 = scmp.eq.s32.totalorder %s2020_s16, 0 }
  0x15   : > { %s2036_s21 = scalar_select %p28_p1, %s1962_s14, %s30_s19  }
  0x16   : > { %p2038_p5 = por %p38_p2, %p37_p0  ;;  %p2044_p6 = por %p4046_p4, %p43_p3 }
  0x17   : > { %4239 = sst [smem:[#allocation20_spill]] %s2036_s21  ;;  %p114_p7 = scmp.eq.s32.totalorder %s2020_s16, 1 }
  0x18   : > { %s4241_s23 = scalar_select %p2044_p6, 1, 0 }
  0x19   : > { %p120_p8 = scmp.eq.s32.totalorder %s1561_s17, 1  ;;  %p1562_p9 = scmp.ge.s32.totalorder %s1966_s15, 1 }
  0x1a   : > { %p127_p10 = scmp.lt.s32.totalorder %s1966_s15, 3  ;;  %p2051_p11 = por %p114_p7, %p37_p0 }
  0x1b   : > { %p2055_p12 = por %p120_p8, %p43_p3  ;;  %p1774_p4 = scmp.lt.s32.totalorder %s1966_s15, 2 }
  0x1c   : > { %s4242_s24 = scalar_select %p2051_p11, 1, 0 }
  0x1d   : > { %s4244_s25 = scalar_select %p2055_p12, 1, 0 }
  0x1e   : > { %4243 = sst [smem:[#allocation21_spill]] %s4242_s24  ;;  %p2059_p13 = pnand %p1562_p9, %p127_p10 }
  0x1f   : > { %4245 = sst [smem:[#allocation22_spill]] %s4244_s25  ;;  %s2068_s27 = sand.u32 1, %s1962_s14  }
  0x20   : > { %p1758_p2 = pneg %p2059_p13  ;;  %s1742_s28 = sshll.u32 %s1966_s15, 10 }
  0x21   : > { %p4247_p0 = scmp.eq.s32.totalorder %s2020_s16, 0  ;;  %p2075_p3 = pnand %p1774_p4, %p2038_p5 }
  0x22   : > { %s1565_s30 = sshll.u32 %s2068_s27, 6  ;;  %s4249_s2 = sld [smem:[#allocation164_spill]] }
  0x23   : > { %p1759_p7 = pnand %p1758_p2, %p4247_p0 }
  0x25   : > { %p1821_p9 = pneg %p1759_p7 }
  0x28   : > { %s1819_s6 = scalar_lea.hbm %s4249_s2, 32 }
  0x29   : > { %p1820_p8 = scmp.ne.s32.totalorder %s4249_s2, %s1819_s6  ;;  %p1826_p2 = scmp.lt.u32.totalorder %s1819_s6, %s4249_s2 }
  0x2b   : > { %p1822_p10 = pnand %p1821_p9, %p1820_p8 }
  0x2d   : > { %p1823_p1 = pneg %p1822_p10 }
  0x2f   : > { %p1828_p4 = pnand %p1826_p2, %p1823_p1 }
  0x31   : > { %1831 = shalt.err (!%p1828_p4)
}
  0x32   : > { %s1968_s11 = smov [#allocation8]   ;;  %s4250_s0 = sld [smem:[#allocation162_spill]] }
  0x33   : > { %1761 = dma.hbm_to_smem (!%p1759_p7), %s4249_s2, 32, %s1968_s11, [#allocation5]  }
  0x34   : > { %s153_s5 = scalar_lea.vmem [#allocation2], %s1565_s30  ;;  %s150_s7 = scalar_lea.sflag [#allocation3], %s2068_s27 }
  0x35   : > { %s160_s6 = sshll.u32 %s153_s5, 4  ;;  %p1834_p1 = pneg %p2075_p3  ;;  %s2097_s6 = int_to_ptr.vmem [resolvable:$true] %s160_s6 }
  0x38   : > { %s2095_s4 = scalar_lea.hbm %s4250_s0, %s1742_s28  ;;  %s1837_s10 = scalar_lea.hbm %s4250_s0, 2048 }
  0x39   : > { %s1832_s8 = scalar_lea.hbm %s2095_s4, 1024  ;;  %p1838_p8 = scmp.lt.u32.totalorder %s2095_s4, %s4250_s0 }
  0x3a   : > { %p1833_p5 = scmp.ne.s32.totalorder %s2095_s4, %s1832_s8  ;;  %p1839_p9 = scmp.lt.u32.totalorder %s1837_s10, %s1832_s8 }
  0x3b   : > { %p1841_p2 = scmp.lt.u32.totalorder %s1832_s8, %s2095_s4 }
  0x3c   : > { %p1835_p0 = pnand %p1834_p1, %p1833_p5  ;;  %p1840_p10 = por %p1839_p9, %p1838_p8 }
  0x3e   : > { %p1836_p7 = pneg %p1835_p0  ;;  %p1842_p4 = por %p1841_p2, %p1840_p10 }
  0x40   : > { %p1843_p12 = pnand %p1842_p4, %p1836_p7 }
  0x42   : > { %1846 = shalt.err (!%p1843_p12)
}
  0x43   : > { %s1847_s30 = scalar_lea.vmem %s2097_s6, 1024  ;;  %s1969_s19 = smov [#allocation2]  }
  0x44   : > { %p1848_p5 = scmp.ne.s32.totalorder %s2097_s6, %s1847_s30  ;;  %s1852_s20 = sshll.u32 %s1969_s19, 4  ;;  %s1853_s20 = int_to_ptr.vmem [resolvable:$false] %s1852_s20 }
  0x45   : > { %s1854_s22 = scalar_lea.vmem %s1853_s20, 2048  ;;  %p1855_p6 = scmp.lt.s32.totalorder %s2097_s6, %s1853_s20 }
  0x46   : > { %p1850_p0 = pnand %p1848_p5, %p1834_p1  ;;  %p1856_p8 = scmp.lt.s32.totalorder %s1854_s22, %s1847_s30 }
  0x48   : > { %p1851_p11 = pneg %p1850_p0  ;;  %p1857_p9 = por %p1856_p8, %p1855_p6 }
  0x4a   : > { %p1858_p10 = pnand %p1857_p9, %p1851_p11 }
  0x4c   : > { %1861 = shalt.err (!%p1858_p10)
}
  0x4d   : > { %s1970_s5 = smov 128   ;;  %s1971_s8 = smov 8  }
  0x4e   : > { %1765 = dma.hbm_to_vmem [thread:$0]  (!%p2075_p3), %s2095_s4, 1024, %s2097_s6, %s150_s7, %s1970_s5, %s1970_s5, %s1971_s8  }
  0x4f   : > { %s1743_s9 = smul.u32 96, %s2068_s27  ;;  %s4251_s1 = sld [smem:[#allocation163_spill]] }
  0x50   : > { %s1744_s28 = smul.u32 1536, %s1966_s15  ;;  %s171_s20 = scalar_lea.sflag [#allocation7], %s2068_s27 }
  0x51   : > { %s174_s30 = scalar_lea.vmem [#allocation6], %s1743_s9 }
  0x52   : > { %s181_s19 = sshll.u32 %s174_s30, 4  ;;  %s2137_s19 = int_to_ptr.vmem [resolvable:$true] %s181_s19 }
  0x55   : > { %s2135_s17 = scalar_lea.hbm %s4251_s1, %s1744_s28  ;;  %s1867_s7 = scalar_lea.hbm %s4251_s1, 3072 }
  0x56   : > { %s1862_s22 = scalar_lea.hbm %s2135_s17, 1536  ;;  %p1868_p7 = scmp.lt.u32.totalorder %s2135_s17, %s4251_s1 }
  0x57   : > { %p1863_p6 = scmp.ne.s32.totalorder %s2135_s17, %s1862_s22  ;;  %p1869_p2 = scmp.lt.u32.totalorder %s1867_s7, %s1862_s22 }
  0x58   : > { %p1871_p5 = scmp.lt.u32.totalorder %s1862_s22, %s2135_s17 }
  0x59   : > { %p1865_p11 = pnand %p1863_p6, %p1834_p1  ;;  %p1870_p4 = por %p1869_p2, %p1868_p7 }
  0x5b   : > { %p1866_p12 = pneg %p1865_p11  ;;  %p1872_p0 = por %p1871_p5, %p1870_p4 }
  0x5d   : > { %p1873_p8 = pnand %p1872_p0, %p1866_p12 }
  0x5f   : > { %1876 = shalt.err (!%p1873_p8)
}
  0x60   : > { %s1877_s9 = scalar_lea.vmem %s2137_s19, 1536  ;;  %s1972_s11 = smov [#allocation6]  }
  0x61   : > { %p1878_p9 = scmp.ne.s32.totalorder %s2137_s19, %s1877_s9  ;;  %s1882_s30 = sshll.u32 %s1972_s11, 4  ;;  %s1883_s30 = int_to_ptr.vmem [resolvable:$false] %s1882_s30 }
  0x62   : > { %s1884_s4 = scalar_lea.vmem %s1883_s30, 3072  ;;  %p1885_p11 = scmp.lt.s32.totalorder %s2137_s19, %s1883_s30 }
  0x63   : > { %p1880_p10 = pnand %p1878_p9, %p1834_p1  ;;  %p1886_p7 = scmp.lt.s32.totalorder %s1884_s4, %s1877_s9 }
  0x65   : > { %p1881_p6 = pneg %p1880_p10  ;;  %p1887_p2 = por %p1886_p7, %p1885_p11 }
  0x67   : > { %p1888_p4 = pnand %p1887_p2, %p1881_p6 }
  0x69   : > { %1891 = shalt.err (!%p1888_p4)
}
  0x6a   : > { %1768 = dma.hbm_to_vmem [thread:$0]  (!%p2075_p3), %s2135_s17, 1536, %s2137_s19, %s171_s20, %s1970_s5, %s1970_s5, %s1971_s8  }
  0x6b   : > { %193 = sbr.rel (%p2059_p13) target bundleno = 705 (0x2c1), region = 32 }
  0x72   : > { %s2171_s22 = sand.u32 1, %s1958_s13   ;;  %p4254_p1 = scmp.ne.s32.totalorder %s4241_s23, 0 }
  0x73   : > { %4252 = sst [smem:[#allocation23_spill]] %s2171_s22  ;;  %s1570_s6 = sshll.u32 %s2171_s22, 6 }
  0x74   : > { %s196_s7 = scalar_lea.sflag [#allocation3], %s2171_s22  ;;  %s2175_s29 = scalar_lea.vmem [#allocation2], %s1570_s6 }
  0x75   : > { %4253 = sst [smem:[#allocation24_spill]] %s2175_s29 }
  0x76   : > { %1937 = dma.done.wait (%p4254_p1), %s196_s7, 1024  }
  0x77   : > { %1939 = vsyncadd (%p4254_p1), %s196_s7, 4294966272  ;;  %s1745_s26 = smul.u32 96, %s2171_s22  ;;  %s205_s27 = scalar_lea.sflag [#allocation7], %s2171_s22 }
  0x79   : > { %s2183_s5 = scalar_lea.vmem [#allocation6], %s1745_s26 }
  0x7a   : > { %4255 = sst [smem:[#allocation25_spill]] %s2183_s5 }
  0x7b   : > { %1941 = dma.done.wait (%p4254_p1), %s205_s27, 1536  }
  0x7c   : > { %1943 = vsyncadd (%p4254_p1), %s205_s27, 4294965760  ;;  %p4256_p13 = scmp.eq.s32.totalorder %s2020_s16, 0 }
  0x7e   : > { %1945 = dma.done.wait (%p4256_p13), [#allocation5], 32   ;;  %p4257_p3 = pmov %p4256_p13 }
  0x80   : > { %1947 = vsyncadd (%p4257_p3), [#allocation5], 4294967264 }
  0x81   : > { %217 = sfence }
  0x82   : > { %v2194_v0 = vld [vmem:[%s2175_s29] sm:$0xff]  ;;  %v2197_v1 = vld [vmem:[%s2175_s29 + $0x10] sm:$0xff]  ;;  %s1973_s23 = smov 16   ;;  %v2204_v2 = vld [vmem:[%s2175_s29 + $0x8] sm:$0xff]  ;;  %vm262_vm0 = vcmask 1047680   ;;  %s1974_s8 = smov 113   ;;  %v241_v40 = vlaneseq }
  0x83   : > { %263 = vrot.lane.b32.xlu0 %v2194_v0, %s1973_s23  ;;  %550 = vrot.lane.b32.xlu1 %v2197_v1, %s1973_s23  ;;  %v2207_v3 = vld [vmem:[%s2175_s29 + $0x18] sm:$0xff]  ;;  %v2214_v4 = vld [vmem:[%s2175_s29 + $0x28] sm:$0xff]  ;;  %s1975_s17 = smov 127   ;;  %s2273_s19 = sld [smem:[#allocation8 + $0x3]]  ;;  %v315_v42 = vrot.slane %v2204_v2, 7  ;;  %v314_v43 = vrot.slane %v2194_v0, 7 }
  0x84   : > { %v2217_v5 = vld [vmem:[%s2175_s29 + $0x20] sm:$0xff]  ;;  %v2224_v6 = vld [vmem:[%s2175_s29 + $0x38] sm:$0xff]  ;;  %v2227_v7 = vld [vmem:[%s2175_s29 + $0x30] sm:$0xff]  ;;  %s2275_s20 = sld [smem:[#allocation8 + $0x27]]  ;;  %s2277_s28 = sld [smem:[#allocation8 + $0x4b]]  ;;  %v2305_v41 = vshrl.u32 %v241_v40, 7 }
  0x85   : > { %4258 = vst [vmem:[#allocation26_spill] sm:$0xff] %v2224_v6  ;;  %4259 = vst [vmem:[#allocation27_spill] sm:$0xff] %v2227_v7  ;;  %s2279_s10 = sld [smem:[#allocation8 + $0x6f]]  ;;  %s2281_s9 = sld [smem:[#allocation8]]  ;;  %v2357_v53 = vand.u32 127, %v241_v40  ;;  %v885_v56 = vrot.slane %v2217_v5, 7 }
  0x86   : > { %s2283_s11 = sld [smem:[#allocation8 + $0x24]]  ;;  %s2285_s30 = sld [smem:[#allocation8 + $0x48]]  ;;  %4272 = vst [vmem:[#allocation40_spill] sm:$0xff] %v2305_v41  ;;  %vm285_vm1 = vcmp.lt.s32.totalorder %v2305_v41, 1  ;;  %vm246_vm2 = vcmp.ge.s32.totalorder %v2305_v41, 1  ;;  %v2341_v48 = vadd.s32 8, %v2305_v41 }
  0x87   : > { %266 = vrot.lane.b32.xlu0 %v2204_v2, %s1973_s23  ;;  %553 = vrot.lane.b32.xlu1 %v2207_v3, %s1973_s23  ;;  %s2287_s4 = sld [smem:[#allocation8 + $0x6c]]  ;;  %s2289_s6 = sld [smem:[#allocation8 + $0x1]]  ;;  %v317_v44 = vsel %vm285_vm1, %v315_v42, %v314_v43  ;;  %v316_v51 = vsel %vm285_vm1, %v314_v43, %v315_v42  ;;  %4282 = vst [vmem:[#allocation50_spill] sm:$0xff] %v2357_v53  ;;  %vm458_vm3 = vcmp.lt.s32.totalorder %v2305_v41, 7  ;;  %vm248_vm5 = vcmp.ge.s32.totalorder %v2357_v53, 1 }
  0x88   : > { %s2291_s7 = sld [smem:[#allocation8 + $0x25]]  ;;  %s2293_s26 = sld [smem:[#allocation8 + $0x49]]  ;;  %4281 = vst [vmem:[#allocation49_spill] sm:$0xff] %v2341_v48  ;;  %v318_v52 = vsel %vm246_vm2, %v317_v44, 0.0  ;;  %vm255_vm4 = vcmp.lt.s32.totalorder %v2341_v48, 15  ;;  %vm2912_vm6 = vmand %vm246_vm2, %vm248_vm5  ;;  %vm251_vm7 = vcmp.lt.s32.totalorder %v2357_v53, 15 }
  0x89   : > { %4260 = sst [smem:[#allocation28_spill]] %s2273_s19  ;;  %s2295_s27 = sld [smem:[#allocation8 + $0x6d]]  ;;  %vm2926_vm8 = vmand %vm255_vm4, %vm248_vm5  ;;  %vm1402_vm10 = vcmask 130048  }
  0x8a   : > { %4261 = sst [smem:[#allocation29_spill]] %s2275_s20  ;;  %s2303_s0 = sld [smem:[#allocation8 + $0x72]]  ;;  %vm3029_vm9 = vmand %vm246_vm2, %vm251_vm7 }
  0x8b   : > { %838 = vrot.lane.b32.xlu1 %v2214_v4, %s1973_s23  ;;  %835 = vrot.lane.b32.xlu0 %v2217_v5, %s1973_s23  ;;  %4262 = sst [smem:[#allocation30_spill]] %s2277_s28  ;;  %s2309_s1 = sld [smem:[#allocation8 + $0x5]]  ;;  %vm3119_vm11 = vmand %vm255_vm4, %vm251_vm7 }
  0x8c   : > { %4263 = sst [smem:[#allocation31_spill]] %s2279_s10  ;;  %s2311_s2 = sld [smem:[#allocation8 + $0x29]] }
  0x8d   : > { %4264 = sst [smem:[#allocation32_spill]] %s2281_s9  ;;  %s2314_s21 = sld [smem:[#allocation8 + $0x4d]]  ;;  %v321_v50 = vstv %s2289_s6 }
  0x8e   : > { %4265 = sst [smem:[#allocation33_spill]] %s2283_s11  ;;  %s2318_s13 = sld [smem:[#allocation8 + $0x2]]  ;;  %v327_v55 = vstv %s2291_s7  ;;  %v333_v59 = vstv %s2293_s26  ;;  %v2377_v62 = vmul.f32 %v321_v50, %v318_v52  ;;  %v2379_v63 = vmul.f32 %v321_v50, %v316_v51 }
  0x8f   : > { %1123 = vrot.lane.b32.xlu1 %v2224_v6, %s1973_s23  ;;  %1120 = vrot.lane.b32.xlu0 %v2227_v7, %s1973_s23  ;;  %4266 = sst [smem:[#allocation34_spill]] %s2285_s30  ;;  %s2316_s14 = sld [smem:[#allocation8 + $0x71]]  ;;  %v339_v60 = vstv %s2295_s27 }
  0x90   : > { %4267 = sst [smem:[#allocation35_spill]] %s2287_s4  ;;  %s2320_s18 = sld [smem:[#allocation8 + $0x26]] }
  0x91   : > { %4271 = sst [smem:[#allocation39_spill]] %s2303_s0  ;;  %s2322_s15 = sld [smem:[#allocation8 + $0x4a]] }
  0x92   : > { %4273 = sst [smem:[#allocation41_spill]] %s2309_s1  ;;  %s2324_s25 = sld [smem:[#allocation8 + $0x6e]] }
  0x93   : > { %4274 = sst [smem:[#allocation42_spill]] %s2311_s2  ;;  %s2329_s12 = sld [smem:[#allocation8 + $0x4]] }
  0x94   : > { %4275 = sst [smem:[#allocation43_spill]] %s2314_s21  ;;  %s2331_s24 = sld [smem:[#allocation8 + $0x28]] }
  0x95   : > { %4276 = sst [smem:[#allocation44_spill]] %s2316_s14  ;;  %s2333_s3 = sld [smem:[#allocation8 + $0x4c]] }
  0x96   : > { %4277 = sst [smem:[#allocation45_spill]] %s2318_s13  ;;  %s2335_s16 = sld [smem:[#allocation8 + $0x70]] }
  0x97   : > { %4278 = sst [smem:[#allocation46_spill]] %s2320_s18  ;;  %s2343_s29 = sld [smem:[#allocation8 + $0x7]] }
  0x98   : > { %4279 = sst [smem:[#allocation47_spill]] %s2322_s15  ;;  %s2345_s5 = sld [smem:[#allocation8 + $0x2b]] }
  0x99   : > { %4280 = sst [smem:[#allocation48_spill]] %s2324_s25  ;;  %s2355_s28 = sld [smem:[#allocation8 + $0x73]] }
  0x9a   : > { %s2353_s22 = sld [smem:[#allocation8 + $0x4f]]  ;;  %s2362_s6 = sld [smem:[#allocation8 + $0x8]] }
  0x9b   : > { %s2364_s10 = sld [smem:[#allocation8 + $0x2c]]  ;;  %s2370_s20 = sld [smem:[#allocation8 + $0x50]] }
  0x9c   : > { %s2372_s19 = sld [smem:[#allocation8 + $0x74]]  ;;  %s2383_s9 = sld [smem:[#allocation8 + $0x30]] }
  0x9d   : > { %s2381_s7 = sld [smem:[#allocation8 + $0xc]]  ;;  %s2393_s27 = sld [smem:[#allocation8 + $0x78]] }
  0x9e   : > { %s2391_s26 = sld [smem:[#allocation8 + $0x54]]  ;;  %s2411_s0 = sld [smem:[#allocation8 + $0x51]] }
  0x9f   : > { %s2419_s4 = sld [smem:[#allocation8 + $0xf]]  ;;  %s2421_s30 = sld [smem:[#allocation8 + $0x33]]  ;;  %v512_v43 = vstv %s2355_s28 }
  0xa0   : > { %4283 = sst [smem:[#allocation51_spill]] %s2362_s6  ;;  %s2427_s1 = sld [smem:[#allocation8 + $0x57]]  ;;  %v506_v42 = vstv %s2353_s22 }
  0xa1   : > { %4284 = sst [smem:[#allocation52_spill]] %s2364_s10  ;;  %s2429_s11 = sld [smem:[#allocation8 + $0x7b]] }
  0xa2   : > { %4285 = sst [smem:[#allocation53_spill]] %s2370_s20  ;;  %s2463_s25 = sld [smem:[#allocation8 + $0xb]] }
  0xa3   : > { %4286 = sst [smem:[#allocation54_spill]] %s2372_s19  ;;  %s2465_s15 = sld [smem:[#allocation8 + $0x2f]] }
  0xa4   : > { %4287 = sst [smem:[#allocation55_spill]] %s2393_s27  ;;  %s2474_s18 = sld [smem:[#allocation8 + $0x53]] }
  0xa5   : > { %4289 = sst [smem:[#allocation57_spill]] %s2411_s0  ;;  %s2476_s13 = sld [smem:[#allocation8 + $0x77]] }
  0xa6   : > { %4291 = sst [smem:[#allocation59_spill]] %s2419_s4  ;;  %s2496_s22 = sld [smem:[#allocation8 + $0xa]] }
  0xa7   : > { %4292 = sst [smem:[#allocation60_spill]] %s2421_s30  ;;  %s2506_s19 = sld [smem:[#allocation8 + $0x2e]] }
  0xa8   : > { %4293 = sst [smem:[#allocation61_spill]] %s2427_s1  ;;  %s2498_s28 = sld [smem:[#allocation8 + $0x59]] }
  0xa9   : > { %4294 = sst [smem:[#allocation62_spill]] %s2429_s11  ;;  %s2508_s20 = sld [smem:[#allocation8 + $0x7d]] }
  0xaa   : > { %4299 = sst [smem:[#allocation67_spill]] %s2463_s25  ;;  %s2518_s10 = sld [smem:[#allocation8 + $0x52]] }
  0xab   : > { %4300 = sst [smem:[#allocation68_spill]] %s2465_s15  ;;  %s2520_s6 = sld [smem:[#allocation8 + $0xd]] }
  0xac   : > { %4301 = sst [smem:[#allocation69_spill]] %s2474_s18  ;;  %s2526_s14 = sld [smem:[#allocation8 + $0x76]] }
  0xad   : > { %4302 = sst [smem:[#allocation70_spill]] %s2476_s13  ;;  %s2528_s21 = sld [smem:[#allocation8 + $0x31]] }
  0xae   : > { %4307 = sst [smem:[#allocation75_spill]] %s2498_s28  ;;  %s2534_s2 = sld [smem:[#allocation8 + $0x55]] }
  0xaf   : > { %4310 = sst [smem:[#allocation78_spill]] %s2508_s20  ;;  %s2539_s27 = sld [smem:[#allocation8 + $0x79]] }
  0xb0   : > { %s2549_s0 = sld [smem:[#allocation8 + $0x34]]  ;;  %s2555_s1 = sld [smem:[#allocation8 + $0x58]] }
  0xb1   : > { %s2564_s15 = sld [smem:[#allocation8 + $0x15]]  ;;  %s2579_s25 = sld [smem:[#allocation8 + $0x81]] }
  0xb2   : > { %s2573_s18 = sld [smem:[#allocation8 + $0x5d]]  ;;  %v625_v50 = vstv %s2526_s14  ;;  %s2601_s14 = sld [smem:[#allocation8 + $0x18]] }
  0xb3   : > { %s2626_s20 = sld [smem:[#allocation8 + $0x17]]  ;;  %s2674_s13 = sld [smem:[#allocation8 + $0x14]] }
  0xb4   : > { %s2650_s28 = sld [smem:[#allocation8 + $0x37]]  ;;  %s2684_s11 = sld [smem:[#allocation8 + $0x38]] }
  0xb5   : > { %s2686_s30 = sld [smem:[#allocation8 + $0x5c]]  ;;  %s2703_s4 = sld [smem:[#allocation8 + $0x80]] }
  0xb6   : > { %v791_v57 = vstv %s2555_s1  ;;  %s2662_s1 = sld [smem:[#allocation8 + $0x5b]] }
  0xb7   : > { %4315 = sst [smem:[#allocation83_spill]] %s2564_s15  ;;  %s2711_s15 = sld [smem:[#allocation8 + $0x82]] }
  0xb8   : > { %4316 = sst [smem:[#allocation84_spill]] %s2579_s25 }
  0xb9   : > { %4321 = sst [smem:[#allocation89_spill]] %s2601_s14  ;;  %s2716_s25 = sld [smem:[#allocation8 + $0x19]] }
  0xba   : > { %4330 = sst [smem:[#allocation98_spill]] %s2626_s20  ;;  %s2725_s14 = sld [smem:[#allocation8 + $0x61]] }
  0xbb   : > { %4344 = sst [smem:[#allocation112_spill]] %s2674_s13  ;;  %s2775_s13 = sld [smem:[#allocation8 + $0x3f]] }
  0xbc   : > { %4349 = sst [smem:[#allocation117_spill]] %s2684_s11  ;;  %s2773_s11 = sld [smem:[#allocation8 + $0x1b]] }
  0xbd   : > { %4350 = sst [smem:[#allocation118_spill]] %s2686_s30  ;;  %s2814_s30 = sld [smem:[#allocation8 + $0x8c]] }
  0xbe   : > { %4353 = sst [smem:[#allocation121_spill]] %s2703_s4  ;;  %s2812_s4 = sld [smem:[#allocation8 + $0x68]] }
  0xbf   : > { %s4390_s20 = sld [smem:[#allocation30_spill]] }
  0xf5   : > { %v264_v8 = vpop.permute.xlu0 %263  ;;  %v551_v9 = vpop.permute.xlu1 %550 }
  0xf6   : > { %v265_v10 = vsel %vm262_vm0, %v264_v8, %v2194_v0  ;;  %v552_v11 = vsel %vm262_vm0, %v551_v9, %v2197_v1  ;;  %v785_v8 = vstv %s2549_s0  ;;  %s2640_s0 = sld [smem:[#allocation8 + $0x13]] }
  0xf7   : > { %269 = vrot.lane.b32.xlu0 %v265_v10, %s1973_s23  ;;  %v2387_v10 = vmul.f32 %v327_v55, %v318_v52 }
  0xf9   : > { %v267_v12 = vpop.permute.xlu0 %266  ;;  %v554_v13 = vpop.permute.xlu1 %553 }
  0xfa   : > { %v268_v14 = vsel %vm262_vm0, %v267_v12, %v2204_v2  ;;  %v555_v15 = vsel %vm262_vm0, %v554_v13, %v2207_v3  ;;  %v2396_v13 = vmul.f32 %v333_v59, %v318_v52 }
  0xfb   : > { %271 = vrot.lane.b32.xlu1 %v268_v14, %s1973_s23  ;;  %556 = vrot.lane.b32.xlu0 %v552_v11, %s1973_s23  ;;  %v2389_v11 = vmul.f32 %v327_v55, %v316_v51  ;;  %v488_v14 = vrot.slane %v2204_v2, 1  ;;  %v607_v55 = vstv %s2496_s22  ;;  %s2571_s22 = sld [smem:[#allocation8 + $0x39]] }
  0xfc   : > { %v892_v45 = vstv %s2640_s0  ;;  %s2735_s0 = sld [smem:[#allocation8 + $0x1a]] }
  0xfd   : > { %v839_v16 = vpop.permute.xlu1 %838  ;;  %v836_v17 = vpop.permute.xlu0 %835 }
  0xfe   : > { %v837_v18 = vsel %vm262_vm0, %v836_v17, %v2217_v5  ;;  %v840_v19 = vsel %vm262_vm0, %v839_v16, %v2214_v4  ;;  %v2404_v16 = vmul.f32 %v333_v59, %v316_v51  ;;  %v2406_v17 = vmul.f32 %v339_v60, %v318_v52 }
  0xff   : > { %558 = vrot.lane.b32.xlu1 %v555_v15, %s1973_s23  ;;  %841 = vrot.lane.b32.xlu0 %v837_v18, %s1973_s23  ;;  %v487_v15 = vrot.slane %v2194_v0, 1  ;;  %v2408_v18 = vmul.f32 %v339_v60, %v316_v51  ;;  %v613_v51 = vstv %s2506_s19  ;;  %s2588_s19 = sld [smem:[#allocation8 + $0x36]] }
 0x101   : > { %v1124_v20 = vpop.permute.xlu1 %1123  ;;  %v1121_v21 = vpop.permute.xlu0 %1120 }
 0x102   : > { %v1122_v22 = vsel %vm262_vm0, %v1121_v21, %v2227_v7  ;;  %v1125_v23 = vsel %vm262_vm0, %v1124_v20, %v2224_v6  ;;  %v711_v20 = vstv %s2539_s27  ;;  %s2638_s27 = sld [smem:[#allocation8 + $0x3b]]  ;;  %4354 = sst [smem:[#allocation122_spill]] %s2735_s0 }
 0x103   : > { %843 = vrot.lane.b32.xlu1 %v840_v19, %s1973_s23  ;;  %1126 = vrot.lane.b32.xlu0 %v1122_v22, %s1973_s23  ;;  %v407_v22 = vstv %s2329_s12  ;;  %s2436_s12 = sld [smem:[#allocation8 + $0xe]]  ;;  %v2643_v58 = vmul.f32 %v2197_v1, %v711_v20  ;;  %s4389_s0 = sld [smem:[#allocation29_spill]] }
 0x105   : > { %4334 = vst [vmem:[#allocation102_spill] sm:$0xff] %v2643_v58 }
 0x107   : > { %1128 = vrot.lane.b32.xlu1 %v1125_v23, %s1973_s23  ;;  %s2297_s23 = sld [smem:[#allocation8 + $0x6]]  ;;  %v413_v23 = vstv %s2331_s24  ;;  %s2438_s24 = sld [smem:[#allocation8 + $0x32]] }
 0x108   : > { %4333 = sst [smem:[#allocation101_spill]] %s2638_s27 }
 0x109   : > { %4295 = sst [smem:[#allocation63_spill]] %s2436_s12  ;;  %s2695_s12 = sld [smem:[#allocation8 + $0x3a]] }
 0x10a   : > { %s2843_s27 = sld [smem:[#allocation8 + $0x40]] }
 0x10d   : > { %4268 = sst [smem:[#allocation36_spill]] %s2297_s23  ;;  %s2413_s23 = sld [smem:[#allocation8 + $0x75]] }
 0x10e   : > { %4296 = sst [smem:[#allocation64_spill]] %s2438_s24  ;;  %s2693_s24 = sld [smem:[#allocation8 + $0x16]] }
 0x113   : > { %4290 = sst [smem:[#allocation58_spill]] %s2413_s23  ;;  %s2547_s23 = sld [smem:[#allocation8 + $0x10]] }
 0x119   : > { %v779_v9 = vstv %s2547_s23  ;;  %s2646_s23 = sld [smem:[#allocation8 + $0x5f]] }
 0x11f   : > { %4335 = sst [smem:[#allocation103_spill]] %s2646_s23  ;;  %s2754_s23 = sld [smem:[#allocation8 + $0x1e]] }
 0x169   : > { %v270_v24 = vpop.permute.xlu0 %269 }
 0x16a   : > { %v273_v25 = vsel %vm262_vm0, %v270_v24, %v2194_v0 }
 0x16b   : > { %277 = vrot.lane.b32.xlu0 %v273_v25, %s1974_s8 }
 0x16d   : > { %v272_v26 = vpop.permute.xlu1 %271  ;;  %v557_v27 = vpop.permute.xlu0 %556 }
 0x16e   : > { %v274_v28 = vsel %vm262_vm0, %v272_v26, %v2204_v2  ;;  %v560_v29 = vsel %vm262_vm0, %v557_v27, %v2197_v1  ;;  %v419_v27 = vstv %s2333_s3  ;;  %s2452_s3 = sld [smem:[#allocation8 + $0x56]] }
 0x16f   : > { %279 = vrot.lane.b32.xlu1 %v274_v28, %s1974_s8  ;;  %344 = vrot.lane.b32.xlu0 %v273_v25, %s1975_s17 }
 0x171   : > { %v559_v30 = vpop.permute.xlu1 %558  ;;  %v842_v32 = vpop.permute.xlu0 %841 }
 0x172   : > { %v561_v31 = vsel %vm262_vm0, %v559_v30, %v2207_v3  ;;  %v845_v33 = vsel %vm262_vm0, %v842_v32, %v2217_v5  ;;  %v425_v30 = vstv %s2335_s16  ;;  %v2441_v32 = vmul.f32 %v407_v22, %v2204_v2  ;;  %s2454_s16 = sld [smem:[#allocation8 + $0x7a]] }
 0x173   : > { %346 = vrot.lane.b32.xlu1 %v274_v28, %s1975_s17  ;;  %564 = vrot.lane.b32.xlu0 %v560_v29, %s1974_s8  ;;  %v2468_v40 = vmul.f32 %v425_v30, %v2204_v2  ;;  %v2490_v59 = vmul.f32 %v425_v30, %v2194_v0 }
 0x174   : > { %4297 = sst [smem:[#allocation65_spill]] %s2452_s3  ;;  %s2560_s3 = sld [smem:[#allocation8 + $0x7c]] }
 0x175   : > { %v844_v34 = vpop.permute.xlu1 %843  ;;  %v1127_v36 = vpop.permute.xlu0 %1126 }
 0x176   : > { %v846_v35 = vsel %vm262_vm0, %v844_v34, %v2214_v4  ;;  %v1130_v37 = vsel %vm262_vm0, %v1127_v36, %v2227_v7  ;;  %v2447_v34 = vmul.f32 %v407_v22, %v2194_v0  ;;  %v2457_v36 = vmul.f32 %v419_v27, %v2204_v2 }
 0x177   : > { %566 = vrot.lane.b32.xlu1 %v561_v31, %s1974_s8  ;;  %630 = vrot.lane.b32.xlu0 %v560_v29, %s1975_s17 }
 0x178   : > { %4298 = sst [smem:[#allocation66_spill]] %s2454_s16  ;;  %s2581_s16 = sld [smem:[#allocation8 + $0x12]] }
 0x179   : > { %v1129_v38 = vpop.permute.xlu1 %1128 }
 0x17a   : > { %v1131_v39 = vsel %vm262_vm0, %v1129_v38, %v2224_v6  ;;  %v500_v38 = vstv %s2345_s5  ;;  %s2484_s5 = sld [smem:[#allocation8 + $0x35]] }
 0x17b   : > { %632 = vrot.lane.b32.xlu1 %v561_v31, %s1975_s17  ;;  %849 = vrot.lane.b32.xlu0 %v845_v33, %s1974_s8  ;;  %v490_v31 = vsel %vm458_vm3, %v488_v14, %v487_v15 }
 0x17c   : > { %v492_v44 = vsel %vm255_vm4, %v490_v31, 0.0 }
 0x17d   : > { %v2512_v30 = vmul.f32 %v506_v42, %v492_v44 }
 0x17e   : > { %4317 = sst [smem:[#allocation85_spill]] %s2581_s16  ;;  %s2718_s16 = sld [smem:[#allocation8 + $0x3d]] }
 0x17f   : > { %851 = vrot.lane.b32.xlu1 %v846_v35, %s1974_s8  ;;  %915 = vrot.lane.b32.xlu0 %v845_v33, %s1975_s17  ;;  %v2444_v33 = vmul.f32 %v413_v23, %v2204_v2  ;;  %v2487_v2 = vmul.f32 %v419_v27, %v2194_v0  ;;  %v2510_v27 = vmul.f32 %v500_v38, %v492_v44 }
 0x180   : > { %4304 = sst [smem:[#allocation72_spill]] %s2484_s5  ;;  %4312 = vst [vmem:[#allocation80_spill] sm:$0xff] %v2512_v30  ;;  %s2660_s5 = sld [smem:[#allocation8 + $0x83]] }
 0x181   : > { %4311 = vst [vmem:[#allocation79_spill] sm:$0xff] %v2510_v27 }
 0x183   : > { %917 = vrot.lane.b32.xlu1 %v846_v35, %s1975_s17  ;;  %1134 = vrot.lane.b32.xlu0 %v1130_v37, %s1974_s8  ;;  %v2450_v35 = vmul.f32 %v413_v23, %v2194_v0  ;;  %v600_v23 = vrot.slane %v2197_v1, 7  ;;  %v601_v0 = vrot.slane %v2207_v3, 7 }
 0x185   : > { %v602_v29 = vsel %vm285_vm1, %v600_v23, %v601_v0 }
 0x186   : > { %v2610_v19 = vmul.f32 %v613_v51, %v602_v29  ;;  %4339 = sst [smem:[#allocation107_spill]] %s2660_s5  ;;  %v2666_v49 = vmul.f32 %v625_v50, %v602_v29 }
 0x187   : > { %1136 = vrot.lane.b32.xlu1 %v1131_v39, %s1974_s8  ;;  %1200 = vrot.lane.b32.xlu0 %v1130_v37, %s1975_s17  ;;  %s2299_s8 = sld [smem:[#allocation8 + $0x2a]]  ;;  %v494_v37 = vstv %s2343_s29  ;;  %s2482_s29 = sld [smem:[#allocation8 + $0x11]] }
 0x188   : > { %4324 = vst [vmem:[#allocation92_spill] sm:$0xff] %v2610_v19  ;;  %4341 = vst [vmem:[#allocation109_spill] sm:$0xff] %v2666_v49  ;;  %s2756_s5 = sld [smem:[#allocation8 + $0x42]] }
 0x18b   : > { %1202 = vrot.lane.b32.xlu1 %v1131_v39, %s1975_s17  ;;  %s2301_s17 = sld [smem:[#allocation8 + $0x4e]]  ;;  %v489_v39 = vsel %vm458_vm3, %v487_v15, %v488_v14  ;;  %v2500_v15 = vmul.f32 %v494_v37, %v492_v44 }
 0x18c   : > { %v2492_v60 = vmul.f32 %v494_v37, %v489_v39  ;;  %v2494_v14 = vmul.f32 %v500_v38, %v489_v39  ;;  %v2502_v22 = vmul.f32 %v506_v42, %v489_v39  ;;  %v2514_v31 = vmul.f32 %v512_v43, %v489_v39 }
 0x18d   : > { %4269 = sst [smem:[#allocation37_spill]] %s2299_s8  ;;  %4308 = vst [vmem:[#allocation76_spill] sm:$0xff] %v2500_v15  ;;  %v2516_v37 = vmul.f32 %v512_v43, %v492_v44  ;;  %v603_v38 = vsel %vm285_vm1, %v601_v0, %v600_v23  ;;  %v772_v44 = vrot.slane %v2197_v1, 1  ;;  %v773_v43 = vrot.slane %v2207_v3, 1 }
 0x18e   : > { %s2402_s8 = sld [smem:[#allocation8 + $0x2d]]  ;;  %4303 = sst [smem:[#allocation71_spill]] %s2482_s29  ;;  %4305 = vst [vmem:[#allocation73_spill] sm:$0xff] %v2492_v60  ;;  %4306 = vst [vmem:[#allocation74_spill] sm:$0xff] %v2494_v14  ;;  %v604_v52 = vsel %vm246_vm2, %v603_v38, 0.0  ;;  %v693_v42 = vstv %s2520_s6  ;;  %v619_v38 = vstv %s2518_s10  ;;  %v699_v39 = vstv %s2528_s21 }
 0x18f   : > { %4309 = vst [vmem:[#allocation77_spill] sm:$0xff] %v2502_v22  ;;  %4313 = vst [vmem:[#allocation81_spill] sm:$0xff] %v2514_v31  ;;  %v2586_v24 = vmul.f32 %v607_v55, %v604_v52  ;;  %s2590_s29 = sld [smem:[#allocation8 + $0x5a]]  ;;  %v705_v23 = vstv %s2534_s2  ;;  %v2593_v0 = vmul.f32 %v607_v55, %v602_v29  ;;  %v2595_v25 = vmul.f32 %v613_v51, %v604_v52  ;;  %s2599_s6 = sld [smem:[#allocation8 + $0x7e]] }
 0x190   : > { %4314 = vst [vmem:[#allocation82_spill] sm:$0xff] %v2516_v37  ;;  %v775_v26 = vsel %vm458_vm3, %v773_v43, %v772_v44  ;;  %v2604_v28 = vmul.f32 %v2197_v1, %v693_v42  ;;  %v2607_v21 = vmul.f32 %v2207_v3, %v693_v42  ;;  %s2612_s2 = sld [smem:[#allocation8 + $0x3c]]  ;;  %s2614_s21 = sld [smem:[#allocation8 + $0x60]]  ;;  %v2617_v55 = vmul.f32 %v2197_v1, %v699_v39 }
 0x191   : > { %4270 = sst [smem:[#allocation38_spill]] %s2301_s17  ;;  %s2400_s17 = sld [smem:[#allocation8 + $0x9]]  ;;  %4318 = vst [vmem:[#allocation86_spill] sm:$0xff] %v2586_v24  ;;  %4319 = vst [vmem:[#allocation87_spill] sm:$0xff] %v2593_v0  ;;  %v2620_v12 = vmul.f32 %v2207_v3, %v699_v39  ;;  %v2629_v51 = vmul.f32 %v2197_v1, %v705_v23  ;;  %v2632_v42 = vmul.f32 %v2207_v3, %v705_v23  ;;  %v777_v39 = vsel %vm255_vm4, %v775_v26, 0.0 }
 0x192   : > { %4320 = vst [vmem:[#allocation88_spill] sm:$0xff] %v2595_v25  ;;  %4322 = vst [vmem:[#allocation90_spill] sm:$0xff] %v2604_v28  ;;  %s2624_s10 = sld [smem:[#allocation8 + $0x84]]  ;;  %v774_v61 = vsel %vm458_vm3, %v772_v44, %v773_v43  ;;  %v886_v23 = vrot.slane %v2214_v4, 7  ;;  %v2653_v43 = vmul.f32 %v2207_v3, %v711_v20  ;;  %v797_v26 = vstv %s2560_s3  ;;  %s2672_s3 = sld [smem:[#allocation8 + $0x7f]] }
 0x193   : > { %4323 = vst [vmem:[#allocation91_spill] sm:$0xff] %v2607_v21  ;;  %4327 = vst [vmem:[#allocation95_spill] sm:$0xff] %v2617_v55  ;;  %v2656_v44 = vmul.f32 %v619_v38, %v604_v52  ;;  %v2658_v54 = vmul.f32 %v619_v38, %v602_v29  ;;  %v2664_v1 = vmul.f32 %v625_v50, %v604_v52  ;;  %4361 = sst [smem:[#allocation129_spill]] %s2756_s5  ;;  %s4391_s5 = sld [smem:[#allocation31_spill]] }
 0x194   : > { %4288 = sst [smem:[#allocation56_spill]] %s2402_s8  ;;  %4328 = vst [vmem:[#allocation96_spill] sm:$0xff] %v2620_v12  ;;  %4331 = vst [vmem:[#allocation99_spill] sm:$0xff] %v2629_v51  ;;  %v2668_v47 = vmul.f32 %v779_v9, %v774_v61  ;;  %v2670_v46 = vmul.f32 %v785_v8, %v774_v61  ;;  %v2676_v3 = vmul.f32 %v779_v9, %v777_v39  ;;  %s2705_s8 = sld [smem:[#allocation8 + $0x5e]]  ;;  %v898_v9 = vstv %s2650_s28 }
 0x195   : > { %4332 = vst [vmem:[#allocation100_spill] sm:$0xff] %v2632_v42  ;;  %4336 = vst [vmem:[#allocation104_spill] sm:$0xff] %v2653_v43  ;;  %v2678_v20 = vmul.f32 %v785_v8, %v777_v39  ;;  %v2680_v52 = vmul.f32 %v791_v57, %v774_v61  ;;  %v2682_v29 = vmul.f32 %v791_v57, %v777_v39  ;;  %s2737_s28 = sld [smem:[#allocation8 + $0x3e]] }
 0x196   : > { %4325 = sst [smem:[#allocation93_spill]] %s2612_s2  ;;  %4337 = vst [vmem:[#allocation105_spill] sm:$0xff] %v2656_v44  ;;  %4338 = vst [vmem:[#allocation106_spill] sm:$0xff] %v2658_v54  ;;  %v2688_v50 = vmul.f32 %v797_v26, %v774_v61  ;;  %v2690_v38 = vmul.f32 %v797_v26, %v777_v39  ;;  %v888_v57 = vsel %vm285_vm1, %v886_v23, %v885_v56  ;;  %v904_v39 = vstv %s2662_s1  ;;  %s2744_s2 = sld [smem:[#allocation8 + $0x86]] }
 0x197   : > { %4326 = sst [smem:[#allocation94_spill]] %s2614_s21  ;;  %4340 = vst [vmem:[#allocation108_spill] sm:$0xff] %v2664_v1  ;;  %4342 = vst [vmem:[#allocation110_spill] sm:$0xff] %v2668_v47  ;;  %v889_v26 = vsel %vm246_vm2, %v888_v57, 0.0  ;;  %v887_v8 = vsel %vm285_vm1, %v885_v56, %v886_v23  ;;  %s2763_s1 = sld [smem:[#allocation8 + $0x66]] }
 0x198   : > { %4329 = sst [smem:[#allocation97_spill]] %s2624_s10  ;;  %4343 = vst [vmem:[#allocation111_spill] sm:$0xff] %v2670_v46  ;;  %4345 = vst [vmem:[#allocation113_spill] sm:$0xff] %v2676_v3  ;;  %s2727_s21 = sld [smem:[#allocation8 + $0x85]]  ;;  %v2746_v56 = vmul.f32 %v892_v45, %v889_v26  ;;  %v2750_v61 = vmul.f32 %v892_v45, %v887_v8  ;;  %v978_v46 = vstv %s2693_s24  ;;  %v984_v3 = vstv %s2695_s12 }
 0x199   : > { %4346 = vst [vmem:[#allocation114_spill] sm:$0xff] %v2678_v20  ;;  %4347 = vst [vmem:[#allocation115_spill] sm:$0xff] %v2680_v52  ;;  %v1058_v52 = vrot.slane %v2214_v4, 1  ;;  %v910_v20 = vstv %s2672_s3  ;;  %s2742_s10 = sld [smem:[#allocation8 + $0x62]]  ;;  %v2761_v47 = vmul.f32 %v898_v9, %v887_v8  ;;  %v2769_v45 = vmul.f32 %v904_v39, %v889_v26  ;;  %s2787_s12 = sld [smem:[#allocation8 + $0x87]] }
 0x19a   : > { %4348 = vst [vmem:[#allocation116_spill] sm:$0xff] %v2682_v29  ;;  %4351 = vst [vmem:[#allocation119_spill] sm:$0xff] %v2688_v50  ;;  %v2752_v50 = vmul.f32 %v898_v9, %v889_v26  ;;  %s2765_s3 = sld [smem:[#allocation8 + $0x8a]]  ;;  %v990_v29 = vstv %s2705_s8  ;;  %v996_v9 = vstv %s2711_s15  ;;  %v2779_v57 = vmul.f32 %v910_v20, %v889_v26  ;;  %s2785_s8 = sld [smem:[#allocation8 + $0x63]] }
 0x19b   : > { %4352 = vst [vmem:[#allocation120_spill] sm:$0xff] %v2690_v38  ;;  %v1057_v38 = vrot.slane %v2217_v5, 1  ;;  %4355 = sst [smem:[#allocation123_spill]] %s2737_s28  ;;  %4358 = vst [vmem:[#allocation126_spill] sm:$0xff] %v2746_v56  ;;  %v2796_v26 = vmul.f32 %v2217_v5, %v984_v3  ;;  %s2803_s24 = sld [smem:[#allocation8 + $0x44]] }
 0x19c   : > { %4357 = sst [smem:[#allocation125_spill]] %s2744_s2  ;;  %4359 = vst [vmem:[#allocation127_spill] sm:$0xff] %v2750_v61  ;;  %4360 = vst [vmem:[#allocation128_spill] sm:$0xff] %v2752_v50  ;;  %v2771_v61 = vmul.f32 %v904_v39, %v887_v8  ;;  %v2790_v39 = vmul.f32 %v2217_v5, %v978_v46  ;;  %s2801_s15 = sld [smem:[#allocation8 + $0x20]] }
 0x19d   : > { %4362 = vst [vmem:[#allocation130_spill] sm:$0xff] %v2761_v47  ;;  %4363 = vst [vmem:[#allocation131_spill] sm:$0xff] %v2769_v45  ;;  %v2781_v47 = vmul.f32 %v910_v20, %v887_v8  ;;  %v1060_v23 = vsel %vm458_vm3, %v1058_v52, %v1057_v38  ;;  %v2799_v20 = vmul.f32 %v2214_v4, %v984_v3  ;;  %s2855_s2 = sld [smem:[#allocation8 + $0x88]]  ;;  %s4388_s28 = sld [smem:[#allocation28_spill]] }
 0x19e   : > { %4364 = vst [vmem:[#allocation132_spill] sm:$0xff] %v2771_v61  ;;  %4365 = vst [vmem:[#allocation133_spill] sm:$0xff] %v2779_v57  ;;  %v2793_v61 = vmul.f32 %v2214_v4, %v978_v46  ;;  %v2806_v8 = vmul.f32 %v2217_v5, %v990_v29  ;;  %v1070_v46 = vstv %s2718_s16  ;;  %v2817_v3 = vmul.f32 %v2214_v4, %v990_v29  ;;  %s2833_s16 = sld [smem:[#allocation8 + $0x41]] }
 0x19f   : > { %4356 = sst [smem:[#allocation124_spill]] %s2742_s10  ;;  %4366 = vst [vmem:[#allocation134_spill] sm:$0xff] %v2781_v47  ;;  %4367 = vst [vmem:[#allocation135_spill] sm:$0xff] %v2790_v39  ;;  %v1064_v39 = vstv %s2716_s25  ;;  %v2826_v47 = vmul.f32 %v2214_v4, %v996_v9  ;;  %v1082_v57 = vstv %s2727_s21  ;;  %s2831_s25 = sld [smem:[#allocation8 + $0x1d]] }
 0x1a0   : > { %4368 = vst [vmem:[#allocation136_spill] sm:$0xff] %v2793_v61  ;;  %4369 = vst [vmem:[#allocation137_spill] sm:$0xff] %v2796_v26  ;;  %v1059_v61 = vsel %vm458_vm3, %v1057_v38, %v1058_v52  ;;  %v1076_v26 = vstv %s2725_s14  ;;  %s2841_s14 = sld [smem:[#allocation8 + $0x1c]]  ;;  %s2863_s10 = sld [smem:[#allocation8 + $0x65]]  ;;  %v4392_v52 = vrot.slane %v2224_v6, 7 }
 0x1a1   : > { %4370 = vst [vmem:[#allocation138_spill] sm:$0xff] %v2799_v20  ;;  %4371 = vst [vmem:[#allocation139_spill] sm:$0xff] %v2806_v8  ;;  %v2820_v20 = vmul.f32 %v2217_v5, %v996_v9  ;;  %v1062_v8 = vsel %vm255_vm4, %v1060_v23, 0.0  ;;  %v2837_v5 = vmul.f32 %v1064_v39, %v1059_v61  ;;  %v2849_v9 = vmul.f32 %v1076_v26, %v1059_v61  ;;  %s2853_s21 = sld [smem:[#allocation8 + $0x64]] }
 0x1a2   : > { %4372 = vst [vmem:[#allocation140_spill] sm:$0xff] %v2817_v3  ;;  %4374 = vst [vmem:[#allocation142_spill] sm:$0xff] %v2826_v47  ;;  %v2845_v4 = vmul.f32 %v1064_v39, %v1062_v8  ;;  %v2847_v23 = vmul.f32 %v1070_v46, %v1062_v8  ;;  %v2851_v38 = vmul.f32 %v1076_v26, %v1062_v8  ;;  %v4410_v3 = vstv %s4390_s20 }
 0x1a3   : > { %4373 = vst [vmem:[#allocation141_spill] sm:$0xff] %v2820_v20  ;;  %4377 = vst [vmem:[#allocation145_spill] sm:$0xff] %v2837_v5  ;;  %v2839_v20 = vmul.f32 %v1070_v46, %v1059_v61  ;;  %4384 = sst [smem:[#allocation152_spill]] %s2855_s2  ;;  %v2857_v29 = vmul.f32 %v1082_v57, %v1059_v61  ;;  %v2859_v39 = vmul.f32 %v1082_v57, %v1062_v8  ;;  %v4393_v46 = vrot.slane %v2227_v7, 7  ;;  %s4409_s2 = sld [smem:[#allocation34_spill]] }
 0x1a4   : > { %4376 = sst [smem:[#allocation144_spill]] %s2833_s16  ;;  %4379 = vst [vmem:[#allocation147_spill] sm:$0xff] %v2845_v4  ;;  %4380 = vst [vmem:[#allocation148_spill] sm:$0xff] %v2847_v23  ;;  %v4397_v61 = vstv %s4390_s20  ;;  %s4406_s16 = sld [smem:[#allocation32_spill]] }
 0x1a5   : > { %4375 = sst [smem:[#allocation143_spill]] %s2831_s25  ;;  %4378 = vst [vmem:[#allocation146_spill] sm:$0xff] %v2839_v20  ;;  %4381 = vst [vmem:[#allocation149_spill] sm:$0xff] %v2849_v9  ;;  %v2889_v45 = vsel %vm285_vm1, %v4393_v46, %v4392_v52  ;;  %v4398_v9 = vstv %s4391_s5  ;;  %v4399_v52 = vmov 0  ;;  %s4407_s25 = sld [smem:[#allocation33_spill]]  ;;  %v4408_v46 = vstv %s4389_s0 }
 0x1a6   : > { %4382 = vst [vmem:[#allocation150_spill] sm:$0xff] %v2851_v38  ;;  %4385 = vst [vmem:[#allocation153_spill] sm:$0xff] %v2857_v29  ;;  %4387 = sst [smem:[#allocation155_spill]] %s2863_s10  ;;  %v4396_v29 = vstv %s4389_s0  ;;  %v4400_v52 = vsel %vm2912_vm6, 4294967295, %v4399_v52  ;;  %s4416_s20 = sld [smem:[#allocation36_spill]] }
 0x1a7   : > { %4383 = sst [smem:[#allocation151_spill]] %s2853_s21  ;;  %4386 = vst [vmem:[#allocation154_spill] sm:$0xff] %v2859_v39  ;;  %4394 = vst [vmem:[#allocation156_spill] sm:$0xff] %v2889_v45  ;;  %v4395_v39 = vstv %s4388_s28  ;;  %s4411_s21 = sld [smem:[#allocation35_spill]] }
 0x1a8   : > { %4401 = vst [vmem:[#allocation157_spill] sm:$0xff] %v4400_v52  ;;  %s4419_s0 = sld [smem:[#allocation37_spill]]  ;;  %s4422_s28 = sld [smem:[#allocation38_spill]] }
 0x1a9   : > { %v4417_v28 = vstv %s4409_s2  ;;  %s4425_s2 = sld [smem:[#allocation41_spill]]  ;;  %s4430_s10 = sld [smem:[#allocation44_spill]] }
 0x1aa   : > { %v4418_v49 = vmov %v4417_v28 }
 0x1ab   : > { %v4414_v55 = vstv %s4407_s25  ;;  %s4426_s25 = sld [smem:[#allocation42_spill]] }
 0x1ad   : > { %v4420_v1 = vstv %s4411_s21  ;;  %s4428_s21 = sld [smem:[#allocation43_spill]] }
 0x1ae   : > { %v4421_v54 = vmov %v4420_v1 }
 0x1b3   : > { %v4451_v52 = vstv %s4428_s21 }
 0x1dd   : > { %v278_v8 = vpop.permute.xlu0 %277 }
 0x1de   : > { %v380_v26 = vsel %vm248_vm5, %v278_v8, 0.0  ;;  %v283_v57 = vrot.slane %v278_v8, 7  ;;  %v456_v20 = vrot.slane %v278_v8, 1 }
 0x1df   : > { %v2893_v38 = vmul.f32 %v4395_v39, %v380_v26  ;;  %v2897_v23 = vmul.f32 %v4396_v29, %v380_v26  ;;  %v2901_v4 = vmul.f32 %v4397_v61, %v380_v26  ;;  %v2906_v5 = vmul.f32 %v4398_v9, %v380_v26 }
 0x1e0   : > { %v4403_v9 = vmov 0 }
 0x1e1   : > { %v280_v6 = vpop.permute.xlu1 %279  ;;  %v2916_v29 = vpop.permute.xlu0 %344  ;;  %v4404_v9 = vsel %vm2926_vm8, 4294967295, %v4403_v9 }
 0x1e2   : > { %4402 = vst [vmem:[#allocation158_spill] sm:$0xff] %v2916_v29  ;;  %4405 = vst [vmem:[#allocation159_spill] sm:$0xff] %v4404_v9  ;;  %v284_v26 = vrot.slane %v280_v6, 7  ;;  %v381_v8 = vsel %vm248_vm5, %v280_v6, 0.0  ;;  %v457_v45 = vrot.slane %v280_v6, 1  ;;  %v350_v56 = vrot.slane %v2916_v29, 7 }
 0x1e3   : > { %v2935_v61 = vmul.f32 %v4395_v39, %v381_v8  ;;  %v2939_v47 = vmul.f32 %v4408_v46, %v381_v8  ;;  %v2943_v50 = vmul.f32 %v4410_v3, %v381_v8 }
 0x1e4   : > { %v286_v6 = vsel %vm285_vm1, %v283_v57, %v284_v26  ;;  %v287_v7 = vsel %vm285_vm1, %v284_v26, %v283_v57  ;;  %v459_v39 = vsel %vm458_vm3, %v456_v20, %v457_v45  ;;  %v460_v46 = vsel %vm458_vm3, %v457_v45, %v456_v20 }
 0x1e5   : > { %v288_v3 = vsel %vm2912_vm6, %v287_v7, 0.0  ;;  %v289_v43 = vsel %vm248_vm5, %v286_v6, 0.0  ;;  %v461_v58 = vsel %vm248_vm5, %v459_v39, 0.0  ;;  %v462_v42 = vsel %vm2926_vm8, %v460_v46, 0.0 }
 0x1e6   : > { %v4412_v57 = vstv %s4406_s16  ;;  %v298_v21 = vmul.f32 %v4414_v55, %v288_v3  ;;  %v4415_v45 = vmov %v4414_v55  ;;  %v304_v7 = vmul.f32 %v4417_v28, %v288_v3  ;;  %s4423_s16 = sld [smem:[#allocation39_spill]] }
 0x1e7   : > { %v292_v26 = vmul.f32 %v4412_v57, %v288_v3  ;;  %v4413_v51 = vmov %v4412_v57  ;;  %v299_v20 = vmul.f32 %v4415_v45, %v289_v43  ;;  %v305_v6 = vmul.f32 %v4418_v49, %v289_v43 }
 0x1e8   : > { %v293_v12 = vmul.f32 %v4413_v51, %v289_v43  ;;  %v310_v39 = vmul.f32 %v4420_v1, %v288_v3  ;;  %v311_v46 = vmul.f32 %v4421_v54, %v289_v43  ;;  %v330_v57 = vadd.f32 %v2387_v10, %v298_v21  ;;  %v2987_v43 = vpop.permute.xlu1 %346 }
 0x1e9   : > { %v324_v51 = vadd.f32 %v2377_v62, %v292_v26  ;;  %v4424_v45 = vstv %s4391_s5  ;;  %v331_v44 = vadd.f32 %v2389_v11, %v299_v20  ;;  %v336_v49 = vadd.f32 %v2396_v13, %v304_v7  ;;  %4427 = vst [vmem:[#allocation160_spill] sm:$0xff] %v2987_v43  ;;  %s4438_s5 = sld [smem:[#allocation45_spill]] }
 0x1ea   : > { %v325_v55 = vadd.f32 %v2379_v63, %v293_v12  ;;  %v403_v28 = vmul.f32 %v4424_v45, %v381_v8  ;;  %v337_v1 = vadd.f32 %v2404_v16, %v305_v6  ;;  %v342_v54 = vadd.f32 %v2406_v17, %v310_v39 }
 0x1eb   : > { %v343_v62 = vadd.f32 %v2408_v18, %v311_v46  ;;  %v4429_v63 = vstv %s4416_s20  ;;  %v4432_v11 = vstv %s4419_s0  ;;  %v4434_v17 = vstv %s4422_s28  ;;  %s4442_s20 = sld [smem:[#allocation46_spill]]  ;;  %s4445_s0 = sld [smem:[#allocation47_spill]] }
 0x1ec   : > { %v2992_v10 = vmul.f32 %v4429_v63, %v461_v58  ;;  %v4431_v12 = vmov %v4429_v63  ;;  %v3000_v13 = vmul.f32 %v4432_v11, %v461_v58  ;;  %v4433_v16 = vmov %v4432_v11  ;;  %s4448_s28 = sld [smem:[#allocation48_spill]] }
 0x1ed   : > { %v2996_v21 = vmul.f32 %v4431_v12, %v462_v42  ;;  %v3004_v8 = vmul.f32 %v4433_v16, %v462_v42  ;;  %v3008_v3 = vmul.f32 %v4434_v17, %v461_v58  ;;  %v4435_v26 = vmov %v4434_v17 }
 0x1ee   : > { %v3012_v18 = vmul.f32 %v4435_v26, %v462_v42  ;;  %v4436_v20 = vstv %s4423_s16  ;;  %v430_v46 = vsel %vm251_vm7, %v2916_v29, 0.0  ;;  %v4439_v45 = vmov 0  ;;  %s3083_s16 = sld [smem:[#allocation8 + $0x1f]] }
 0x1ef   : > { %v3016_v7 = vmul.f32 %v4436_v20, %v461_v58  ;;  %v4437_v6 = vmov %v4436_v20  ;;  %v4440_v45 = vsel %vm3029_vm9, 4294967295, %v4439_v45  ;;  %v351_v58 = vrot.slane %v2987_v43, 7 }
 0x1f0   : > { %v3020_v39 = vmul.f32 %v4437_v6, %v462_v42  ;;  %4441 = vst [vmem:[#allocation161_spill] sm:$0xff] %v4440_v45  ;;  %v431_v42 = vsel %vm251_vm7, %v2987_v43, 0.0  ;;  %v4443_v63 = vstv %s4425_s2  ;;  %v4444_v11 = vstv %s4426_s25  ;;  %s4461_s2 = sld [smem:[#allocation23_spill]] }
 0x1f1   : > { %v434_v12 = vmul.f32 %v4443_v63, %v430_v46  ;;  %v440_v16 = vmul.f32 %v4444_v11, %v430_v46  ;;  %v4446_v17 = vstv %s4428_s21  ;;  %v4447_v20 = vstv %s4430_s10  ;;  %s3081_s10 = sld [smem:[#allocation8 + $0x89]]  ;;  %s4465_s21 = sld [smem:[#allocation25_spill]] }
 0x1f2   : > { %v446_v26 = vmul.f32 %v4446_v17, %v430_v46  ;;  %v452_v6 = vmul.f32 %v4447_v20, %v430_v46  ;;  %v352_v19 = vsel %vm285_vm1, %v350_v56, %v351_v58  ;;  %v353_v25 = vsel %vm285_vm1, %v351_v58, %v350_v56 }
 0x1f3   : > { %v4449_v0 = vmov %v4443_v63  ;;  %v4450_v9 = vmov %v4444_v11  ;;  %v354_v11 = vsel %vm3029_vm9, %v353_v25, 0.0  ;;  %v355_v17 = vsel %vm251_vm7, %v352_v19, 0.0 }
 0x1f4   : > { %v435_v24 = vmul.f32 %v4449_v0, %v431_v42  ;;  %v441_v63 = vmul.f32 %v4450_v9, %v431_v42  ;;  %v447_v37 = vmul.f32 %v4451_v52, %v431_v42  ;;  %v4452_v46 = vmov %v4447_v20 }
 0x1f5   : > { %v453_v20 = vmul.f32 %v4452_v46, %v431_v42  ;;  %v4453_v43 = vstv %s4438_s5  ;;  %v4455_v41 = vstv %s4442_s20  ;;  %v4457_v22 = vstv %s4445_s0  ;;  %s4479_s5 = sld [smem:[#allocation55_spill]]  ;;  %s4482_s20 = sld [smem:[#allocation51_spill]] }
 0x1f6   : > { %v358_v31 = vmul.f32 %v4453_v43, %v354_v11  ;;  %v4454_v30 = vmov %v4453_v43  ;;  %v364_v56 = vmul.f32 %v4455_v41, %v354_v11  ;;  %v4456_v58 = vmov %v4455_v41  ;;  %s1746_s25 = smul.u32 160, %s4461_s2  ;;  %s4490_s2 = sld [smem:[#allocation54_spill]] }
 0x1f7   : > { %v359_v48 = vmul.f32 %v4454_v30, %v355_v17  ;;  %v365_v0 = vmul.f32 %v4456_v58, %v355_v17  ;;  %v370_v9 = vmul.f32 %v4457_v22, %v354_v11  ;;  %v4458_v27 = vmov %v4457_v22 }
 0x1f8   : > { %v371_v45 = vmul.f32 %v4458_v27, %v355_v17  ;;  %v4459_v25 = vstv %s4448_s28  ;;  %v360_v15 = vadd.f32 %v358_v31, %v324_v51  ;;  %v366_v60 = vadd.f32 %v364_v56, %v330_v57  ;;  %v4476_v56 = vld [vmem:[#allocation160_spill] sm:$0xff]  ;;  %s3157_s0 = scalar_lea.vmem [#allocation9], %s1746_s25  ;;  %s4485_s28 = sld [smem:[#allocation52_spill]] }
 0x1f9   : > { %v376_v14 = vmul.f32 %v4459_v25, %v354_v11  ;;  %v4460_v53 = vmov %v4459_v25  ;;  %v361_v52 = vadd.f32 %v359_v48, %v325_v55  ;;  %v367_v42 = vadd.f32 %v365_v0, %v331_v44  ;;  %v4477_v25 = vld [vmem:[#allocation82_spill] sm:$0xff]  ;;  %s4486_s25 = sld [smem:[#allocation53_spill]] }
 0x1fa   : > { %v377_v19 = vmul.f32 %v4460_v53, %v355_v17  ;;  %v372_v46 = vadd.f32 %v370_v9, %v336_v49  ;;  %v373_v43 = vadd.f32 %v371_v45, %v337_v1  ;;  %v386_v41 = vadd.f32 %v2893_v38, %v360_v15  ;;  %v4463_v1 = vld [vmem:[#allocation73_spill] sm:$0xff]  ;;  %v4466_v45 = vld [vmem:[#allocation74_spill] sm:$0xff]  ;;  %v4475_v17 = vld [vmem:[#allocation81_spill] sm:$0xff] }
 0x1fb   : > { %v378_v29 = vadd.f32 %v376_v14, %v342_v54  ;;  %v387_v58 = vadd.f32 %v2935_v61, %v361_v52  ;;  %v392_v22 = vadd.f32 %v2897_v23, %v366_v60  ;;  %v393_v27 = vadd.f32 %v2939_v47, %v367_v42 }
 0x1fc   : > { %v379_v30 = vadd.f32 %v377_v19, %v343_v62  ;;  %v398_v48 = vadd.f32 %v2901_v4, %v372_v46  ;;  %v399_v53 = vadd.f32 %v2943_v50, %v373_v43  ;;  %v410_v15 = vadd.f32 %v2447_v34, %v386_v41  ;;  %v1414_v41 = vld [vmem:[%s4465_s21] sm:$0xff] }
 0x1fd   : > { %v404_v31 = vadd.f32 %v2906_v5, %v378_v29  ;;  %v411_v44 = vadd.f32 %v2441_v32, %v387_v58  ;;  %v416_v60 = vadd.f32 %v2450_v35, %v392_v22  ;;  %v417_v47 = vadd.f32 %v2444_v33, %v393_v27  ;;  %v1415_v58 = vld [vmem:[%s4465_s21 + $0x8] sm:$0xff]  ;;  %v1416_v22 = vld [vmem:[%s4465_s21 + $0x10] sm:$0xff]  ;;  %1727 = vst.msk [vmem:[%s3157_s0 + $0x40] sm:$0xff] %vm1402_vm10, %v1414_v41 }
 0x1fe   : > { %v405_v14 = vadd.f32 %v403_v28, %v379_v30  ;;  %v422_v38 = vadd.f32 %v2487_v2, %v398_v48  ;;  %v423_v23 = vadd.f32 %v2457_v36, %v399_v53  ;;  %v436_v5 = vadd.f32 %v434_v12, %v410_v15  ;;  %v4468_v12 = vld [vmem:[#allocation77_spill] sm:$0xff]  ;;  %v3136_v30 = vpop.permute.xlu0 %564  ;;  %1728 = vst.msk [vmem:[%s3157_s0 + $0x48] sm:$0xff] %vm1402_vm10, %v1415_v58 }
 0x1ff   : > { %v428_v4 = vadd.f32 %v2490_v59, %v404_v31  ;;  %v437_v29 = vadd.f32 %v435_v24, %v411_v44  ;;  %v442_v61 = vadd.f32 %v440_v16, %v416_v60  ;;  %v443_v51 = vadd.f32 %v441_v63, %v417_v47  ;;  %v3113_v16 = vpop.permute.xlu1 %566  ;;  %v4474_v63 = vld [vmem:[#allocation80_spill] sm:$0xff]  ;;  %v1417_v44 = vld [vmem:[%s4465_s21 + $0x18] sm:$0xff]  ;;  %v1418_v60 = vld [vmem:[%s4465_s21 + $0x20] sm:$0xff]  ;;  %1729 = vst.msk [vmem:[%s3157_s0 + $0x50] sm:$0xff] %vm1402_vm10, %v1416_v22 }
 0x200   : > { %v429_v50 = vadd.f32 %v2468_v40, %v405_v14  ;;  %v448_v34 = vadd.f32 %v446_v26, %v422_v38  ;;  %v449_v32 = vadd.f32 %v447_v37, %v423_v23  ;;  %v467_v33 = vadd.f32 %v2992_v10, %v436_v5  ;;  %v4462_v37 = vld [vmem:[#allocation158_spill] sm:$0xff]  ;;  %v1419_v47 = vld [vmem:[%s4465_s21 + $0x28] sm:$0xff]  ;;  %1730 = vst.msk [vmem:[%s3157_s0 + $0x58] sm:$0xff] %vm1402_vm10, %v1417_v44 }
 0x201   : > { %v454_v55 = vadd.f32 %v452_v6, %v428_v4  ;;  %v468_v2 = vadd.f32 %v2996_v21, %v437_v29  ;;  %v473_v36 = vadd.f32 %v3000_v13, %v442_v61  ;;  %v474_v59 = vadd.f32 %v3004_v8, %v443_v51  ;;  %v4464_v21 = vld [vmem:[#allocation76_spill] sm:$0xff]  ;;  %v1420_v61 = vld [vmem:[%s4465_s21 + $0x30] sm:$0xff]  ;;  %1731 = vst.msk [vmem:[%s3157_s0 + $0x60] sm:$0xff] %vm1402_vm10, %v1418_v60 }
 0x202   : > { %v455_v35 = vadd.f32 %v453_v20, %v429_v50  ;;  %v479_v40 = vadd.f32 %v3008_v3, %v448_v34  ;;  %v480_v24 = vadd.f32 %v3012_v18, %v449_v32  ;;  %v517_v49 = vrot.slane %v4462_v37, 1  ;;  %v4467_v3 = vld [vmem:[#allocation79_spill] sm:$0xff]  ;;  %v1421_v51 = vld [vmem:[%s4465_s21 + $0x38] sm:$0xff]  ;;  %v1422_v34 = vld [vmem:[%s4465_s21 + $0x40] sm:$0xff]  ;;  %1732 = vst.msk [vmem:[%s3157_s0 + $0x68] sm:$0xff] %vm1402_vm10, %v1419_v47 }
 0x203   : > { %v485_v57 = vadd.f32 %v3016_v7, %v454_v55  ;;  %v497_v54 = vadd.f32 %v4463_v1, %v467_v33  ;;  %v498_v13 = vadd.f32 %v4464_v21, %v468_v2  ;;  %v503_v8 = vadd.f32 %v4466_v45, %v473_v36  ;;  %1733 = vst.msk [vmem:[%s3157_s0 + $0x70] sm:$0xff] %vm1402_vm10, %v1420_v61 }
 0x204   : > { %v486_v28 = vadd.f32 %v3020_v39, %v455_v35  ;;  %v504_v18 = vadd.f32 %v4467_v3, %v474_v59  ;;  %v509_v7 = vadd.f32 %v4468_v12, %v479_v40  ;;  %v4471_v6 = vmov 0  ;;  %v1423_v40 = vld [vmem:[%s4465_s21 + $0x48] sm:$0xff]  ;;  %1734 = vst.msk [vmem:[%s3157_s0 + $0x78] sm:$0xff] %vm1402_vm10, %v1421_v51  ;;  %1735 = vst.msk [vmem:[%s3157_s0 + $0x80] sm:$0xff] %vm1402_vm10, %v1422_v34 }
 0x205   : > { %v4472_v6 = vsel %vm3119_vm11, 4294967295, %v4471_v6  ;;  %v510_v11 = vadd.f32 %v4474_v63, %v480_v24  ;;  %v515_v20 = vadd.f32 %v4475_v17, %v485_v57  ;;  %v518_v0 = vrot.slane %v4476_v56, 1  ;;  %v1424_v24 = vld [vmem:[%s4465_s21 + $0x50] sm:$0xff]  ;;  %v1425_v57 = vld [vmem:[%s4465_s21 + $0x58] sm:$0xff]  ;;  %1736 = vst.msk [vmem:[%s3157_s0 + $0x88] sm:$0xff] %vm1402_vm10, %v1423_v40  ;;  %s4512_s21 = sld [smem:[#allocation63_spill]] }
 0x206   : > { %4473 = vst [vmem:[#allocation158_spill] sm:$0xff] %v4472_v6  ;;  %v667_v9 = vsel %vm248_vm5, %v3113_v16, 0.0  ;;  %v516_v19 = vadd.f32 %v4477_v25, %v486_v28  ;;  %v571_v52 = vrot.slane %v3113_v16, 7  ;;  %v4478_v42 = vstv %s2381_s7  ;;  %1737 = vst.msk [vmem:[%s3157_s0 + $0x90] sm:$0xff] %vm1402_vm10, %v1424_v24  ;;  %s4499_s7 = sld [smem:[#allocation57_spill]] }
 0x207   : > { %v3133_v46 = vmul.f32 %v4478_v42, %v667_v9  ;;  %v743_v43 = vrot.slane %v3113_v16, 1  ;;  %v519_v48 = vsel %vm458_vm3, %v517_v49, %v518_v0  ;;  %v520_v53 = vsel %vm458_vm3, %v518_v0, %v517_v49  ;;  %1738 = vst.msk [vmem:[%s3157_s0 + $0x98] sm:$0xff] %vm1402_vm10, %v1425_v57 }
 0x208   : > { %v4481_v31 = vstv %s2383_s9  ;;  %v666_v15 = vsel %vm248_vm5, %v3136_v30, 0.0  ;;  %v521_v38 = vsel %vm251_vm7, %v519_v48, 0.0  ;;  %v522_v23 = vsel %vm3119_vm11, %v520_v53, 0.0  ;;  %s4498_s9 = sld [smem:[#allocation56_spill]]  ;;  %v3226_v53 = vpop.permute.xlu1 %632 }
 0x209   : > { %v3147_v14 = vmul.f32 %v4481_v31, %v667_v9  ;;  %v4483_v4 = vstv %s2391_s26  ;;  %v4484_v5 = vstv %s4479_s5  ;;  %v4487_v32 = vstv %s4482_s20  ;;  %s4510_s26 = sld [smem:[#allocation59_spill]]  ;;  %s4514_s5 = sld [smem:[#allocation64_spill]] }
 0x20a   : > { %v3171_v50 = vmul.f32 %v4483_v4, %v667_v9  ;;  %v3175_v29 = vmul.f32 %v4484_v5, %v667_v9  ;;  %v525_v55 = vmul.f32 %v4487_v32, %v521_v38  ;;  %v570_v35 = vrot.slane %v3136_v30, 7  ;;  %s4516_s20 = sld [smem:[#allocation61_spill]] }
 0x20b   : > { %v4488_v33 = vmov %v4478_v42  ;;  %v4489_v36 = vmov %v4481_v31  ;;  %v4491_v28 = vmov %v4487_v32  ;;  %v4492_v49 = vstv %s4485_s28  ;;  %s4517_s28 = sld [smem:[#allocation62_spill]] }
 0x20c   : > { %v3191_v2 = vmul.f32 %v4488_v33, %v666_v15  ;;  %v3195_v59 = vmul.f32 %v4489_v36, %v666_v15  ;;  %v526_v37 = vmul.f32 %v4491_v28, %v522_v23  ;;  %v531_v1 = vmul.f32 %v4492_v49, %v521_v38 }
 0x20d   : > { %v4493_v21 = vmov %v4492_v49  ;;  %v4494_v3 = vstv %s4486_s25  ;;  %v527_v63 = vadd.f32 %v525_v55, %v497_v54  ;;  %v4496_v0 = vstv %s4490_s2  ;;  %s4500_s2 = sld [smem:[#allocation58_spill]]  ;;  %s4518_s25 = sld [smem:[#allocation65_spill]] }
 0x20e   : > { %v532_v45 = vmul.f32 %v4493_v21, %v522_v23  ;;  %v537_v12 = vmul.f32 %v4494_v3, %v521_v38  ;;  %v4495_v17 = vmov %v4494_v3  ;;  %v543_v9 = vmul.f32 %v4496_v0, %v521_v38 }
 0x20f   : > { %v538_v56 = vmul.f32 %v4495_v17, %v522_v23  ;;  %v4497_v25 = vmov %v4496_v0  ;;  %v528_v41 = vadd.f32 %v526_v37, %v498_v13  ;;  %v533_v58 = vadd.f32 %v531_v1, %v503_v8 }
 0x210   : > { %v544_v42 = vmul.f32 %v4497_v25, %v522_v23  ;;  %v534_v22 = vadd.f32 %v532_v45, %v504_v18  ;;  %v539_v48 = vadd.f32 %v537_v12, %v509_v7  ;;  %v545_v31 = vadd.f32 %v543_v9, %v515_v20 }
 0x211   : > { %v540_v54 = vadd.f32 %v538_v56, %v510_v11  ;;  %v572_v44 = vsel %vm285_vm1, %v570_v35, %v571_v52  ;;  %v573_v60 = vsel %vm285_vm1, %v571_v52, %v570_v35  ;;  %v4502_v47 = vmov %v4483_v4 }
 0x212   : > { %v546_v13 = vadd.f32 %v544_v42, %v516_v19  ;;  %v574_v18 = vsel %vm2912_vm6, %v573_v60, 0.0  ;;  %v575_v7 = vsel %vm248_vm5, %v572_v44, 0.0  ;;  %v3238_v38 = vmul.f32 %v4502_v47, %v666_v15 }
 0x213   : > { %v4503_v11 = vstv %s2400_s17  ;;  %v4504_v23 = vmov %v4484_v5  ;;  %v742_v5 = vrot.slane %v3136_v30, 1  ;;  %v637_v52 = vrot.slane %v3226_v53, 7  ;;  %s4515_s17 = sld [smem:[#allocation60_spill]] }
 0x214   : > { %v578_v20 = vmul.f32 %v4503_v11, %v574_v18  ;;  %v3244_v4 = vmul.f32 %v4504_v23, %v666_v15  ;;  %v4505_v61 = vmov %v4503_v11  ;;  %v4506_v51 = vstv %s4498_s9  ;;  %s4519_s9 = sld [smem:[#allocation66_spill]]  ;;  %v3306_v11 = vpop.permute.xlu0 %630 }
 0x215   : > { %v579_v19 = vmul.f32 %v4505_v61, %v575_v7  ;;  %v584_v34 = vmul.f32 %v4506_v51, %v574_v18  ;;  %v4507_v32 = vmov %v4506_v51  ;;  %v4508_v35 = vstv %s4499_s7  ;;  %s4538_s7 = sld [smem:[#allocation67_spill]] }
 0x216   : > { %v585_v55 = vmul.f32 %v4507_v32, %v575_v7  ;;  %v590_v33 = vmul.f32 %v4508_v35, %v574_v18  ;;  %v580_v36 = vadd.f32 %v578_v20, %v527_v63  ;;  %v4509_v40 = vmov %v4508_v35 }
 0x217   : > { %v591_v24 = vmul.f32 %v4509_v40, %v575_v7  ;;  %v4511_v57 = vstv %s4500_s2  ;;  %v581_v37 = vadd.f32 %v579_v19, %v528_v41  ;;  %v586_v49 = vadd.f32 %v584_v34, %v533_v58  ;;  %s4539_s2 = sld [smem:[#allocation68_spill]] }
 0x218   : > { %v596_v15 = vmul.f32 %v4511_v57, %v574_v18  ;;  %v4513_v28 = vmov %v4511_v57  ;;  %v587_v1 = vadd.f32 %v585_v55, %v534_v22  ;;  %v592_v21 = vadd.f32 %v590_v33, %v539_v48  ;;  %v4533_v33 = vld [vmem:[#allocation86_spill] sm:$0xff] }
 0x219   : > { %v597_v30 = vmul.f32 %v4513_v28, %v575_v7  ;;  %v593_v45 = vadd.f32 %v591_v24, %v540_v54  ;;  %v744_v3 = vsel %vm458_vm3, %v742_v5, %v743_v43  ;;  %v745_v12 = vsel %vm458_vm3, %v743_v43, %v742_v5  ;;  %v4534_v24 = vld [vmem:[#allocation87_spill] sm:$0xff] }
 0x21a   : > { %v717_v63 = vsel %vm251_vm7, %v3226_v53, 0.0  ;;  %v598_v17 = vadd.f32 %v596_v15, %v545_v31  ;;  %v746_v0 = vsel %vm248_vm5, %v744_v3, 0.0  ;;  %v747_v16 = vsel %vm2926_vm8, %v745_v12, 0.0  ;;  %v4535_v15 = vld [vmem:[#allocation88_spill] sm:$0xff]  ;;  %v4537_v12 = vld [vmem:[#allocation105_spill] sm:$0xff] }
 0x21b   : > { %v599_v56 = vadd.f32 %v597_v30, %v546_v13  ;;  %v4521_v25 = vstv %s4510_s26  ;;  %v4522_v43 = vstv %s4512_s21  ;;  %v4523_v58 = vstv %s4514_s5  ;;  %v4536_v30 = vld [vmem:[#allocation92_spill] sm:$0xff]  ;;  %s4542_s26 = sld [smem:[#allocation69_spill]] }
 0x21c   : > { %v3279_v42 = vmul.f32 %v4521_v25, %v746_v0  ;;  %v3283_v41 = vmul.f32 %v4522_v43, %v717_v63  ;;  %v3287_v22 = vmul.f32 %v4523_v58, %v717_v63  ;;  %v4524_v54 = vmov %v4521_v25  ;;  %v4540_v25 = vld [vmem:[#allocation106_spill] sm:$0xff] }
 0x21d   : > { %v3292_v31 = vmul.f32 %v4524_v54, %v747_v16  ;;  %v4525_v44 = vstv %s4515_s17  ;;  %v4527_v7 = vstv %s4516_s20  ;;  %v4529_v5 = vstv %s4517_s28  ;;  %s4545_s17 = sld [smem:[#allocation70_spill]]  ;;  %s4570_s20 = sld [smem:[#allocation84_spill]] }
 0x21e   : > { %v3296_v60 = vmul.f32 %v4525_v44, %v746_v0  ;;  %v4526_v13 = vmov %v4525_v44  ;;  %v3304_v47 = vmul.f32 %v4527_v7, %v746_v0  ;;  %v4528_v20 = vmov %v4527_v7  ;;  %s4573_s28 = sld [smem:[#allocation72_spill]] }
 0x21f   : > { %v3300_v18 = vmul.f32 %v4526_v13, %v747_v16  ;;  %v3310_v23 = vmul.f32 %v4528_v20, %v747_v16  ;;  %v3314_v61 = vmul.f32 %v4529_v5, %v746_v0  ;;  %v4530_v19 = vmov %v4529_v5 }
 0x220   : > { %v3318_v51 = vmul.f32 %v4530_v19, %v747_v16  ;;  %v4531_v34 = vstv %s4518_s25  ;;  %v4532_v55 = vstv %s4519_s9  ;;  %v610_v40 = vadd.f32 %v4533_v33, %v580_v36  ;;  %s4576_s25 = sld [smem:[#allocation75_spill]]  ;;  %s4580_s9 = sld [smem:[#allocation78_spill]] }
 0x221   : > { %v733_v32 = vmul.f32 %v4531_v34, %v717_v63  ;;  %v739_v35 = vmul.f32 %v4532_v55, %v717_v63  ;;  %v611_v57 = vadd.f32 %v4534_v24, %v581_v37  ;;  %v616_v28 = vadd.f32 %v4535_v15, %v586_v49  ;;  %v4541_v37 = vld [vmem:[#allocation108_spill] sm:$0xff]  ;;  %v4543_v49 = vld [vmem:[#allocation109_spill] sm:$0xff] }
 0x222   : > { %v617_v3 = vadd.f32 %v4536_v30, %v587_v1  ;;  %v622_v0 = vadd.f32 %v4537_v12, %v592_v21  ;;  %v636_v16 = vrot.slane %v3306_v11, 7  ;;  %v716_v63 = vsel %vm251_vm7, %v3306_v11, 0.0 }
 0x223   : > { %v623_v36 = vadd.f32 %v4540_v25, %v593_v45  ;;  %v628_v43 = vadd.f32 %v4541_v37, %v598_v17  ;;  %v629_v1 = vadd.f32 %v4543_v49, %v599_v56  ;;  %v4544_v58 = vstv %s4512_s21  ;;  %s4567_s21 = sld [smem:[#allocation83_spill]] }
 0x224   : > { %v720_v21 = vmul.f32 %v4544_v58, %v716_v63  ;;  %v638_v54 = vsel %vm285_vm1, %v636_v16, %v637_v52  ;;  %v639_v44 = vsel %vm285_vm1, %v637_v52, %v636_v16  ;;  %v4546_v13 = vstv %s4514_s5  ;;  %s4568_s5 = sld [smem:[#allocation71_spill]] }
 0x225   : > { %v726_v7 = vmul.f32 %v4546_v13, %v716_v63  ;;  %v4547_v20 = vmov %v4531_v34  ;;  %v640_v17 = vsel %vm3029_vm9, %v639_v44, 0.0  ;;  %v641_v56 = vsel %vm251_vm7, %v638_v54, 0.0 }
 0x226   : > { %v732_v45 = vmul.f32 %v4547_v20, %v716_v63  ;;  %v4549_v19 = vmov %v4532_v55  ;;  %v802_v55 = vrot.slane %v3306_v11, 1  ;;  %v4550_v33 = vstv %s4538_s7  ;;  %s4594_s7 = sld [smem:[#allocation85_spill]] }
 0x227   : > { %v738_v34 = vmul.f32 %v4549_v19, %v716_v63  ;;  %v644_v24 = vmul.f32 %v4550_v33, %v640_v17  ;;  %v4551_v15 = vmov %v4550_v33  ;;  %v4552_v12 = vstv %s4539_s2  ;;  %s4605_s2 = sld [smem:[#allocation93_spill]] }
 0x228   : > { %v645_v30 = vmul.f32 %v4551_v15, %v641_v56  ;;  %v650_v52 = vmul.f32 %v4552_v12, %v640_v17  ;;  %v4553_v16 = vmov %v4552_v12  ;;  %v4554_v37 = vstv %s4542_s26  ;;  %s4607_s26 = sld [smem:[#allocation94_spill]] }
 0x229   : > { %v651_v25 = vmul.f32 %v4553_v16, %v641_v56  ;;  %v656_v49 = vmul.f32 %v4554_v37, %v640_v17  ;;  %v4555_v58 = vmov %v4554_v37  ;;  %v4556_v44 = vstv %s4545_s17  ;;  %s4616_s17 = sld [smem:[#allocation107_spill]] }
 0x22a   : > { %v657_v13 = vmul.f32 %v4555_v58, %v641_v56  ;;  %v662_v20 = vmul.f32 %v4556_v44, %v640_v17  ;;  %v4557_v62 = vmov %v4556_v44  ;;  %v646_v10 = vadd.f32 %v644_v24, %v610_v40  ;;  %v4564_v24 = vld [vmem:[#allocation102_spill] sm:$0xff] }
 0x22b   : > { %v663_v54 = vmul.f32 %v4557_v62, %v641_v56  ;;  %v647_v63 = vadd.f32 %v645_v30, %v611_v57  ;;  %v652_v19 = vadd.f32 %v650_v52, %v616_v28  ;;  %v653_v11 = vadd.f32 %v651_v25, %v617_v3  ;;  %v4558_v28 = vld [vmem:[#allocation90_spill] sm:$0xff]  ;;  %v4563_v56 = vld [vmem:[#allocation100_spill] sm:$0xff] }
 0x22c   : > { %v658_v48 = vadd.f32 %v656_v49, %v622_v0  ;;  %v659_v33 = vadd.f32 %v657_v13, %v623_v36  ;;  %v664_v26 = vadd.f32 %v662_v20, %v628_v43  ;;  %v672_v12 = vadd.f32 %v3191_v2, %v646_v10  ;;  %v4559_v0 = vld [vmem:[#allocation91_spill] sm:$0xff]  ;;  %v4560_v43 = vld [vmem:[#allocation95_spill] sm:$0xff]  ;;  %v4561_v2 = vld [vmem:[#allocation96_spill] sm:$0xff] }
 0x22d   : > { %v665_v15 = vadd.f32 %v663_v54, %v629_v1  ;;  %v673_v16 = vadd.f32 %v3133_v46, %v647_v63  ;;  %v678_v37 = vadd.f32 %v3195_v59, %v652_v19  ;;  %v679_v58 = vadd.f32 %v3147_v14, %v653_v11  ;;  %v4562_v1 = vld [vmem:[#allocation99_spill] sm:$0xff] }
 0x22e   : > { %v684_v17 = vadd.f32 %v3238_v38, %v658_v48  ;;  %v685_v62 = vadd.f32 %v3171_v50, %v659_v33  ;;  %v690_v40 = vadd.f32 %v3244_v4, %v664_v26  ;;  %v696_v3 = vadd.f32 %v4558_v28, %v672_v12  ;;  %v4565_v48 = vld [vmem:[#allocation104_spill] sm:$0xff]  ;;  %v4575_v33 = vld [vmem:[#allocation116_spill] sm:$0xff]  ;;  %v4577_v12 = vld [vmem:[#allocation119_spill] sm:$0xff] }
 0x22f   : > { %v691_v57 = vadd.f32 %v3175_v29, %v665_v15  ;;  %v697_v36 = vadd.f32 %v4559_v0, %v673_v16  ;;  %v702_v10 = vadd.f32 %v4560_v43, %v678_v37  ;;  %v703_v46 = vadd.f32 %v4561_v2, %v679_v58 }
 0x230   : > { %v708_v59 = vadd.f32 %v4562_v1, %v684_v17  ;;  %v709_v14 = vadd.f32 %v4563_v56, %v685_v62  ;;  %v714_v38 = vadd.f32 %v4564_v24, %v690_v40  ;;  %v722_v30 = vadd.f32 %v720_v21, %v696_v3  ;;  %v4581_v40 = vld [vmem:[#allocation120_spill] sm:$0xff] }
 0x231   : > { %v715_v50 = vadd.f32 %v4565_v48, %v691_v57  ;;  %v723_v26 = vadd.f32 %v3283_v41, %v697_v36  ;;  %v728_v29 = vadd.f32 %v726_v7, %v702_v10  ;;  %v729_v4 = vadd.f32 %v3287_v22, %v703_v46  ;;  %v852_v7 = vpop.permute.xlu1 %851 }
 0x232   : > { %v734_v52 = vadd.f32 %v732_v45, %v708_v59  ;;  %v735_v25 = vadd.f32 %v733_v32, %v709_v14  ;;  %v740_v49 = vadd.f32 %v738_v34, %v714_v38  ;;  %v752_v44 = vadd.f32 %v3279_v42, %v722_v30  ;;  %v4566_v32 = vld [vmem:[#allocation110_spill] sm:$0xff]  ;;  %v4572_v45 = vld [vmem:[#allocation114_spill] sm:$0xff] }
 0x233   : > { %v741_v13 = vadd.f32 %v739_v35, %v715_v50  ;;  %v753_v20 = vadd.f32 %v3292_v31, %v723_v26  ;;  %v758_v54 = vadd.f32 %v3296_v60, %v728_v29  ;;  %v759_v63 = vadd.f32 %v3300_v18, %v729_v4  ;;  %v4569_v18 = vld [vmem:[#allocation113_spill] sm:$0xff]  ;;  %v4574_v34 = vld [vmem:[#allocation115_spill] sm:$0xff] }
 0x234   : > { %v764_v19 = vadd.f32 %v3304_v47, %v734_v52  ;;  %v765_v21 = vadd.f32 %v3310_v23, %v735_v25  ;;  %v770_v41 = vadd.f32 %v3314_v61, %v740_v49  ;;  %v782_v35 = vadd.f32 %v4566_v32, %v752_v44  ;;  %v4571_v23 = vld [vmem:[#allocation111_spill] sm:$0xff] }
 0x235   : > { %v771_v22 = vadd.f32 %v3318_v51, %v741_v13  ;;  %v856_v42 = vrot.slane %v852_v7, 7  ;;  %v952_v31 = vsel %vm248_vm5, %v852_v7, 0.0  ;;  %v1028_v60 = vrot.slane %v852_v7, 1 }
 0x236   : > { %v783_v47 = vadd.f32 %v4569_v18, %v753_v20  ;;  %v788_v61 = vadd.f32 %v4571_v23, %v758_v54  ;;  %v789_v51 = vadd.f32 %v4572_v45, %v759_v63  ;;  %v794_v11 = vadd.f32 %v4574_v34, %v764_v19  ;;  %v3449_v20 = vpop.permute.xlu1 %917 }
 0x237   : > { %v795_v15 = vadd.f32 %v4575_v33, %v765_v21  ;;  %v800_v16 = vadd.f32 %v4577_v12, %v770_v41  ;;  %v4578_v37 = vrot.slane %v3226_v53, 1  ;;  %v801_v57 = vadd.f32 %v4581_v40, %v771_v22  ;;  %v850_v41 = vpop.permute.xlu0 %849 }
 0x238   : > { %v4582_v0 = vstv %s4567_s21  ;;  %v4583_v43 = vstv %s4568_s5  ;;  %v4584_v2 = vstv %s2571_s22  ;;  %v4585_v46 = vstv %s2573_s18  ;;  %s4602_s22 = sld [smem:[#allocation89_spill]]  ;;  %s4633_s5 = sld [smem:[#allocation117_spill]] }
 0x239   : > { %v804_v58 = vsel %vm458_vm3, %v802_v55, %v4578_v37  ;;  %v4579_v17 = vmov %v4578_v37  ;;  %v3419_v36 = vmul.f32 %v4582_v0, %v952_v31  ;;  %v3425_v53 = vmul.f32 %v4584_v2, %v952_v31  ;;  %s4632_s21 = sld [smem:[#allocation112_spill]] }
 0x23a   : > { %v805_v62 = vsel %vm458_vm3, %v4579_v17, %v802_v55  ;;  %v806_v28 = vsel %vm251_vm7, %v804_v58, 0.0  ;;  %v3429_v1 = vmul.f32 %v4585_v46, %v952_v31  ;;  %v4586_v55 = vstv %s4570_s20 }
 0x23b   : > { %v807_v3 = vsel %vm3119_vm11, %v805_v62, 0.0  ;;  %v810_v10 = vmul.f32 %v4583_v43, %v806_v28  ;;  %v3433_v59 = vmul.f32 %v4586_v55, %v952_v31  ;;  %v4587_v56 = vmov %v4583_v43 }
 0x23c   : > { %v811_v14 = vmul.f32 %v4587_v56, %v807_v3  ;;  %v4588_v24 = vstv %s4573_s28  ;;  %v4590_v30 = vstv %s4576_s25  ;;  %v4592_v25 = vstv %s4580_s9  ;;  %s4639_s28 = sld [smem:[#allocation121_spill]]  ;;  %s3593_s25 = sld [smem:[#allocation8 + $0x43]] }
 0x23d   : > { %v816_v38 = vmul.f32 %v4588_v24, %v806_v28  ;;  %v4589_v48 = vmov %v4588_v24  ;;  %v822_v26 = vmul.f32 %v4590_v30, %v806_v28  ;;  %v812_v29 = vadd.f32 %v810_v10, %v782_v35  ;;  %s4663_s9 = sld [smem:[#allocation129_spill]] }
 0x23e   : > { %v817_v50 = vmul.f32 %v4589_v48, %v807_v3  ;;  %v4591_v4 = vmov %v4590_v30  ;;  %v828_v49 = vmul.f32 %v4592_v25, %v806_v28  ;;  %v4593_v13 = vmov %v4592_v25 }
 0x23f   : > { %v823_v52 = vmul.f32 %v4591_v4, %v807_v3  ;;  %v829_v44 = vmul.f32 %v4593_v13, %v807_v3  ;;  %v813_v54 = vadd.f32 %v811_v14, %v783_v47  ;;  %v818_v63 = vadd.f32 %v816_v38, %v788_v61 }
 0x240   : > { %v819_v19 = vadd.f32 %v817_v50, %v789_v51  ;;  %v824_v21 = vadd.f32 %v822_v26, %v794_v11  ;;  %v855_v7 = vrot.slane %v850_v41, 7  ;;  %v951_v32 = vsel %vm248_vm5, %v850_v41, 0.0 }
 0x241   : > { %v825_v22 = vadd.f32 %v823_v52, %v795_v15  ;;  %v1027_v35 = vrot.slane %v850_v41, 1  ;;  %v830_v31 = vadd.f32 %v828_v49, %v800_v16  ;;  %v831_v18 = vadd.f32 %v829_v44, %v801_v57 }
 0x242   : > { %v4595_v23 = vmov %v4582_v0  ;;  %v922_v61 = vrot.slane %v3449_v20, 7  ;;  %v857_v45 = vsel %vm285_vm1, %v855_v7, %v856_v42  ;;  %v858_v51 = vsel %vm285_vm1, %v856_v42, %v855_v7 }
 0x243   : > { %v3455_v47 = vmul.f32 %v4595_v23, %v951_v32  ;;  %v4596_v34 = vmov %v4584_v2  ;;  %v1029_v33 = vsel %vm458_vm3, %v1027_v35, %v1028_v60  ;;  %v859_v15 = vsel %vm2912_vm6, %v858_v51, 0.0 }
 0x244   : > { %v3464_v11 = vmul.f32 %v4596_v34, %v951_v32  ;;  %v860_v12 = vsel %vm248_vm5, %v857_v45, 0.0  ;;  %v1030_v16 = vsel %vm458_vm3, %v1028_v60, %v1027_v35  ;;  %v1031_v42 = vsel %vm248_vm5, %v1029_v33, 0.0 }
 0x245   : > { %v4597_v37 = vstv %s4594_s7  ;;  %v4599_v40 = vstv %s2588_s19  ;;  %v4601_v0 = vstv %s2590_s29  ;;  %v4604_v46 = vstv %s2599_s6  ;;  %s4610_s19 = sld [smem:[#allocation97_spill]]  ;;  %s4611_s29 = sld [smem:[#allocation98_spill]] }
 0x246   : > { %v863_v58 = vmul.f32 %v4597_v37, %v859_v15  ;;  %v4598_v17 = vmov %v4597_v37  ;;  %v869_v57 = vmul.f32 %v4599_v40, %v859_v15  ;;  %v4600_v28 = vmov %v4599_v40  ;;  %s4612_s6 = sld [smem:[#allocation101_spill]]  ;;  %s4666_s7 = sld [smem:[#allocation122_spill]] }
 0x247   : > { %v864_v62 = vmul.f32 %v4598_v17, %v860_v12  ;;  %v870_v3 = vmul.f32 %v4600_v28, %v860_v12  ;;  %v875_v43 = vmul.f32 %v4601_v0, %v859_v15  ;;  %v4603_v10 = vmov %v4601_v0 }
 0x248   : > { %v876_v2 = vmul.f32 %v4603_v10, %v860_v12  ;;  %v881_v60 = vmul.f32 %v4604_v46, %v859_v15  ;;  %v4606_v55 = vmov %v4604_v46  ;;  %v865_v14 = vadd.f32 %v863_v58, %v812_v29  ;;  %v3537_v15 = vpop.permute.xlu0 %915  ;;  %v4624_v58 = vld [vmem:[#allocation126_spill] sm:$0xff]  ;;  %v4629_v10 = vld [vmem:[#allocation128_spill] sm:$0xff]  ;;  %v4630_v46 = vld [vmem:[#allocation130_spill] sm:$0xff] }
 0x249   : > { %v882_v56 = vmul.f32 %v4606_v55, %v860_v12  ;;  %v4608_v24 = vstv %s2573_s18  ;;  %v4609_v48 = vstv %s4570_s20  ;;  %v1032_v30 = vsel %vm2926_vm8, %v1030_v16, 0.0  ;;  %s4614_s18 = sld [smem:[#allocation103_spill]]  ;;  %v4631_v55 = vld [vmem:[#allocation131_spill] sm:$0xff]  ;;  %s4636_s20 = sld [smem:[#allocation118_spill]] }
 0x24a   : > { %v3494_v38 = vmul.f32 %v4608_v24, %v951_v32  ;;  %v3498_v50 = vmul.f32 %v4609_v48, %v951_v32  ;;  %v866_v26 = vadd.f32 %v864_v62, %v813_v54  ;;  %v871_v4 = vadd.f32 %v869_v57, %v818_v63  ;;  %v4625_v62 = vld [vmem:[#allocation127_spill] sm:$0xff] }
 0x24b   : > { %v872_v52 = vadd.f32 %v870_v3, %v819_v19  ;;  %v877_v25 = vadd.f32 %v875_v43, %v824_v21  ;;  %v878_v49 = vadd.f32 %v876_v2, %v825_v22  ;;  %v883_v13 = vadd.f32 %v881_v60, %v830_v31  ;;  %v4634_v48 = vld [vmem:[#allocation132_spill] sm:$0xff] }
 0x24c   : > { %v884_v29 = vadd.f32 %v882_v56, %v831_v18  ;;  %v4613_v44 = vstv %s4602_s22  ;;  %v4617_v35 = vstv %s4605_s2  ;;  %v4619_v19 = vstv %s4607_s26  ;;  %s4668_s22 = sld [smem:[#allocation123_spill]]  ;;  %s4673_s2 = sld [smem:[#allocation124_spill]] }
 0x24d   : > { %v3504_v41 = vmul.f32 %v4613_v44, %v1031_v42  ;;  %v4615_v7 = vmov %v4613_v44  ;;  %v3512_v23 = vmul.f32 %v4617_v35, %v1031_v42  ;;  %v4618_v54 = vmov %v4617_v35  ;;  %s4677_s26 = sld [smem:[#allocation125_spill]] }
 0x24e   : > { %v3508_v32 = vmul.f32 %v4615_v7, %v1032_v30  ;;  %v3516_v63 = vmul.f32 %v4618_v54, %v1032_v30  ;;  %v3520_v21 = vmul.f32 %v4619_v19, %v1031_v42  ;;  %v4620_v22 = vmov %v4619_v19 }
 0x24f   : > { %v3524_v31 = vmul.f32 %v4620_v22, %v1032_v30  ;;  %v4621_v18 = vstv %s4610_s19  ;;  %v1002_v33 = vsel %vm251_vm7, %v3449_v20, 0.0  ;;  %v4623_v12 = vstv %s4611_s29  ;;  %s3699_s19 = sld [smem:[#allocation8 + $0x67]]  ;;  %s3701_s29 = sld [smem:[#allocation8 + $0x8b]] }
 0x250   : > { %v3528_v45 = vmul.f32 %v4621_v18, %v1031_v42  ;;  %v4622_v51 = vmov %v4621_v18  ;;  %v1006_v16 = vmul.f32 %v4623_v12, %v1002_v33  ;;  %v895_v17 = vadd.f32 %v4624_v58, %v865_v14 }
 0x251   : > { %v3532_v34 = vmul.f32 %v4622_v51, %v1032_v30  ;;  %v896_v42 = vadd.f32 %v4625_v62, %v866_v26  ;;  %v4626_v40 = vstv %s4612_s6  ;;  %v4627_v28 = vstv %s4614_s18  ;;  %v4635_v26 = vld [vmem:[#allocation133_spill] sm:$0xff]  ;;  %s3721_s6 = sld [smem:[#allocation8 + $0x45]]  ;;  %s3723_s18 = sld [smem:[#allocation8 + $0x69]] }
 0x252   : > { %v1012_v57 = vmul.f32 %v4626_v40, %v1002_v33  ;;  %v1018_v3 = vmul.f32 %v4627_v28, %v1002_v33  ;;  %v4628_v0 = vstv %s4616_s17  ;;  %v901_v2 = vadd.f32 %v4629_v10, %v871_v4  ;;  %v4637_v4 = vld [vmem:[#allocation134_spill] sm:$0xff]  ;;  %s3733_s17 = sld [smem:[#allocation8 + $0x8d]] }
 0x253   : > { %v1024_v43 = vmul.f32 %v4628_v0, %v1002_v33  ;;  %v902_v60 = vadd.f32 %v4630_v46, %v872_v52  ;;  %v907_v56 = vadd.f32 %v4631_v55, %v877_v25  ;;  %v921_v14 = vrot.slane %v3537_v15, 7 }
 0x254   : > { %v1001_v24 = vsel %vm251_vm7, %v3537_v15, 0.0  ;;  %v908_v30 = vadd.f32 %v4634_v48, %v878_v49  ;;  %v913_v44 = vadd.f32 %v4635_v26, %v883_v13  ;;  %v914_v52 = vadd.f32 %v4637_v4, %v884_v29 }
 0x255   : > { %v4638_v7 = vmov %v4623_v12  ;;  %v923_v35 = vsel %vm285_vm1, %v921_v14, %v922_v61  ;;  %v924_v54 = vsel %vm285_vm1, %v922_v61, %v921_v14  ;;  %v4640_v19 = vmov %v4626_v40 }
 0x256   : > { %v1005_v25 = vmul.f32 %v4638_v7, %v1001_v24  ;;  %v1011_v22 = vmul.f32 %v4640_v19, %v1001_v24  ;;  %v4641_v18 = vmov %v4627_v28  ;;  %v925_v13 = vsel %vm3029_vm9, %v924_v54, 0.0 }
 0x257   : > { %v1017_v49 = vmul.f32 %v4641_v18, %v1001_v24  ;;  %v926_v29 = vsel %vm251_vm7, %v923_v35, 0.0  ;;  %v4642_v51 = vmov %v4628_v0  ;;  %v4643_v58 = vstv %s4632_s21  ;;  %s4728_s21 = sld [smem:[#allocation155_spill]] }
 0x258   : > { %v1023_v33 = vmul.f32 %v4642_v51, %v1001_v24  ;;  %v929_v62 = vmul.f32 %v4643_v58, %v925_v13  ;;  %v4644_v40 = vmov %v4643_v58  ;;  %v4645_v0 = vstv %s4633_s5 }
 0x259   : > { %v930_v28 = vmul.f32 %v4644_v40, %v926_v29  ;;  %v935_v61 = vmul.f32 %v4645_v0, %v925_v13  ;;  %v4646_v10 = vmov %v4645_v0  ;;  %v4647_v55 = vstv %s4636_s20  ;;  %s1453_s20 = sshll.u32 %s3157_s0, 4  ;;  %s3982_s20 = int_to_ptr.vmem [resolvable:$true] %s1453_s20 }
 0x25a   : > { %v936_v46 = vmul.f32 %v4646_v10, %v926_v29  ;;  %v941_v14 = vmul.f32 %v4647_v55, %v925_v13  ;;  %v4648_v48 = vmov %v4647_v55  ;;  %v4649_v4 = vstv %s4639_s28  ;;  %s4764_s28 = sld [smem:[#allocation23_spill]] }
 0x25b   : > { %v942_v26 = vmul.f32 %v4648_v48, %v926_v29  ;;  %v947_v7 = vmul.f32 %v4649_v4, %v925_v13  ;;  %v4650_v54 = vmov %v4649_v4  ;;  %v931_v19 = vadd.f32 %v929_v62, %v895_v17  ;;  %v4654_v62 = vld [vmem:[#allocation138_spill] sm:$0xff] }
 0x25c   : > { %v948_v35 = vmul.f32 %v4650_v54, %v926_v29  ;;  %v932_v24 = vadd.f32 %v930_v28, %v896_v42  ;;  %v937_v18 = vadd.f32 %v935_v61, %v901_v2  ;;  %v938_v51 = vadd.f32 %v936_v46, %v902_v60  ;;  %v4651_v60 = vld [vmem:[#allocation135_spill] sm:$0xff]  ;;  %v4656_v61 = vld [vmem:[#allocation140_spill] sm:$0xff]  ;;  %v4657_v46 = vld [vmem:[#allocation141_spill] sm:$0xff] }
 0x25d   : > { %v943_v12 = vadd.f32 %v941_v14, %v907_v56  ;;  %v944_v58 = vadd.f32 %v942_v26, %v908_v30  ;;  %v949_v37 = vadd.f32 %v947_v7, %v913_v44  ;;  %v957_v0 = vadd.f32 %v3455_v47, %v931_v19  ;;  %v4652_v30 = vld [vmem:[#allocation136_spill] sm:$0xff]  ;;  %v4655_v28 = vld [vmem:[#allocation139_spill] sm:$0xff] }
 0x25e   : > { %v950_v40 = vadd.f32 %v948_v35, %v914_v52  ;;  %v958_v10 = vadd.f32 %v3419_v36, %v932_v24  ;;  %v963_v55 = vadd.f32 %v3464_v11, %v937_v18  ;;  %v964_v13 = vadd.f32 %v3425_v53, %v938_v51  ;;  %v4653_v52 = vld [vmem:[#allocation137_spill] sm:$0xff]  ;;  %v4667_v51 = vld [vmem:[#allocation146_spill] sm:$0xff] }
 0x25f   : > { %v969_v29 = vadd.f32 %v3494_v38, %v943_v12  ;;  %v970_v17 = vadd.f32 %v3429_v1, %v944_v58  ;;  %v975_v42 = vadd.f32 %v3498_v50, %v949_v37  ;;  %v981_v56 = vadd.f32 %v4651_v60, %v957_v0  ;;  %v4658_v12 = vld [vmem:[#allocation142_spill] sm:$0xff] }
 0x260   : > { %v976_v2 = vadd.f32 %v3433_v59, %v950_v40  ;;  %v982_v44 = vadd.f32 %v4652_v30, %v958_v10  ;;  %v987_v47 = vadd.f32 %v4653_v52, %v963_v55  ;;  %v988_v36 = vadd.f32 %v4654_v62, %v964_v13  ;;  %v4669_v0 = vld [vmem:[#allocation148_spill] sm:$0xff]  ;;  %v4670_v55 = vld [vmem:[#allocation149_spill] sm:$0xff]  ;;  %v4676_v30 = vld [vmem:[#allocation150_spill] sm:$0xff] }
 0x261   : > { %v993_v11 = vadd.f32 %v4655_v28, %v969_v29  ;;  %v994_v53 = vadd.f32 %v4656_v61, %v970_v17  ;;  %v999_v38 = vadd.f32 %v4657_v46, %v975_v42  ;;  %v1007_v14 = vadd.f32 %v1005_v25, %v981_v56  ;;  %v4678_v52 = vld [vmem:[#allocation153_spill] sm:$0xff]  ;;  %v4679_v28 = vld [vmem:[#allocation154_spill] sm:$0xff] }
 0x262   : > { %v1000_v1 = vadd.f32 %v4658_v12, %v976_v2  ;;  %v1008_v50 = vadd.f32 %v1006_v16, %v982_v44  ;;  %v1013_v59 = vadd.f32 %v1011_v22, %v987_v47  ;;  %v1014_v37 = vadd.f32 %v1012_v57, %v988_v36  ;;  %v1137_v22 = vpop.permute.xlu1 %1136 }
 0x263   : > { %v1019_v48 = vadd.f32 %v1017_v49, %v993_v11  ;;  %v1020_v26 = vadd.f32 %v1018_v3, %v994_v53  ;;  %v1025_v4 = vadd.f32 %v1023_v33, %v999_v38  ;;  %v1037_v54 = vadd.f32 %v3504_v41, %v1007_v14 }
 0x264   : > { %v1026_v7 = vadd.f32 %v1024_v43, %v1000_v1  ;;  %v1038_v35 = vadd.f32 %v3508_v32, %v1008_v50  ;;  %v1043_v19 = vadd.f32 %v3512_v23, %v1013_v59  ;;  %v1044_v24 = vadd.f32 %v3516_v63, %v1014_v37  ;;  %v4659_v32 = vld [vmem:[#allocation27_spill] sm:$0xff]  ;;  %v4661_v23 = vld [vmem:[#allocation26_spill] sm:$0xff] }
 0x265   : > { %v1049_v18 = vadd.f32 %v3520_v21, %v1019_v48  ;;  %v1050_v25 = vadd.f32 %v3524_v31, %v1020_v26  ;;  %v1055_v16 = vadd.f32 %v3528_v45, %v1025_v4  ;;  %v1269_v57 = vstv %s3593_s25  ;;  %v4664_v21 = vld [vmem:[#allocation145_spill] sm:$0xff]  ;;  %v4665_v45 = vld [vmem:[#allocation147_spill] sm:$0xff] }
 0x266   : > { %v1056_v3 = vadd.f32 %v3532_v34, %v1026_v7  ;;  %v1141_v49 = vrot.slane %v1137_v22, 7  ;;  %v1237_v41 = vsel %vm248_vm5, %v1137_v22, 0.0  ;;  %v4660_v43 = vrot.slane %v4659_v32, 7 }
 0x267   : > { %v4662_v33 = vrot.slane %v4661_v23, 7  ;;  %v1067_v31 = vadd.f32 %v4664_v21, %v1037_v54  ;;  %v1068_v34 = vadd.f32 %v4665_v45, %v1038_v35  ;;  %v1073_v58 = vadd.f32 %v4667_v51, %v1043_v19  ;;  %v1135_v21 = vpop.permute.xlu0 %1134  ;;  %v3686_v45 = vpop.permute.xlu1 %1202 }
 0x268   : > { %v1313_v40 = vrot.slane %v1137_v22, 1  ;;  %v1074_v10 = vadd.f32 %v4669_v0, %v1044_v24  ;;  %v1079_v13 = vadd.f32 %v4670_v55, %v1049_v18  ;;  %v4671_v29 = vrot.slane %v3449_v20, 1  ;;  %4692 = vst [vmem:[#allocation73_spill] sm:$0xff] %v3686_v45 }
 0x269   : > { %v3628_v63 = vsel %vm285_vm1, %v4662_v33, %v4660_v43  ;;  %v4672_v17 = vrot.slane %v3537_v15, 1  ;;  %v1080_v44 = vadd.f32 %v4676_v30, %v1050_v25  ;;  %v1085_v47 = vadd.f32 %v4678_v52, %v1055_v16 }
 0x26a   : > { %v4675_v60 = vmov %v4671_v29  ;;  %v1086_v15 = vadd.f32 %v4679_v28, %v1056_v3  ;;  %v4680_v11 = vstv %s2754_s23  ;;  %v4681_v61 = vstv %s4663_s9  ;;  %s3711_s23 = sld [smem:[#allocation8 + $0x21]] }
 0x26b   : > { %v1089_v42 = vsel %vm458_vm3, %v4672_v17, %v4671_v29  ;;  %v4674_v2 = vmov %v4672_v17  ;;  %v3656_v20 = vmul.f32 %v4680_v11, %v1237_v41  ;;  %v3660_v53 = vmul.f32 %v4681_v61, %v1237_v41 }
 0x26c   : > { %v1090_v56 = vsel %vm458_vm3, %v4675_v60, %v4674_v2  ;;  %v1091_v62 = vsel %vm251_vm7, %v1089_v42, 0.0  ;;  %v4682_v46 = vstv %s2763_s1  ;;  %v4683_v12 = vstv %s4666_s7  ;;  %s4765_s7 = sld [smem:[#allocation165_spill]] }
 0x26d   : > { %v1092_v36 = vsel %vm3119_vm11, %v1090_v56, 0.0  ;;  %v3664_v38 = vmul.f32 %v4682_v46, %v1237_v41  ;;  %v1095_v1 = vmul.f32 %v4683_v12, %v1091_v62  ;;  %v4684_v14 = vmov %v4683_v12 }
 0x26e   : > { %v1096_v50 = vmul.f32 %v4684_v14, %v1092_v36  ;;  %v4685_v59 = vstv %s4668_s22  ;;  %v4686_v48 = vstv %s2765_s3  ;;  %v4688_v54 = vstv %s4673_s2  ;;  %s4766_s2 = sld [smem:[#allocation21_spill]] }
 0x26f   : > { %v1101_v37 = vmul.f32 %v4685_v59, %v1091_v62  ;;  %v3674_v26 = vmul.f32 %v4686_v48, %v1237_v41  ;;  %v4687_v4 = vmov %v4685_v59  ;;  %v1107_v35 = vmul.f32 %v4688_v54, %v1091_v62 }
 0x270   : > { %v1102_v7 = vmul.f32 %v4687_v4, %v1092_v36  ;;  %v4689_v19 = vmov %v4688_v54  ;;  %v4690_v18 = vstv %s4677_s26  ;;  %v1097_v16 = vadd.f32 %v1095_v1, %v1067_v31  ;;  %s1440_s26 = scalar_lea.sflag [#allocation4], %s4764_s28 }
 0x271   : > { %v1108_v24 = vmul.f32 %v4689_v19, %v1092_v36  ;;  %v1113_v25 = vmul.f32 %v4690_v18, %v1091_v62  ;;  %v1098_v22 = vadd.f32 %v1096_v50, %v1068_v34  ;;  %v1103_v3 = vadd.f32 %v1101_v37, %v1073_v58 }
 0x272   : > { %v4691_v43 = vmov %v4690_v18  ;;  %v1104_v51 = vadd.f32 %v1102_v7, %v1074_v10  ;;  %v1140_v41 = vrot.slane %v1135_v21, 7  ;;  %v1236_v0 = vsel %vm248_vm5, %v1135_v21, 0.0 }
 0x273   : > { %v1114_v33 = vmul.f32 %v4691_v43, %v1092_v36  ;;  %v1312_v55 = vrot.slane %v1135_v21, 1  ;;  %v1109_v29 = vadd.f32 %v1107_v35, %v1079_v13  ;;  %v1110_v17 = vadd.f32 %v1108_v24, %v1080_v44 }
 0x274   : > { %v1115_v31 = vadd.f32 %v1113_v25, %v1085_v47  ;;  %v1142_v58 = vsel %vm285_vm1, %v1140_v41, %v1141_v49  ;;  %v1143_v42 = vsel %vm285_vm1, %v1141_v49, %v1140_v41  ;;  %v4693_v10 = vmov %v4680_v11  ;;  %p4767_p5 = scmp.ne.s32.totalorder %s4766_s2, 0 }
 0x275   : > { %v1116_v34 = vadd.f32 %v1114_v33, %v1086_v15  ;;  %v3696_v2 = vmul.f32 %v4693_v10, %v1236_v0  ;;  %v1207_v60 = vrot.slane %v3686_v45, 7  ;;  %v1144_v13 = vsel %vm2912_vm6, %v1143_v42, 0.0 }
 0x276   : > { %v1145_v56 = vsel %vm248_vm5, %v1142_v58, 0.0  ;;  %v1314_v49 = vsel %vm458_vm3, %v1312_v55, %v1313_v40  ;;  %v1315_v30 = vsel %vm458_vm3, %v1313_v40, %v1312_v55  ;;  %v4694_v44 = vstv %s2773_s11  ;;  %s3735_s11 = sld [smem:[#allocation8 + $0x22]] }
 0x277   : > { %v1148_v52 = vmul.f32 %v4694_v44, %v1144_v13  ;;  %v4695_v47 = vmov %v4694_v44  ;;  %v4696_v8 = vstv %s2775_s13  ;;  %v4698_v11 = vstv %s2785_s8  ;;  %s4705_s13 = sld [smem:[#allocation24_spill]]  ;;  %s3753_s8 = sld [smem:[#allocation8 + $0x46]] }
 0x278   : > { %v1149_v62 = vmul.f32 %v4695_v47, %v1145_v56  ;;  %v1154_v36 = vmul.f32 %v4696_v8, %v1144_v13  ;;  %v4697_v28 = vmov %v4696_v8  ;;  %v1160_v61 = vmul.f32 %v4698_v11, %v1144_v13 }
 0x279   : > { %v1155_v15 = vmul.f32 %v4697_v28, %v1145_v56  ;;  %v4699_v46 = vmov %v4698_v11  ;;  %v4700_v40 = vstv %s2787_s12  ;;  %v4702_v59 = vstv %s4663_s9  ;;  %s3755_s12 = sld [smem:[#allocation8 + $0x6a]] }
 0x27a   : > { %v1161_v12 = vmul.f32 %v4699_v46, %v1145_v56  ;;  %v1166_v1 = vmul.f32 %v4700_v40, %v1144_v13  ;;  %v4701_v14 = vmov %v4700_v40  ;;  %v3739_v37 = vmul.f32 %v4702_v59, %v1236_v0 }
 0x27b   : > { %v1167_v50 = vmul.f32 %v4701_v14, %v1145_v56  ;;  %v4703_v48 = vstv %s2763_s1  ;;  %v4704_v7 = vstv %s2765_s3  ;;  %v3751_v35 = vsel %vm248_vm5, %v1314_v49, 0.0  ;;  %s3770_s1 = sld [smem:[#allocation8 + $0x8e]]  ;;  %v4714_v14 = vld [vmem:[#allocation156_spill] sm:$0xff] }
 0x27c   : > { %v3743_v4 = vmul.f32 %v4703_v48, %v1236_v0  ;;  %v3747_v54 = vmul.f32 %v4704_v7, %v1236_v0  ;;  %v1150_v19 = vadd.f32 %v1148_v52, %v1097_v16  ;;  %v1151_v24 = vadd.f32 %v1149_v62, %v1098_v22  ;;  %s4712_s3 = sld [smem:[#allocation151_spill]] }
 0x27d   : > { %v1156_v18 = vadd.f32 %v1154_v36, %v1103_v3  ;;  %v3759_v25 = vsel %vm2926_vm8, %v1315_v30, 0.0  ;;  %v1157_v43 = vadd.f32 %v1155_v15, %v1104_v51  ;;  %v1162_v33 = vadd.f32 %v1160_v61, %v1109_v29  ;;  %v1817_v9 = vld [vmem:[%s4705_s13 + $0x30] sm:$0xff] }
 0x27e   : > { %v1163_v21 = vadd.f32 %v1161_v12, %v1110_v17  ;;  %v1287_v16 = vsel %vm251_vm7, %v3686_v45, 0.0  ;;  %v1168_v22 = vadd.f32 %v1166_v1, %v1115_v31  ;;  %v1169_v41 = vadd.f32 %v1167_v50, %v1116_v34  ;;  %v1818_v17 = vld [vmem:[%s4705_s13 + $0x38] sm:$0xff] }
 0x27f   : > { %v4706_v0 = vstv %s3083_s16  ;;  %v4707_v51 = vstv %s2801_s15  ;;  %v1275_v31 = vstv %s3699_s19  ;;  %v1281_v34 = vstv %s3701_s29  ;;  %s4713_s16 = sld [smem:[#allocation152_spill]]  ;;  %s1892_s19 = scalar_lea.vmem %s3982_s20, 2560 }
 0x280   : > { %v3768_v55 = vmul.f32 %v1817_v9, %v4706_v0  ;;  %v3774_v29 = vmul.f32 %v4707_v51, %v1287_v16  ;;  %v4708_v58 = vmov %v4706_v0  ;;  %v4709_v10 = vstv %s2803_s24  ;;  %v3830_v0 = vpop.permute.xlu0 %1200  ;;  %p1893_p12 = scmp.ne.s32.totalorder %s3982_s20, %s1892_s19  ;;  %s1976_s29 = smov [#allocation9]  }
 0x281   : > { %v3779_v42 = vmul.f32 %v1818_v17, %v4708_v58  ;;  %v3785_v13 = vmul.f32 %v4709_v10, %v1287_v16  ;;  %v4710_v56 = vstv %s2812_s4  ;;  %v4711_v30 = vstv %s2814_s30  ;;  %4718 = vst [vmem:[#allocation76_spill] sm:$0xff] %v3830_v0  ;;  %s3900_s30 = sld [smem:[#allocation8 + $0x23]] }
 0x282   : > { %v3789_v49 = vmul.f32 %v4710_v56, %v1287_v16  ;;  %v3793_v44 = vmul.f32 %v4711_v30, %v1287_v16  ;;  %v3797_v52 = vmul.f32 %v1817_v9, %v1269_v57  ;;  %v3801_v47 = vmul.f32 %v1818_v17, %v1269_v57  ;;  %p1894_p0 = pnand %p1893_p12, %p4767_p5 }
 0x283   : > { %v3803_v62 = vmul.f32 %v1817_v9, %v1275_v31  ;;  %v3805_v8 = vmul.f32 %v1818_v17, %v1275_v31  ;;  %v3807_v36 = vmul.f32 %v1817_v9, %v1281_v34  ;;  %v3809_v28 = vmul.f32 %v1818_v17, %v1281_v34 }
 0x284   : > { %v1319_v15 = vstv %s3711_s23  ;;  %v1325_v11 = vstv %s3721_s6  ;;  %v1174_v1 = vsel %vm246_vm2, %v3628_v63, 0.0  ;;  %v4715_v50 = vstv %s2841_s14  ;;  %s4725_s14 = sld [smem:[#allocation144_spill]]  ;;  %p1895_p8 = pneg %p1894_p0 }
 0x285   : > { %v1179_v59 = vmul.f32 %v4715_v50, %v4714_v14  ;;  %v4716_v48 = vstv %s2843_s27  ;;  %v4717_v16 = vstv %s4712_s3  ;;  %v4719_v51 = vmov %v4715_v50  ;;  %s4724_s27 = sld [smem:[#allocation143_spill]]  ;;  %s1896_s23 = sshll.u32 %s1976_s29, 4  ;;  %s1897_s23 = int_to_ptr.vmem [resolvable:$false] %s1896_s23 }
 0x286   : > { %v1185_v7 = vmul.f32 %v4716_v48, %v4714_v14  ;;  %v1191_v9 = vmul.f32 %v4717_v16, %v4714_v14  ;;  %v1178_v17 = vmul.f32 %v4719_v51, %v1174_v1  ;;  %v4720_v58 = vmov %v4716_v48  ;;  %s1898_s6 = scalar_lea.vmem %s1897_s23, 5120  ;;  %p1899_p9 = scmp.lt.s32.totalorder %s3982_s20, %s1897_s23 }
 0x287   : > { %v1184_v31 = vmul.f32 %v4720_v58, %v1174_v1  ;;  %v4721_v34 = vmov %v4717_v16  ;;  %v4722_v63 = vstv %s4713_s16  ;;  %v1181_v50 = vadd.f32 %v1179_v59, %v1151_v24  ;;  %p1900_p10 = scmp.lt.s32.totalorder %s1898_s6, %s1892_s19 }
 0x288   : > { %v1190_v10 = vmul.f32 %v4721_v34, %v1174_v1  ;;  %v1196_v56 = vmul.f32 %v4722_v63, %v1174_v1  ;;  %v1187_v3 = vadd.f32 %v1185_v7, %v1157_v43  ;;  %v4723_v48 = vmov %v4722_v63 }
 0x289   : > { %v1197_v16 = vmul.f32 %v4723_v48, %v4714_v14  ;;  %v1180_v40 = vadd.f32 %v1178_v17, %v1150_v19  ;;  %v1186_v12 = vadd.f32 %v1184_v31, %v1156_v18  ;;  %v1193_v51 = vadd.f32 %v1191_v9, %v1163_v21  ;;  %p1901_p6 = por %p1900_p10, %p1899_p9 }
 0x28a   : > { %v1192_v57 = vadd.f32 %v1190_v10, %v1162_v33  ;;  %v1198_v46 = vadd.f32 %v1196_v56, %v1168_v22  ;;  %v1206_v34 = vrot.slane %v3830_v0, 7  ;;  %v1286_v24 = vsel %vm251_vm7, %v3830_v0, 0.0 }
 0x28b   : > { %v1199_v58 = vadd.f32 %v1197_v16, %v1169_v41  ;;  %v4726_v43 = vstv %s2801_s15  ;;  %v4727_v59 = vstv %s2803_s24  ;;  %v4729_v18 = vstv %s2812_s4  ;;  %s3902_s4 = sld [smem:[#allocation8 + $0x47]]  ;;  %s3908_s15 = sld [smem:[#allocation8 + $0x6b]] }
 0x28c   : > { %v1290_v1 = vmul.f32 %v4726_v43, %v1286_v24  ;;  %v1296_v19 = vmul.f32 %v4727_v59, %v1286_v24  ;;  %v1302_v33 = vmul.f32 %v4729_v18, %v1286_v24  ;;  %v1320_v21 = vmul.f32 %v1319_v15, %v3751_v35  ;;  %s3910_s24 = sld [smem:[#allocation8 + $0x8f]]  ;;  %p1902_p11 = pnand %p1901_p6, %p1895_p8 }
 0x28d   : > { %v1208_v22 = vsel %vm285_vm1, %v1206_v34, %v1207_v60  ;;  %v1209_v41 = vsel %vm285_vm1, %v1207_v60, %v1206_v34  ;;  %v4730_v14 = vmov %v4711_v30  ;;  %v1321_v9 = vmul.f32 %v1319_v15, %v3759_v25 }
 0x28e   : > { %v1308_v7 = vmul.f32 %v4730_v14, %v1286_v24  ;;  %v1210_v17 = vsel %vm3029_vm9, %v1209_v41, 0.0  ;;  %v1211_v31 = vsel %vm251_vm7, %v1208_v22, 0.0  ;;  %v1326_v10 = vmul.f32 %v1325_v11, %v3751_v35 }
 0x28f   : > { %v1327_v63 = vmul.f32 %v1325_v11, %v3759_v25  ;;  %v4731_v56 = vstv %s4724_s27  ;;  %v4733_v59 = vstv %s4725_s14  ;;  %v4735_v18 = vstv %s4728_s21 }
 0x290   : > { %v1214_v48 = vmul.f32 %v4731_v56, %v1210_v17  ;;  %v4732_v16 = vmov %v4731_v56  ;;  %v1220_v60 = vmul.f32 %v4733_v59, %v1210_v17  ;;  %v4734_v34 = vmov %v4733_v59 }
 0x291   : > { %v1215_v43 = vmul.f32 %v4732_v16, %v1211_v31  ;;  %v1221_v24 = vmul.f32 %v4734_v34, %v1211_v31  ;;  %v1226_v15 = vmul.f32 %v4735_v18, %v1210_v17  ;;  %v4736_v14 = vmov %v4735_v18 }
 0x292   : > { %v1227_v5 = vmul.f32 %v4736_v14, %v1211_v31  ;;  %v4737_v41 = vstv %s3081_s10  ;;  %v1216_v6 = vadd.f32 %v1214_v48, %v1180_v40  ;;  %v1222_v45 = vadd.f32 %v1220_v60, %v1186_v12  ;;  %s4756_s10 = sld [smem:[#allocation18_spill]] }
 0x293   : > { %v1232_v30 = vmul.f32 %v4737_v41, %v1210_v17  ;;  %v4738_v61 = vmov %v4737_v41  ;;  %v1217_v39 = vadd.f32 %v1215_v43, %v1181_v50  ;;  %v1223_v11 = vadd.f32 %v1221_v24, %v1187_v3 }
 0x294   : > { %v1233_v22 = vmul.f32 %v4738_v61, %v1211_v31  ;;  %v1228_v0 = vadd.f32 %v1226_v15, %v1192_v57  ;;  %v1229_v56 = vadd.f32 %v1227_v5, %v1193_v51  ;;  %v1242_v59 = vadd.f32 %v3696_v2, %v1216_v6 }
 0x295   : > { %v1234_v27 = vadd.f32 %v1232_v30, %v1198_v46  ;;  %v1243_v34 = vadd.f32 %v3656_v20, %v1217_v39  ;;  %v1248_v18 = vadd.f32 %v3739_v37, %v1222_v45  ;;  %v1249_v14 = vadd.f32 %v3660_v53, %v1223_v11 }
 0x296   : > { %v1235_v16 = vadd.f32 %v1233_v22, %v1199_v58  ;;  %v1254_v17 = vadd.f32 %v3743_v4, %v1228_v0  ;;  %v1255_v61 = vadd.f32 %v3664_v38, %v1229_v56  ;;  %v1266_v57 = vadd.f32 %v3768_v55, %v1242_v59 }
 0x297   : > { %v1260_v40 = vadd.f32 %v3747_v54, %v1234_v27  ;;  %v1267_v46 = vadd.f32 %v3779_v42, %v1243_v34  ;;  %v1272_v6 = vadd.f32 %v3797_v52, %v1248_v18  ;;  %v1273_v39 = vadd.f32 %v3801_v47, %v1249_v14 }
 0x298   : > { %v1261_v3 = vadd.f32 %v3674_v26, %v1235_v16  ;;  %v1278_v20 = vadd.f32 %v3803_v62, %v1254_v17  ;;  %v1279_v53 = vadd.f32 %v3805_v8, %v1255_v61  ;;  %v1292_v26 = vadd.f32 %v1290_v1, %v1266_v57  ;;  %s1747_s5 = smul.u32 2560, %s4756_s10 }
 0x299   : > { %v1284_v27 = vadd.f32 %v3807_v36, %v1260_v40  ;;  %v1293_v45 = vadd.f32 %v3774_v29, %v1267_v46  ;;  %v1298_v2 = vadd.f32 %v1296_v19, %v1272_v6  ;;  %v1299_v37 = vadd.f32 %v3785_v13, %v1273_v39 }
 0x29a   : > { %v1285_v38 = vadd.f32 %v3809_v28, %v1261_v3  ;;  %v1304_v4 = vadd.f32 %v1302_v33, %v1278_v20  ;;  %v1305_v54 = vadd.f32 %v3789_v49, %v1279_v53  ;;  %v1322_v52 = vadd.f32 %v1320_v21, %v1292_v26  ;;  %v4748_v21 = vld [vmem:[#allocation76_spill] sm:$0xff]  ;;  %v4759_v53 = vld [vmem:[#allocation73_spill] sm:$0xff]  ;;  %s3980_s22 = scalar_lea.hbm %s4765_s7, %s1747_s5 }
 0x29b   : > { %v1310_v55 = vadd.f32 %v1308_v7, %v1284_v27  ;;  %v1323_v47 = vadd.f32 %v1321_v9, %v1293_v45  ;;  %v1328_v62 = vadd.f32 %v1326_v10, %v1298_v2  ;;  %v4739_v8 = vstv %s3723_s18 }
 0x29c   : > { %v1311_v42 = vadd.f32 %v3793_v44, %v1285_v38  ;;  %v1332_v36 = vmul.f32 %v4739_v8, %v3751_v35  ;;  %v1329_v29 = vadd.f32 %v1327_v63, %v1299_v37  ;;  %v4740_v28 = vmov %v4739_v8 }
 0x29d   : > { %v1333_v13 = vmul.f32 %v4740_v28, %v3759_v25  ;;  %v4741_v49 = vstv %s3733_s17  ;;  %v4743_v50 = vrot.slane %v4661_v23, 1  ;;  %v4744_v51 = vrot.slane %v4659_v32, 1 }
 0x29e   : > { %v1338_v12 = vmul.f32 %v4741_v49, %v3751_v35  ;;  %v4742_v44 = vmov %v4741_v49  ;;  %v1334_v30 = vadd.f32 %v1332_v36, %v1304_v4  ;;  %v4750_v48 = vstv %s3735_s11 }
 0x29f   : > { %v1339_v0 = vmul.f32 %v4742_v44, %v3759_v25  ;;  %v1344_v1 = vsel %vm458_vm3, %v4744_v51, %v4743_v50  ;;  %v4746_v19 = vmov %v4744_v51  ;;  %v4747_v33 = vmov %v4743_v50 }
 0x2a0   : > { %v1345_v35 = vsel %vm458_vm3, %v4747_v33, %v4746_v19  ;;  %v1372_v25 = vrot.slane %v4748_v21, 1  ;;  %v1335_v7 = vadd.f32 %v1333_v13, %v1305_v54  ;;  %v1340_v9 = vadd.f32 %v1338_v12, %v1310_v55 }
 0x2a1   : > { %v1341_v31 = vadd.f32 %v1339_v0, %v1311_v42  ;;  %v1347_v63 = vsel %vm255_vm4, %v1345_v35, 0.0  ;;  %v1350_v43 = vmul.f32 %v4750_v48, %v1344_v1  ;;  %v4751_v60 = vmov %v4750_v48 }
 0x2a2   : > { %v1351_v32 = vmul.f32 %v4751_v60, %v1347_v63  ;;  %v4752_v24 = vstv %s3753_s8  ;;  %v4754_v41 = vstv %s3755_s12  ;;  %v4757_v16 = vstv %s3770_s1 }
 0x2a3   : > { %v1356_v23 = vmul.f32 %v4752_v24, %v1344_v1  ;;  %v4753_v15 = vmov %v4752_v24  ;;  %v1362_v22 = vmul.f32 %v4754_v41, %v1344_v1  ;;  %v4755_v11 = vmov %v4754_v41 }
 0x2a4   : > { %v1357_v5 = vmul.f32 %v4753_v15, %v1347_v63  ;;  %v1363_v56 = vmul.f32 %v4755_v11, %v1347_v63  ;;  %v1368_v59 = vmul.f32 %v4757_v16, %v1344_v1  ;;  %v4758_v34 = vmov %v4757_v16 }
 0x2a5   : > { %v1369_v18 = vmul.f32 %v4758_v34, %v1347_v63  ;;  %v1379_v14 = vstv %s3900_s30  ;;  %v1385_v17 = vstv %s3902_s4  ;;  %v1391_v61 = vstv %s3908_s15 }
 0x2a6   : > { %v1397_v40 = vstv %s3910_s24  ;;  %v1352_v3 = vadd.f32 %v1350_v43, %v1322_v52  ;;  %v1353_v57 = vadd.f32 %v1351_v32, %v1323_v47  ;;  %v1358_v46 = vadd.f32 %v1356_v23, %v1328_v62 }
 0x2a7   : > { %v1359_v6 = vadd.f32 %v1357_v5, %v1329_v29  ;;  %v1364_v39 = vadd.f32 %v1362_v22, %v1334_v30  ;;  %v1365_v20 = vadd.f32 %v1363_v56, %v1335_v7  ;;  %v4760_v27 = vrot.slane %v4759_v53, 1 }
 0x2a8   : > { %v1370_v2 = vadd.f32 %v1368_v59, %v1340_v9  ;;  %v1371_v37 = vadd.f32 %v1369_v18, %v1341_v31 }
 0x2a9   : > { %v1374_v38 = vsel %vm458_vm3, %v1372_v25, %v4760_v27  ;;  %v4761_v26 = vmov %v4760_v27 }
 0x2aa   : > { %v1375_v45 = vsel %vm458_vm3, %v4761_v26, %v1372_v25  ;;  %v1376_v54 = vsel %vm251_vm7, %v1374_v38, 0.0 }
 0x2ab   : > { %v1377_v42 = vsel %vm3119_vm11, %v1375_v45, 0.0  ;;  %v1380_v52 = vmul.f32 %v1379_v14, %v1376_v54  ;;  %v1386_v62 = vmul.f32 %v1385_v17, %v1376_v54  ;;  %v1392_v36 = vmul.f32 %v1391_v61, %v1376_v54 }
 0x2ac   : > { %v1381_v47 = vmul.f32 %v1379_v14, %v1377_v42  ;;  %v1387_v8 = vmul.f32 %v1385_v17, %v1377_v42  ;;  %v1393_v29 = vmul.f32 %v1391_v61, %v1377_v42  ;;  %v1398_v28 = vmul.f32 %v1397_v40, %v1376_v54 }
 0x2ad   : > { %v1399_v13 = vmul.f32 %v1397_v40, %v1377_v42  ;;  %v1382_v49 = vadd.f32 %v1380_v52, %v1352_v3  ;;  %v1388_v44 = vadd.f32 %v1386_v62, %v1358_v46  ;;  %v1394_v30 = vadd.f32 %v1392_v36, %v1364_v39 }
 0x2ae   : > { %v1383_v12 = vadd.f32 %v1381_v47, %v1353_v57  ;;  %v1389_v0 = vadd.f32 %v1387_v8, %v1359_v6  ;;  %v1395_v50 = vadd.f32 %v1393_v29, %v1365_v20  ;;  %v1400_v51 = vadd.f32 %v1398_v28, %v1370_v2 }
 0x2af   : > { %v1401_v58 = vadd.f32 %v1399_v13, %v1371_v37  ;;  %1403 = vst.msk [vmem:[%s3157_s0] sm:$0xff] %vm1402_vm10, %v1382_v49  ;;  %1721 = vst.msk [vmem:[%s3157_s0 + $0x10] sm:$0xff] %vm1402_vm10, %v1388_v44 }
 0x2b0   : > { %1404 = vst.msk [vmem:[%s3157_s0 + $0x8] sm:$0xff] %vm1402_vm10, %v1383_v12  ;;  %1722 = vst.msk [vmem:[%s3157_s0 + $0x18] sm:$0xff] %vm1402_vm10, %v1389_v0 }
 0x2b1   : > { %1723 = vst.msk [vmem:[%s3157_s0 + $0x20] sm:$0xff] %vm1402_vm10, %v1394_v30  ;;  %1724 = vst.msk [vmem:[%s3157_s0 + $0x28] sm:$0xff] %vm1402_vm10, %v1395_v50 }
 0x2b2   : > { %1725 = vst.msk [vmem:[%s3157_s0 + $0x30] sm:$0xff] %vm1402_vm10, %v1400_v51  ;;  %1726 = vst.msk [vmem:[%s3157_s0 + $0x38] sm:$0xff] %vm1402_vm10, %v1401_v58 }
 0x2b3   : > { %1905 = shalt.err (!%p1902_p11)
}
 0x2b4   : > { %s1906_s0 = scalar_lea.hbm %s3980_s22, 2560  ;;  %s1910_s11 = scalar_lea.hbm %s4765_s7, 5120 }
 0x2b5   : > { %p1907_p7 = scmp.ne.s32.totalorder %s3980_s22, %s1906_s0  ;;  %p1911_p1 = scmp.lt.u32.totalorder %s3980_s22, %s4765_s7 }
 0x2b6   : > { %p1912_p13 = scmp.lt.u32.totalorder %s1910_s11, %s1906_s0  ;;  %p1914_p12 = scmp.lt.u32.totalorder %s1906_s0, %s3980_s22 }
 0x2b7   : > { %p1908_p2 = pnand %p1907_p7, %p4767_p5 }
 0x2b8   : > { %p1913_p3 = por %p1912_p13, %p1911_p1 }
 0x2b9   : > { %p1909_p4 = pneg %p1908_p2 }
 0x2ba   : > { %p1915_p0 = por %p1914_p12, %p1913_p3 }
 0x2bc   : > { %p1916_p8 = pnand %p1915_p0, %p1909_p4 }
 0x2be   : > { %1919 = shalt.err (!%p1916_p8)
}
 0x2bf   : > { %s1977_s12 = smov 128   ;;  %s1978_s1 = smov 8  }
 0x2c0   : > { %1756 = dma.vmem_to_hbm [thread:$0]  (%p4767_p5), %s3982_s20, 2560, %s3980_s22, %s1440_s26, %s1977_s12, %s1977_s12, %s1978_s1  }
 0x2c1 PF: > { %s4768_s3 = sld [smem:[#allocation14_spill]]  ;;  %s4769_s16 = sld [smem:[#allocation22_spill]] }
 0x2c2   : > { %s4770_s27 = sld [smem:[#allocation17_spill]] }
 0x2c7   : > { %s1468_s14 = sand.u32 1, %s4768_s3   ;;  %p4771_p9 = scmp.ne.s32.totalorder %s4769_s16, 0 }
 0x2c8   : > { %p4772_p10 = scmp.ge.s32.totalorder %s4770_s27, 2  ;;  %s1469_s21 = scalar_lea.sflag [#allocation4], %s1468_s14 }
 0x2ca   : > { %p1770_p6 = pnand %p4772_p10, %p4771_p9 }
 0x2cc   : > { %1949 = dma.done.wait (!%p1770_p6), %s1469_s21, 2560  }
 0x2cd   : > { %1951 = vsyncadd (!%p1770_p6), %s1469_s21, 4294964736  ;;  %s4773_s15 = sld [smem:[#allocation19_spill]]  ;;  %s4774_s12 = sld [smem:[#allocation15_spill]] }
 0x2ce   : > { %s4775_s13 = sld [smem:[#allocation16_spill]]  ;;  %s4776_s14 = sld [smem:[#allocation20_spill]] }
 0x2d3   : > { %p20_p11 = scmp.ge.s32.totalorder %s4773_s15, 4  }
 0x2d5   :  { %22 = sbr.rel (!%p20_p11) target bundleno = 13 (0xd), region = 102 }
 0x2dc   :  { %1474 = vsyncpa [#allocation3], 1 }
 0x2dd   :  { %1476 = vsyncpa [#allocation3 + $0x1], 1 }
 0x2de   :  { %1477 = vsyncpa [#allocation7], 1 }
 0x2df   :  { %1479 = vsyncpa [#allocation7 + $0x1], 1 }
 0x2e0   :  { %1480 = vsyncpa [#allocation4], 1 }
 0x2e1   :  { %1482 = vsyncpa [#allocation4 + $0x1], 1 }
 0x2e2   :  { %1483 = vsyncpa [#allocation5], 1 }
 0x2e3   :  { %1485 = vsyncpa [#allocation5 + $0x1], 1 }

</bundles_post_ra>
